<compile_context>
chip_gen: v5e
topology: v5e:2x2
jax: 0.10.0
libtpu: 0.0.40
codegen_flags: <defaults>
</compile_context>

<pallas_src>
import jax
import jax.numpy as jnp
from jax.experimental import pallas as pl
from jax.experimental.pallas import tpu as pltpu

EPS = 1e-5
LANES = 128
MXU_DTYPE = jnp.bfloat16          # bf16 MXU path (v6e/v7x); jnp.float32 for exact f32.
VMEM_LIMIT = 32 * 1024 * 1024     # safe on v5e/v6e/v7x; raises v5e's 16 MiB default.


def _round_up(x, m):
    return (x + m - 1) // m * m


def _pow2_row_tile(rows, cap=2048):
    """Largest power-of-two row tile (<= cap) that divides `rows`."""
    t = 1
    while t * 2 <= cap and rows % (t * 2) == 0:
        t *= 2
    return t


# ----------------------------------------------------------------------------
# Pass 1: conv3x3 (im2col matmul) + partial BN statistics, one image per step.
# ----------------------------------------------------------------------------
def _conv3x3_im2col_kernel(x_ref, w_ref, conv_ref, stats_ref, pad_ref, col_ref):
    """x_ref    : (1, H, W, Cin_p)     channel-padded input image (f32)
       w_ref    : (9*Cin_p, Cout_p)    conv weight, 3x3 taps folded into K (bf16)
       conv_ref : (H*W, Cout_p)        conv output rows (f32)
       stats_ref: (1, 2, Cout_p)       per-image [sum, sum of squares]
       pad_ref  : VMEM (H+2, W+2, Cin_p) f32   zero-padded image (in-kernel halo)
       col_ref  : VMEM (H*W, 9*Cin_p)  MXU_DTYPE im2col matrix
    """
    _, H, W, Cin = x_ref.shape

    # Build the 1-pixel zero halo in VMEM (replaces wrapper jnp.pad HBM traffic).
    pad_ref[...] = jnp.zeros_like(pad_ref)
    pad_ref[1:H + 1, 1:W + 1, :] = x_ref[0]

    # im2col: each of the 9 shifted windows becomes a 128-lane-aligned column group.
    for dy in range(3):
        for dx in range(3):
            t = dy * 3 + dx
            patch = pad_ref[dy:dy + H, dx:dx + W, :].reshape(H * W, Cin)
            col_ref[:, t * Cin:(t + 1) * Cin] = patch.astype(MXU_DTYPE)

    # Single MXU matmul: (H*W, 9*Cin_p) x (9*Cin_p, Cout_p), f32 accumulation.
    y = jnp.dot(col_ref[...], w_ref[...], preferred_element_type=jnp.float32)
    conv_ref[...] = y

    # Partial batch-norm statistics for this image (reduced across batch outside).
    stats_ref[0, 0:1, :] = jnp.sum(y, axis=0, keepdims=True)
    stats_ref[0, 1:2, :] = jnp.sum(y * y, axis=0, keepdims=True)


def _conv3x3(x_nhwc_p, w_flat):
    """x_nhwc_p: (N, H, W, Cin_p) f32;  w_flat: (9*Cin_p, Cout_p) MXU_DTYPE."""
    N, H, W, Cin_p = x_nhwc_p.shape
    Cout_p = w_flat.shape[-1]
    conv, stats = pl.pallas_call(
        _conv3x3_im2col_kernel,
        grid=(N,),
        in_specs=[
            pl.BlockSpec((1, H, W, Cin_p), lambda n: (n, 0, 0, 0)),
            pl.BlockSpec((9 * Cin_p, Cout_p), lambda n: (0, 0)),
        ],
        out_specs=[
            pl.BlockSpec((H * W, Cout_p), lambda n: (n, 0)),
            pl.BlockSpec((1, 2, Cout_p), lambda n: (n, 0, 0)),
        ],
        out_shape=[
            jax.ShapeDtypeStruct((N * H * W, Cout_p), jnp.float32),
            jax.ShapeDtypeStruct((N, 2, Cout_p), jnp.float32),
        ],
        scratch_shapes=[
            pltpu.VMEM((H + 2, W + 2, Cin_p), jnp.float32),
            pltpu.VMEM((H * W, 9 * Cin_p), MXU_DTYPE),
        ],
        compiler_params=pltpu.CompilerParams(
            dimension_semantics=("parallel",),
            vmem_limit_bytes=VMEM_LIMIT),
    )(x_nhwc_p, w_flat)
    return conv, stats


# ----------------------------------------------------------------------------
# Pass 2: BN apply (+ optional residual) + ReLU over lane-dense row tiles.
# ----------------------------------------------------------------------------
def _bn_relu_kernel(conv_ref, scale_ref, shift_ref, o_ref):
    o_ref[...] = jnp.maximum(conv_ref[...] * scale_ref[...] + shift_ref[...], 0.0)


def _bn_add_relu_kernel(conv_ref, scale_ref, shift_ref, res_ref, o_ref):
    o_ref[...] = jnp.maximum(
        conv_ref[...] * scale_ref[...] + shift_ref[...] + res_ref[...], 0.0)


def _bn_apply(conv_rows, scale, shift, residual=None):
    R, Cp = conv_rows.shape
    tr = _pow2_row_tile(R)
    row_spec = pl.BlockSpec((tr, Cp), lambda i: (i, 0))
    vec_spec = pl.BlockSpec((1, Cp), lambda i: (0, 0))
    if residual is None:
        kernel = _bn_relu_kernel
        in_specs = [row_spec, vec_spec, vec_spec]
        args = (conv_rows, scale, shift)
    else:
        kernel = _bn_add_relu_kernel
        in_specs = [row_spec, vec_spec, vec_spec, row_spec]
        args = (conv_rows, scale, shift, residual)
    return pl.pallas_call(
        kernel,
        grid=(R // tr,),
        in_specs=in_specs,
        out_specs=row_spec,
        out_shape=jax.ShapeDtypeStruct((R, Cp), jnp.float32),
        compiler_params=pltpu.CompilerParams(
            dimension_semantics=("parallel",),
            vmem_limit_bytes=VMEM_LIMIT),
    )(*args)


# ----------------------------------------------------------------------------
# Wrapper-level helpers
# ----------------------------------------------------------------------------
def _bn_scale_shift(stats, gamma_p, beta_p, count):
    total = jnp.sum(stats, axis=0)                      # (2, Cp)
    mean = total[0] / count
    var = jnp.maximum(total[1] / count - mean * mean, 0.0)   # biased (training-mode) var
    scale = gamma_p * jax.lax.rsqrt(var + EPS)
    shift = beta_p - mean * scale
    return scale.reshape(1, -1), shift.reshape(1, -1)


def _pad_channels(a, c_new):
    pad = c_new - a.shape[-1]
    if pad == 0:
        return a.astype(jnp.float32)
    cfg = [(0, 0)] * (a.ndim - 1) + [(0, pad)]
    return jnp.pad(a.astype(jnp.float32), cfg)


def _prep_weight(w_hwio, cin_p, cout_p):
    kh, kw, cin, cout = w_hwio.shape
    w = jnp.zeros((kh, kw, cin_p, cout_p), jnp.float32)
    w = w.at[:, :, :cin, :cout].set(w_hwio.astype(jnp.float32))
    return w.reshape(kh * kw * cin_p, cout_p).astype(MXU_DTYPE)


@jax.jit
def basic_block_forward(x_nchw, params):
    """Pallas BasicBlock.forward (stride=1, downsample=None)."""
    x = jnp.transpose(x_nchw, (0, 2, 3, 1)).astype(jnp.float32)     # NCHW -> NHWC
    N, H, W, Cin = x.shape
    Cout = params["w1"].shape[-1]
    assert Cin == Cout, "downsample=None requires inplanes == planes"
    Cp = _round_up(Cout, LANES)
    count = N * H * W

    x_p = _pad_channels(x, Cp)                                       # lane-dense channels
    w1 = _prep_weight(params["w1"], Cp, Cp)
    w2 = _prep_weight(params["w2"], Cp, Cp)
    g1, b1 = _pad_channels(params["gamma1"], Cp), _pad_channels(params["beta1"], Cp)
    g2, b2 = _pad_channels(params["gamma2"], Cp), _pad_channels(params["beta2"], Cp)

    # out = relu(bn1(conv1(x)))
    conv1, st1 = _conv3x3(x_p, w1)
    s1, sh1 = _bn_scale_shift(st1, g1, b1, count)
    out1 = _bn_apply(conv1, s1, sh1)                                 # no zeros residual

    # out = relu(bn2(conv2(out)) + identity)
    conv2, st2 = _conv3x3(out1.reshape(N, H, W, Cp), w2)
    s2, sh2 = _bn_scale_shift(st2, g2, b2, count)
    out2 = _bn_apply(conv2, s2, sh2, residual=x_p.reshape(N * H * W, Cp))

    out = out2.reshape(N, H, W, Cp)[..., :Cout]
    return jnp.transpose(out, (0, 3, 1, 2))                          # NHWC -> NCHW


# ----------------------------------------------------------------------------
# Pure-JAX reference & test
# ----------------------------------------------------------------------------
def _reference_forward(x_nchw, params):
    x = jnp.transpose(x_nchw, (0, 2, 3, 1)).astype(jnp.float32)

    def conv(v, w):
        return jax.lax.conv_general_dilated(
            v, w, window_strides=(1, 1), padding="SAME",
            dimension_numbers=("NHWC", "HWIO", "NHWC"))

    def bn(v, g, b):
        mean = v.mean(axis=(0, 1, 2), keepdims=True)
        var = ((v - mean) ** 2).mean(axis=(0, 1, 2), keepdims=True)
        return (v - mean) / jnp.sqrt(var + EPS) * g.reshape(1, 1, 1, -1) + b.reshape(1, 1, 1, -1)

    out = jax.nn.relu(bn(conv(x, params["w1"]), params["gamma1"], params["beta1"]))
    out = bn(conv(out, params["w2"]), params["gamma2"], params["beta2"]) + x
    return jnp.transpose(jax.nn.relu(out), (0, 3, 1, 2))


def _init_params(key, inplanes, planes):
    k1, k2 = jax.random.split(key)
    std1 = (2.0 / (inplanes * 9)) ** 0.5
    std2 = (2.0 / (planes * 9)) ** 0.5
    return {
        # HWIO conv weights (generated directly in the kernel's layout).
        "w1": std1 * jax.random.normal(k1, (3, 3, inplanes, planes), jnp.float32),
        "w2": std2 * jax.random.normal(k2, (3, 3, planes, planes), jnp.float32),
        # PyTorch BatchNorm2d __init__ defaults: weight=1, bias=0.
        "gamma1": jnp.ones((planes,), jnp.float32),
        "beta1": jnp.zeros((planes,), jnp.float32),
        "gamma2": jnp.ones((planes,), jnp.float32),
        "beta2": jnp.zeros((planes,), jnp.float32),
    }


if __name__ == "__main__":
    key = jax.random.PRNGKey(0)
    kx, kp = jax.random.split(key)

    N, C, Hs, Ws = 2, 8, 16, 16          # inplanes == planes (downsample=None)
    x = jax.random.normal(kx, (N, C, Hs, Ws), jnp.float32)
    params = _init_params(kp, inplanes=C, planes=C)

    out = jax.block_until_ready(basic_block_forward(x, params))
    ref = _reference_forward(x, params)

    assert out.shape == (N, C, Hs, Ws)
    err = float(jnp.max(jnp.abs(out - ref)))
    # bf16 MXU operands (f32 accumulation) vs the pure-f32 reference.
    assert err < 7.5e-2, err

    print("KERNEL_OK")
</pallas_src>

<mosaic_0001>
module attributes {stable_mosaic.version = 11 : i64} {
  func.func @_conv3x3_im2col_kernel(%arg0: i32, %arg1: memref<1x16x16x128xf32, #tpu.memory_space<vmem>>, %arg2: memref<1152x128xbf16, #tpu.memory_space<vmem>>, %arg3: memref<256x128xf32, #tpu.memory_space<vmem>>, %arg4: memref<1x2x128xf32, #tpu.memory_space<vmem>>, %arg5: memref<18x18x128xf32, #tpu.memory_space<vmem>>, %arg6: memref<256x1152xbf16, #tpu.memory_space<vmem>>) attributes {dimension_semantics = [#tpu.dimension_semantics<parallel>], iteration_bounds = array<i64: 2>, scalar_prefetch = 0 : i64, scratch_operands = 2 : i64, tpu.core_type = #tpu.core_type<tc>, window_params = [{transform_indices = @transform_0, window_bounds = array<i64: 1, 16, 16, 128>}, {pipeline_mode = #tpu.pipeline_mode<synchronous>, transform_indices = @transform_1, window_bounds = array<i64: 1152, 128>}, {transform_indices = @transform_2, window_bounds = array<i64: 256, 128>}, {transform_indices = @transform_3, window_bounds = array<i64: 1, 2, 128>}]} {
    %cst = arith.constant 0.000000e+00 : f32
    %0 = vector.broadcast %cst : f32 to vector<18x18x128xf32>
    %c0 = arith.constant 0 : index
    %c0_0 = arith.constant 0 : index
    %c0_1 = arith.constant 0 : index
    %1 = vector.load %arg5[%c0, %c0_0, %c0_1] : memref<18x18x128xf32, #tpu.memory_space<vmem>>, vector<18x18x128xf32>
    tpu.vector_store %arg5[%c0, %c0_0, %c0_1], %0 {strides = array<i32>} : memref<18x18x128xf32, #tpu.memory_space<vmem>>, vector<18x18x128xf32>,
    %c0_2 = arith.constant 0 : index
    %c0_3 = arith.constant 0 : index
    %c0_4 = arith.constant 0 : index
    %c0_5 = arith.constant 0 : index
    %2 = vector.load %arg1[%c0_2, %c0_3, %c0_4, %c0_5] : memref<1x16x16x128xf32, #tpu.memory_space<vmem>>, vector<1x16x16x128xf32>
    %3 = vector.shape_cast %2 : vector<1x16x16x128xf32> to vector<16x16x128xf32>
    %c1 = arith.constant 1 : index
    %c1_6 = arith.constant 1 : index
    %c0_7 = arith.constant 0 : index
    %4 = vector.load %arg5[%c1, %c1_6, %c0_7] : memref<18x18x128xf32, #tpu.memory_space<vmem>>, vector<16x16x128xf32>
    tpu.vector_store %arg5[%c1, %c1_6, %c0_7], %3 {strides = array<i32>} : memref<18x18x128xf32, #tpu.memory_space<vmem>>, vector<16x16x128xf32>,
    %c0_8 = arith.constant 0 : index
    %c0_9 = arith.constant 0 : index
    %c0_10 = arith.constant 0 : index
    %5 = vector.load %arg5[%c0_8, %c0_9, %c0_10] : memref<18x18x128xf32, #tpu.memory_space<vmem>>, vector<16x16x128xf32>
    %6 = vector.shape_cast %5 : vector<16x16x128xf32> to vector<256x128xf32>
    %7 = arith.truncf %6 : vector<256x128xf32> to vector<256x128xbf16>
    %c0_11 = arith.constant 0 : index
    %c0_12 = arith.constant 0 : index
    %8 = vector.load %arg6[%c0_11, %c0_12] : memref<256x1152xbf16, #tpu.memory_space<vmem>>, vector<256x128xbf16>
    tpu.vector_store %arg6[%c0_11, %c0_12], %7 {strides = array<i32>} : memref<256x1152xbf16, #tpu.memory_space<vmem>>, vector<256x128xbf16>,
    %c0_13 = arith.constant 0 : index
    %c1_14 = arith.constant 1 : index
    %c0_15 = arith.constant 0 : index
    %9 = vector.load %arg5[%c0_13, %c1_14, %c0_15] : memref<18x18x128xf32, #tpu.memory_space<vmem>>, vector<16x16x128xf32>
    %10 = vector.shape_cast %9 : vector<16x16x128xf32> to vector<256x128xf32>
    %11 = arith.truncf %10 : vector<256x128xf32> to vector<256x128xbf16>
    %c0_16 = arith.constant 0 : index
    %c128 = arith.constant 128 : index
    %12 = vector.load %arg6[%c0_16, %c128] : memref<256x1152xbf16, #tpu.memory_space<vmem>>, vector<256x128xbf16>
    tpu.vector_store %arg6[%c0_16, %c128], %11 {strides = array<i32>} : memref<256x1152xbf16, #tpu.memory_space<vmem>>, vector<256x128xbf16>,
    %c0_17 = arith.constant 0 : index
    %c2 = arith.constant 2 : index
    %c0_18 = arith.constant 0 : index
    %13 = vector.load %arg5[%c0_17, %c2, %c0_18] : memref<18x18x128xf32, #tpu.memory_space<vmem>>, vector<16x16x128xf32>
    %14 = vector.shape_cast %13 : vector<16x16x128xf32> to vector<256x128xf32>
    %15 = arith.truncf %14 : vector<256x128xf32> to vector<256x128xbf16>
    %c0_19 = arith.constant 0 : index
    %c256 = arith.constant 256 : index
    %16 = vector.load %arg6[%c0_19, %c256] : memref<256x1152xbf16, #tpu.memory_space<vmem>>, vector<256x128xbf16>
    tpu.vector_store %arg6[%c0_19, %c256], %15 {strides = array<i32>} : memref<256x1152xbf16, #tpu.memory_space<vmem>>, vector<256x128xbf16>,
    %c1_20 = arith.constant 1 : index
    %c0_21 = arith.constant 0 : index
    %c0_22 = arith.constant 0 : index
    %17 = vector.load %arg5[%c1_20, %c0_21, %c0_22] : memref<18x18x128xf32, #tpu.memory_space<vmem>>, vector<16x16x128xf32>
    %18 = vector.shape_cast %17 : vector<16x16x128xf32> to vector<256x128xf32>
    %19 = arith.truncf %18 : vector<256x128xf32> to vector<256x128xbf16>
    %c0_23 = arith.constant 0 : index
    %c384 = arith.constant 384 : index
    %20 = vector.load %arg6[%c0_23, %c384] : memref<256x1152xbf16, #tpu.memory_space<vmem>>, vector<256x128xbf16>
    tpu.vector_store %arg6[%c0_23, %c384], %19 {strides = array<i32>} : memref<256x1152xbf16, #tpu.memory_space<vmem>>, vector<256x128xbf16>,
    %c1_24 = arith.constant 1 : index
    %c1_25 = arith.constant 1 : index
    %c0_26 = arith.constant 0 : index
    %21 = vector.load %arg5[%c1_24, %c1_25, %c0_26] : memref<18x18x128xf32, #tpu.memory_space<vmem>>, vector<16x16x128xf32>
    %22 = vector.shape_cast %21 : vector<16x16x128xf32> to vector<256x128xf32>
    %23 = arith.truncf %22 : vector<256x128xf32> to vector<256x128xbf16>
    %c0_27 = arith.constant 0 : index
    %c512 = arith.constant 512 : index
    %24 = vector.load %arg6[%c0_27, %c512] : memref<256x1152xbf16, #tpu.memory_space<vmem>>, vector<256x128xbf16>
    tpu.vector_store %arg6[%c0_27, %c512], %23 {strides = array<i32>} : memref<256x1152xbf16, #tpu.memory_space<vmem>>, vector<256x128xbf16>,
    %c1_28 = arith.constant 1 : index
    %c2_29 = arith.constant 2 : index
    %c0_30 = arith.constant 0 : index
    %25 = vector.load %arg5[%c1_28, %c2_29, %c0_30] : memref<18x18x128xf32, #tpu.memory_space<vmem>>, vector<16x16x128xf32>
    %26 = vector.shape_cast %25 : vector<16x16x128xf32> to vector<256x128xf32>
    %27 = arith.truncf %26 : vector<256x128xf32> to vector<256x128xbf16>
    %c0_31 = arith.constant 0 : index
    %c640 = arith.constant 640 : index
    %28 = vector.load %arg6[%c0_31, %c640] : memref<256x1152xbf16, #tpu.memory_space<vmem>>, vector<256x128xbf16>
    tpu.vector_store %arg6[%c0_31, %c640], %27 {strides = array<i32>} : memref<256x1152xbf16, #tpu.memory_space<vmem>>, vector<256x128xbf16>,
    %c2_32 = arith.constant 2 : index
    %c0_33 = arith.constant 0 : index
    %c0_34 = arith.constant 0 : index
    %29 = vector.load %arg5[%c2_32, %c0_33, %c0_34] : memref<18x18x128xf32, #tpu.memory_space<vmem>>, vector<16x16x128xf32>
    %30 = vector.shape_cast %29 : vector<16x16x128xf32> to vector<256x128xf32>
    %31 = arith.truncf %30 : vector<256x128xf32> to vector<256x128xbf16>
    %c0_35 = arith.constant 0 : index
    %c768 = arith.constant 768 : index
    %32 = vector.load %arg6[%c0_35, %c768] : memref<256x1152xbf16, #tpu.memory_space<vmem>>, vector<256x128xbf16>
    tpu.vector_store %arg6[%c0_35, %c768], %31 {strides = array<i32>} : memref<256x1152xbf16, #tpu.memory_space<vmem>>, vector<256x128xbf16>,
    %c2_36 = arith.constant 2 : index
    %c1_37 = arith.constant 1 : index
    %c0_38 = arith.constant 0 : index
    %33 = vector.load %arg5[%c2_36, %c1_37, %c0_38] : memref<18x18x128xf32, #tpu.memory_space<vmem>>, vector<16x16x128xf32>
    %34 = vector.shape_cast %33 : vector<16x16x128xf32> to vector<256x128xf32>
    %35 = arith.truncf %34 : vector<256x128xf32> to vector<256x128xbf16>
    %c0_39 = arith.constant 0 : index
    %c896 = arith.constant 896 : index
    %36 = vector.load %arg6[%c0_39, %c896] : memref<256x1152xbf16, #tpu.memory_space<vmem>>, vector<256x128xbf16>
    tpu.vector_store %arg6[%c0_39, %c896], %35 {strides = array<i32>} : memref<256x1152xbf16, #tpu.memory_space<vmem>>, vector<256x128xbf16>,
    %c2_40 = arith.constant 2 : index
    %c2_41 = arith.constant 2 : index
    %c0_42 = arith.constant 0 : index
    %37 = vector.load %arg5[%c2_40, %c2_41, %c0_42] : memref<18x18x128xf32, #tpu.memory_space<vmem>>, vector<16x16x128xf32>
    %38 = vector.shape_cast %37 : vector<16x16x128xf32> to vector<256x128xf32>
    %39 = arith.truncf %38 : vector<256x128xf32> to vector<256x128xbf16>
    %c0_43 = arith.constant 0 : index
    %c1024 = arith.constant 1024 : index
    %40 = vector.load %arg6[%c0_43, %c1024] : memref<256x1152xbf16, #tpu.memory_space<vmem>>, vector<256x128xbf16>
    tpu.vector_store %arg6[%c0_43, %c1024], %39 {strides = array<i32>} : memref<256x1152xbf16, #tpu.memory_space<vmem>>, vector<256x128xbf16>,
    %c0_44 = arith.constant 0 : index
    %c0_45 = arith.constant 0 : index
    %41 = vector.load %arg6[%c0_44, %c0_45] : memref<256x1152xbf16, #tpu.memory_space<vmem>>, vector<256x1152xbf16>
    %c0_46 = arith.constant 0 : index
    %c0_47 = arith.constant 0 : index
    %42 = vector.load %arg2[%c0_46, %c0_47] : memref<1152x128xbf16, #tpu.memory_space<vmem>>, vector<1152x128xbf16>
    %cst_48 = arith.constant dense<0.000000e+00> : vector<256x128xf32>
    %43 = tpu.matmul %41, %42, %cst_48 {dimension_numbers = #tpu.dot_dimension_numbers<[1], [0], [0], [1], [0, 0, 1, 1], [], []>} : vector<256x1152xbf16>, vector<1152x128xbf16>, vector<256x128xf32> -> vector<256x128xf32>
    %c0_49 = arith.constant 0 : index
    %c0_50 = arith.constant 0 : index
    %44 = vector.load %arg3[%c0_49, %c0_50] : memref<256x128xf32, #tpu.memory_space<vmem>>, vector<256x128xf32>
    tpu.vector_store %arg3[%c0_49, %c0_50], %43 {strides = array<i32>} : memref<256x128xf32, #tpu.memory_space<vmem>>, vector<256x128xf32>,
    %cst_51 = arith.constant dense<0.000000e+00> : vector<128xf32>
    %45 = vector.multi_reduction <add>, %43, %cst_51 [0] : vector<256x128xf32> to vector<128xf32>
    %46 = vector.shape_cast %45 : vector<128xf32> to vector<1x128xf32>
    %c0_52 = arith.constant 0 : index
    %c0_53 = arith.constant 0 : index
    %c0_54 = arith.constant 0 : index
    %47 = vector.load %arg4[%c0_52, %c0_53, %c0_54] : memref<1x2x128xf32, #tpu.memory_space<vmem>>, vector<1x1x128xf32>
    %48 = vector.shape_cast %47 : vector<1x1x128xf32> to vector<1x128xf32>
    %49 = vector.shape_cast %46 : vector<1x128xf32> to vector<1x1x128xf32>
    tpu.vector_store %arg4[%c0_52, %c0_53, %c0_54], %49 {strides = array<i32>} : memref<1x2x128xf32, #tpu.memory_space<vmem>>, vector<1x1x128xf32>,
    %50 = arith.mulf %43, %43 : vector<256x128xf32>
    %cst_55 = arith.constant dense<0.000000e+00> : vector<128xf32>
    %51 = vector.multi_reduction <add>, %50, %cst_55 [0] : vector<256x128xf32> to vector<128xf32>
    %52 = vector.shape_cast %51 : vector<128xf32> to vector<1x128xf32>
    %c0_56 = arith.constant 0 : index
    %c1_57 = arith.constant 1 : index
    %c0_58 = arith.constant 0 : index
    %53 = vector.load %arg4[%c0_56, %c1_57, %c0_58] : memref<1x2x128xf32, #tpu.memory_space<vmem>>, vector<1x1x128xf32>
    %54 = vector.shape_cast %53 : vector<1x1x128xf32> to vector<1x128xf32>
    %55 = vector.shape_cast %52 : vector<1x128xf32> to vector<1x1x128xf32>
    tpu.vector_store %arg4[%c0_56, %c1_57, %c0_58], %55 {strides = array<i32>} : memref<1x2x128xf32, #tpu.memory_space<vmem>>, vector<1x1x128xf32>,
    return
  }
  func.func @transform_0(%arg0: i32) -> (i32, i32, i32, i32) {
    %c0_i32 = arith.constant 0 : i32
    %c0_i32_0 = arith.constant 0 : i32
    %c0_i32_1 = arith.constant 0 : i32
    %c0_i32_2 = arith.constant 0 : i32
    return %arg0, %c0_i32, %c0_i32_0, %c0_i32_1 : i32, i32, i32, i32
  }
  func.func @transform_1(%arg0: i32) -> (i32, i32) {
    %c0_i32 = arith.constant 0 : i32
    %c0_i32_0 = arith.constant 0 : i32
    %c0_i32_1 = arith.constant 0 : i32
    return %c0_i32, %c0_i32_0 : i32, i32
  }
  func.func @transform_2(%arg0: i32) -> (i32, i32) {
    %c0_i32 = arith.constant 0 : i32
    %c0_i32_0 = arith.constant 0 : i32
    return %arg0, %c0_i32 : i32, i32
  }
  func.func @transform_3(%arg0: i32) -> (i32, i32, i32) {
    %c0_i32 = arith.constant 0 : i32
    %c0_i32_0 = arith.constant 0 : i32
    %c0_i32_1 = arith.constant 0 : i32
    return %arg0, %c0_i32, %c0_i32_0 : i32, i32, i32
  }
}

module attributes {stable_mosaic.version = 11 : i64} {
  func.func @_bn_add_relu_kernel(%arg0: i32, %arg1: memref<512x128xf32, #tpu.memory_space<vmem>>, %arg2: memref<1x128xf32, #tpu.memory_space<vmem>>, %arg3: memref<1x128xf32, #tpu.memory_space<vmem>>, %arg4: memref<512x128xf32, #tpu.memory_space<vmem>>, %arg5: memref<512x128xf32, #tpu.memory_space<vmem>>) attributes {dimension_semantics = [#tpu.dimension_semantics<parallel>], iteration_bounds = array<i64: 1>, scalar_prefetch = 0 : i64, scratch_operands = 0 : i64, tpu.core_type = #tpu.core_type<tc>, window_params = [{transform_indices = @transform_0, window_bounds = array<i64: 512, 128>}, {pipeline_mode = #tpu.pipeline_mode<synchronous>, transform_indices = @transform_1, window_bounds = array<i64: 1, 128>}, {pipeline_mode = #tpu.pipeline_mode<synchronous>, transform_indices = @transform_2, window_bounds = array<i64: 1, 128>}, {transform_indices = @transform_3, window_bounds = array<i64: 512, 128>}, {transform_indices = @transform_4, window_bounds = array<i64: 512, 128>}]} {
    %c0 = arith.constant 0 : index
    %c0_0 = arith.constant 0 : index
    %0 = vector.load %arg1[%c0, %c0_0] : memref<512x128xf32, #tpu.memory_space<vmem>>, vector<512x128xf32>
    %c0_1 = arith.constant 0 : index
    %c0_2 = arith.constant 0 : index
    %1 = vector.load %arg2[%c0_1, %c0_2] : memref<1x128xf32, #tpu.memory_space<vmem>>, vector<1x128xf32>
    %2 = vector.broadcast %1 : vector<1x128xf32> to vector<512x128xf32>
    %3 = arith.mulf %0, %2 : vector<512x128xf32>
    %c0_3 = arith.constant 0 : index
    %c0_4 = arith.constant 0 : index
    %4 = vector.load %arg3[%c0_3, %c0_4] : memref<1x128xf32, #tpu.memory_space<vmem>>, vector<1x128xf32>
    %5 = vector.broadcast %4 : vector<1x128xf32> to vector<512x128xf32>
    %6 = arith.addf %3, %5 : vector<512x128xf32>
    %c0_5 = arith.constant 0 : index
    %c0_6 = arith.constant 0 : index
    %7 = vector.load %arg4[%c0_5, %c0_6] : memref<512x128xf32, #tpu.memory_space<vmem>>, vector<512x128xf32>
    %8 = arith.addf %6, %7 : vector<512x128xf32>
    %cst = arith.constant 0.000000e+00 : f32
    %9 = vector.broadcast %cst : f32 to vector<512x128xf32>
    %10 = arith.maximumf %8, %9 : vector<512x128xf32>
    %c0_7 = arith.constant 0 : index
    %c0_8 = arith.constant 0 : index
    %11 = vector.load %arg5[%c0_7, %c0_8] : memref<512x128xf32, #tpu.memory_space<vmem>>, vector<512x128xf32>
    tpu.vector_store %arg5[%c0_7, %c0_8], %10 {strides = array<i32>} : memref<512x128xf32, #tpu.memory_space<vmem>>, vector<512x128xf32>,
    return
  }
  func.func @transform_0(%arg0: i32) -> (i32, i32) {
    %c0_i32 = arith.constant 0 : i32
    %c0_i32_0 = arith.constant 0 : i32
    return %arg0, %c0_i32 : i32, i32
  }
  func.func @transform_1(%arg0: i32) -> (i32, i32) {
    %c0_i32 = arith.constant 0 : i32
    %c0_i32_0 = arith.constant 0 : i32
    %c0_i32_1 = arith.constant 0 : i32
    return %c0_i32, %c0_i32_0 : i32, i32
  }
  func.func @transform_2(%arg0: i32) -> (i32, i32) {
    %c0_i32 = arith.constant 0 : i32
    %c0_i32_0 = arith.constant 0 : i32
    %c0_i32_1 = arith.constant 0 : i32
    return %c0_i32, %c0_i32_0 : i32, i32
  }
  func.func @transform_3(%arg0: i32) -> (i32, i32) {
    %c0_i32 = arith.constant 0 : i32
    %c0_i32_0 = arith.constant 0 : i32
    return %arg0, %c0_i32 : i32, i32
  }
  func.func @transform_4(%arg0: i32) -> (i32, i32) {
    %c0_i32 = arith.constant 0 : i32
    %c0_i32_0 = arith.constant 0 : i32
    return %arg0, %c0_i32 : i32, i32
  }
}

module attributes {stable_mosaic.version = 11 : i64} {
  func.func @_bn_relu_kernel(%arg0: i32, %arg1: memref<512x128xf32, #tpu.memory_space<vmem>>, %arg2: memref<1x128xf32, #tpu.memory_space<vmem>>, %arg3: memref<1x128xf32, #tpu.memory_space<vmem>>, %arg4: memref<512x128xf32, #tpu.memory_space<vmem>>) attributes {dimension_semantics = [#tpu.dimension_semantics<parallel>], iteration_bounds = array<i64: 1>, scalar_prefetch = 0 : i64, scratch_operands = 0 : i64, tpu.core_type = #tpu.core_type<tc>, window_params = [{transform_indices = @transform_0, window_bounds = array<i64: 512, 128>}, {pipeline_mode = #tpu.pipeline_mode<synchronous>, transform_indices = @transform_1, window_bounds = array<i64: 1, 128>}, {pipeline_mode = #tpu.pipeline_mode<synchronous>, transform_indices = @transform_2, window_bounds = array<i64: 1, 128>}, {transform_indices = @transform_3, window_bounds = array<i64: 512, 128>}]} {
    %c0 = arith.constant 0 : index
    %c0_0 = arith.constant 0 : index
    %0 = vector.load %arg1[%c0, %c0_0] : memref<512x128xf32, #tpu.memory_space<vmem>>, vector<512x128xf32>
    %c0_1 = arith.constant 0 : index
    %c0_2 = arith.constant 0 : index
    %1 = vector.load %arg2[%c0_1, %c0_2] : memref<1x128xf32, #tpu.memory_space<vmem>>, vector<1x128xf32>
    %2 = vector.broadcast %1 : vector<1x128xf32> to vector<512x128xf32>
    %3 = arith.mulf %0, %2 : vector<512x128xf32>
    %c0_3 = arith.constant 0 : index
    %c0_4 = arith.constant 0 : index
    %4 = vector.load %arg3[%c0_3, %c0_4] : memref<1x128xf32, #tpu.memory_space<vmem>>, vector<1x128xf32>
    %5 = vector.broadcast %4 : vector<1x128xf32> to vector<512x128xf32>
    %6 = arith.addf %3, %5 : vector<512x128xf32>
    %cst = arith.constant 0.000000e+00 : f32
    %7 = vector.broadcast %cst : f32 to vector<512x128xf32>
    %8 = arith.maximumf %6, %7 : vector<512x128xf32>
    %c0_5 = arith.constant 0 : index
    %c0_6 = arith.constant 0 : index
    %9 = vector.load %arg4[%c0_5, %c0_6] : memref<512x128xf32, #tpu.memory_space<vmem>>, vector<512x128xf32>
    tpu.vector_store %arg4[%c0_5, %c0_6], %8 {strides = array<i32>} : memref<512x128xf32, #tpu.memory_space<vmem>>, vector<512x128xf32>,
    return
  }
  func.func @transform_0(%arg0: i32) -> (i32, i32) {
    %c0_i32 = arith.constant 0 : i32
    %c0_i32_0 = arith.constant 0 : i32
    return %arg0, %c0_i32 : i32, i32
  }
  func.func @transform_1(%arg0: i32) -> (i32, i32) {
    %c0_i32 = arith.constant 0 : i32
    %c0_i32_0 = arith.constant 0 : i32
    %c0_i32_1 = arith.constant 0 : i32
    return %c0_i32, %c0_i32_0 : i32, i32
  }
  func.func @transform_2(%arg0: i32) -> (i32, i32) {
    %c0_i32 = arith.constant 0 : i32
    %c0_i32_0 = arith.constant 0 : i32
    %c0_i32_1 = arith.constant 0 : i32
    return %c0_i32, %c0_i32_0 : i32, i32
  }
  func.func @transform_3(%arg0: i32) -> (i32, i32) {
    %c0_i32 = arith.constant 0 : i32
    %c0_i32_0 = arith.constant 0 : i32
    return %arg0, %c0_i32 : i32, i32
  }
}

</mosaic_0001>

<bundles_post_ra>
// kernel: basic_block_forward.5
= control target key start
LH: loop header
LB: loop body
LE: loop exit
PB: predicated region body
PF: predicated region fallthrough
CT: control target
= control target key end

     0   :  { %s893_s0 = inlined_call_operand.vmem [shape: f32[512,128], index: 0, kind: input, shape index: {}]   ;;  %s894_s1 = inlined_call_operand.vmem [shape: f32[1,128], index: 1, kind: input, shape index: {}]   ;;  %s895_s2 = inlined_call_operand.vmem [shape: f32[1,128], index: 2, kind: input, shape index: {}]   ;;  %s896_s3 = inlined_call_operand.vmem [shape: f32[512,128], index: 3, kind: output, shape index: {}]  }
   0x1   :  { %v14_v0 = vld [vmem:[%s893_s0] sm:$0xff]  ;;  %v15_v3 = vld [vmem:[%s893_s0 + $0x8] sm:$0xff]  ;;  %v16_v6 = vld [vmem:[%s893_s0 + $0x10] sm:$0xff] }
   0x2   :  { %v374_v1 = vld [vmem:[%s894_s1] ss:$0 sm:$0xff]  ;;  %v17_v7 = vld [vmem:[%s893_s0 + $0x18] sm:$0xff]  ;;  %v19_v12 = vld [vmem:[%s893_s0 + $0x28] sm:$0xff] }
   0x3   :  { %v379_v2 = vld [vmem:[%s895_s2] ss:$0 sm:$0xff]  ;;  %v82_v4 = vmul.f32 %v374_v1, %v14_v0  ;;  %v83_v5 = vmul.f32 %v374_v1, %v15_v3  ;;  %v84_v9 = vmul.f32 %v374_v1, %v16_v6  ;;  %v85_v10 = vmul.f32 %v374_v1, %v17_v7  ;;  %v20_v13 = vld [vmem:[%s893_s0 + $0x30] sm:$0xff]  ;;  %v21_v14 = vld [vmem:[%s893_s0 + $0x38] sm:$0xff] }
   0x4   :  { %v18_v8 = vld [vmem:[%s893_s0 + $0x20] sm:$0xff]  ;;  %v87_v17 = vmul.f32 %v374_v1, %v19_v12  ;;  %v88_v18 = vmul.f32 %v374_v1, %v20_v13  ;;  %v89_v22 = vmul.f32 %v374_v1, %v21_v14  ;;  %v23_v24 = vld [vmem:[%s893_s0 + $0x48] sm:$0xff]  ;;  %v24_v29 = vld [vmem:[%s893_s0 + $0x50] sm:$0xff] }
   0x5   :  { %v86_v11 = vmul.f32 %v374_v1, %v18_v8  ;;  %v150_v15 = vadd.f32 %v379_v2, %v82_v4  ;;  %v151_v16 = vadd.f32 %v379_v2, %v83_v5  ;;  %v152_v19 = vadd.f32 %v379_v2, %v84_v9  ;;  %v22_v23 = vld [vmem:[%s893_s0 + $0x40] sm:$0xff]  ;;  %v25_v30 = vld [vmem:[%s893_s0 + $0x58] sm:$0xff]  ;;  %v27_v35 = vld [vmem:[%s893_s0 + $0x68] sm:$0xff] }
   0x6   :  { %v153_v20 = vadd.f32 %v379_v2, %v85_v10  ;;  %v155_v27 = vadd.f32 %v379_v2, %v87_v17  ;;  %v156_v28 = vadd.f32 %v379_v2, %v88_v18  ;;  %v26_v31 = vld [vmem:[%s893_s0 + $0x60] sm:$0xff]  ;;  %v157_v34 = vadd.f32 %v379_v2, %v89_v22  ;;  %v28_v36 = vld [vmem:[%s893_s0 + $0x70] sm:$0xff]  ;;  %v29_v41 = vld [vmem:[%s893_s0 + $0x78] sm:$0xff] }
   0x7   :  { %v154_v21 = vadd.f32 %v379_v2, %v86_v11  ;;  %v214_v25 = vmax.f32 %v150_v15, 0.0  ;;  %v215_v26 = vmax.f32 %v151_v16, 0.0  ;;  %v216_v32 = vmax.f32 %v152_v19, 0.0  ;;  %v30_v54 = vld [vmem:[%s893_s0 + $0x80] sm:$0xff]  ;;  %v31_v55 = vld [vmem:[%s893_s0 + $0x88] sm:$0xff]  ;;  %v32_v58 = vld [vmem:[%s893_s0 + $0x90] sm:$0xff] }
   0x8   :  { %v217_v33 = vmax.f32 %v153_v20, 0.0  ;;  %v219_v38 = vmax.f32 %v155_v27, 0.0  ;;  %v90_v39 = vmul.f32 %v374_v1, %v22_v23  ;;  %v91_v40 = vmul.f32 %v374_v1, %v23_v24  ;;  %v33_v59 = vld [vmem:[%s893_s0 + $0x98] sm:$0xff]  ;;  %v34_v62 = vld [vmem:[%s893_s0 + $0xa0] sm:$0xff]  ;;  %v35_v5 = vld [vmem:[%s893_s0 + $0xa8] sm:$0xff] }
   0x9   :  { %278 = vst [vmem:[%s896_s3] sm:$0xff] %v214_v25  ;;  %v218_v37 = vmax.f32 %v154_v21, 0.0  ;;  %v220_v42 = vmax.f32 %v156_v28, 0.0  ;;  %v92_v43 = vmul.f32 %v374_v1, %v24_v29  ;;  %v93_v44 = vmul.f32 %v374_v1, %v25_v30  ;;  %v36_v10 = vld [vmem:[%s893_s0 + $0xb0] sm:$0xff]  ;;  %v37_v14 = vld [vmem:[%s893_s0 + $0xb8] sm:$0xff]  ;;  %v38_v18 = vld [vmem:[%s893_s0 + $0xc0] sm:$0xff] }
   0xa   :  { %279 = vst [vmem:[%s896_s3 + $0x8] sm:$0xff] %v215_v26  ;;  %v94_v45 = vmul.f32 %v374_v1, %v26_v31  ;;  %v158_v46 = vadd.f32 %v379_v2, %v90_v39  ;;  %v159_v47 = vadd.f32 %v379_v2, %v91_v40  ;;  %v95_v48 = vmul.f32 %v374_v1, %v27_v35  ;;  %v39_v22 = vld [vmem:[%s893_s0 + $0xc8] sm:$0xff]  ;;  %v40_v26 = vld [vmem:[%s893_s0 + $0xd0] sm:$0xff]  ;;  %v41_v30 = vld [vmem:[%s893_s0 + $0xd8] sm:$0xff] }
   0xb   :  { %280 = vst [vmem:[%s896_s3 + $0x10] sm:$0xff] %v216_v32  ;;  %v96_v49 = vmul.f32 %v374_v1, %v28_v36  ;;  %v221_v50 = vmax.f32 %v157_v34, 0.0  ;;  %v160_v51 = vadd.f32 %v379_v2, %v92_v43  ;;  %v161_v52 = vadd.f32 %v379_v2, %v93_v44  ;;  %v42_v34 = vld [vmem:[%s893_s0 + $0xe0] sm:$0xff] }
   0xc   :  { %281 = vst [vmem:[%s896_s3 + $0x18] sm:$0xff] %v217_v33  ;;  %v97_v53 = vmul.f32 %v374_v1, %v29_v41  ;;  %v222_v56 = vmax.f32 %v158_v46, 0.0  ;;  %v162_v57 = vadd.f32 %v379_v2, %v94_v45  ;;  %v223_v60 = vmax.f32 %v159_v47, 0.0  ;;  %v45_v46 = vld [vmem:[%s893_s0 + $0xf8] sm:$0xff] }
   0xd   :  { %282 = vst [vmem:[%s896_s3 + $0x20] sm:$0xff] %v218_v37  ;;  %v163_v61 = vadd.f32 %v379_v2, %v95_v48  ;;  %v224_v63 = vmax.f32 %v160_v51, 0.0  ;;  %v164_v0 = vadd.f32 %v379_v2, %v96_v49  ;;  %v98_v3 = vmul.f32 %v374_v1, %v30_v54  ;;  %v47_v54 = vld [vmem:[%s893_s0 + $0x108] sm:$0xff] }
   0xe   :  { %283 = vst [vmem:[%s896_s3 + $0x28] sm:$0xff] %v219_v38  ;;  %v99_v4 = vmul.f32 %v374_v1, %v31_v55  ;;  %v225_v6 = vmax.f32 %v161_v52, 0.0  ;;  %v165_v7 = vadd.f32 %v379_v2, %v97_v53  ;;  %v100_v8 = vmul.f32 %v374_v1, %v32_v58  ;;  %v43_v38 = vld [vmem:[%s893_s0 + $0xe8] sm:$0xff]  ;;  %v48_v58 = vld [vmem:[%s893_s0 + $0x110] sm:$0xff] }
   0xf   :  { %284 = vst [vmem:[%s896_s3 + $0x30] sm:$0xff] %v220_v42  ;;  %v101_v9 = vmul.f32 %v374_v1, %v33_v59  ;;  %v226_v11 = vmax.f32 %v162_v57, 0.0  ;;  %v166_v12 = vadd.f32 %v379_v2, %v98_v3  ;;  %v102_v13 = vmul.f32 %v374_v1, %v34_v62  ;;  %v44_v42 = vld [vmem:[%s893_s0 + $0xf0] sm:$0xff]  ;;  %v49_v62 = vld [vmem:[%s893_s0 + $0x118] sm:$0xff] }
  0x10   :  { %285 = vst [vmem:[%s896_s3 + $0x38] sm:$0xff] %v221_v50  ;;  %v227_v15 = vmax.f32 %v163_v61, 0.0  ;;  %v167_v16 = vadd.f32 %v379_v2, %v99_v4  ;;  %v103_v17 = vmul.f32 %v374_v1, %v35_v5  ;;  %v228_v19 = vmax.f32 %v164_v0, 0.0  ;;  %v46_v50 = vld [vmem:[%s893_s0 + $0x100] sm:$0xff] }
  0x11   :  { %286 = vst [vmem:[%s896_s3 + $0x40] sm:$0xff] %v222_v56  ;;  %v168_v20 = vadd.f32 %v379_v2, %v100_v8  ;;  %v104_v21 = vmul.f32 %v374_v1, %v36_v10  ;;  %v229_v23 = vmax.f32 %v165_v7, 0.0  ;;  %v169_v24 = vadd.f32 %v379_v2, %v101_v9  ;;  %v50_v4 = vld [vmem:[%s893_s0 + $0x120] sm:$0xff]  ;;  %v51_v8 = vld [vmem:[%s893_s0 + $0x128] sm:$0xff] }
  0x12   :  { %287 = vst [vmem:[%s896_s3 + $0x48] sm:$0xff] %v223_v60  ;;  %v105_v25 = vmul.f32 %v374_v1, %v37_v14  ;;  %v230_v27 = vmax.f32 %v166_v12, 0.0  ;;  %v170_v28 = vadd.f32 %v379_v2, %v102_v13  ;;  %v106_v29 = vmul.f32 %v374_v1, %v38_v18  ;;  %v52_v12 = vld [vmem:[%s893_s0 + $0x130] sm:$0xff] }
  0x13   :  { %288 = vst [vmem:[%s896_s3 + $0x50] sm:$0xff] %v224_v63  ;;  %v231_v31 = vmax.f32 %v167_v16, 0.0  ;;  %v171_v32 = vadd.f32 %v379_v2, %v103_v17  ;;  %v107_v33 = vmul.f32 %v374_v1, %v39_v22  ;;  %v232_v35 = vmax.f32 %v168_v20, 0.0  ;;  %v53_v16 = vld [vmem:[%s893_s0 + $0x138] sm:$0xff]  ;;  %v54_v20 = vld [vmem:[%s893_s0 + $0x140] sm:$0xff] }
  0x14   :  { %289 = vst [vmem:[%s896_s3 + $0x58] sm:$0xff] %v225_v6  ;;  %v172_v36 = vadd.f32 %v379_v2, %v104_v21  ;;  %v108_v37 = vmul.f32 %v374_v1, %v40_v26  ;;  %v233_v39 = vmax.f32 %v169_v24, 0.0  ;;  %v173_v40 = vadd.f32 %v379_v2, %v105_v25  ;;  %v55_v24 = vld [vmem:[%s893_s0 + $0x148] sm:$0xff] }
  0x15   :  { %290 = vst [vmem:[%s896_s3 + $0x60] sm:$0xff] %v226_v11  ;;  %v109_v41 = vmul.f32 %v374_v1, %v41_v30  ;;  %v234_v43 = vmax.f32 %v170_v28, 0.0  ;;  %v174_v44 = vadd.f32 %v379_v2, %v106_v29  ;;  %v110_v45 = vmul.f32 %v374_v1, %v42_v34  ;;  %v56_v28 = vld [vmem:[%s893_s0 + $0x150] sm:$0xff] }
  0x16   :  { %291 = vst [vmem:[%s896_s3 + $0x68] sm:$0xff] %v227_v15  ;;  %v235_v47 = vmax.f32 %v171_v32, 0.0  ;;  %v175_v48 = vadd.f32 %v379_v2, %v107_v33  ;;  %v111_v49 = vmul.f32 %v374_v1, %v43_v38  ;;  %v236_v51 = vmax.f32 %v172_v36, 0.0  ;;  %v57_v32 = vld [vmem:[%s893_s0 + $0x158] sm:$0xff]  ;;  %v58_v36 = vld [vmem:[%s893_s0 + $0x160] sm:$0xff] }
  0x17   :  { %292 = vst [vmem:[%s896_s3 + $0x70] sm:$0xff] %v228_v19  ;;  %v176_v52 = vadd.f32 %v379_v2, %v108_v37  ;;  %v112_v53 = vmul.f32 %v374_v1, %v44_v42  ;;  %v237_v55 = vmax.f32 %v173_v40, 0.0  ;;  %v177_v56 = vadd.f32 %v379_v2, %v109_v41  ;;  %v59_v40 = vld [vmem:[%s893_s0 + $0x168] sm:$0xff] }
  0x18   :  { %293 = vst [vmem:[%s896_s3 + $0x78] sm:$0xff] %v229_v23  ;;  %v113_v57 = vmul.f32 %v374_v1, %v45_v46  ;;  %v238_v59 = vmax.f32 %v174_v44, 0.0  ;;  %v178_v60 = vadd.f32 %v379_v2, %v110_v45  ;;  %v114_v61 = vmul.f32 %v374_v1, %v46_v50  ;;  %v60_v44 = vld [vmem:[%s893_s0 + $0x170] sm:$0xff] }
  0x19   :  { %294 = vst [vmem:[%s896_s3 + $0x80] sm:$0xff] %v230_v27  ;;  %v239_v63 = vmax.f32 %v175_v48, 0.0  ;;  %v179_v0 = vadd.f32 %v379_v2, %v111_v49  ;;  %v115_v3 = vmul.f32 %v374_v1, %v47_v54  ;;  %v240_v5 = vmax.f32 %v176_v52, 0.0  ;;  %v61_v48 = vld [vmem:[%s893_s0 + $0x178] sm:$0xff]  ;;  %v62_v52 = vld [vmem:[%s893_s0 + $0x180] sm:$0xff] }
  0x1a   :  { %295 = vst [vmem:[%s896_s3 + $0x88] sm:$0xff] %v231_v31  ;;  %v180_v6 = vadd.f32 %v379_v2, %v112_v53  ;;  %v116_v7 = vmul.f32 %v374_v1, %v48_v58  ;;  %v241_v9 = vmax.f32 %v177_v56, 0.0  ;;  %v181_v10 = vadd.f32 %v379_v2, %v113_v57  ;;  %v63_v56 = vld [vmem:[%s893_s0 + $0x188] sm:$0xff] }
  0x1b   :  { %296 = vst [vmem:[%s896_s3 + $0x90] sm:$0xff] %v232_v35  ;;  %v117_v11 = vmul.f32 %v374_v1, %v49_v62  ;;  %v242_v13 = vmax.f32 %v178_v60, 0.0  ;;  %v182_v14 = vadd.f32 %v379_v2, %v114_v61  ;;  %v118_v15 = vmul.f32 %v374_v1, %v50_v4  ;;  %v64_v60 = vld [vmem:[%s893_s0 + $0x190] sm:$0xff] }
  0x1c   :  { %297 = vst [vmem:[%s896_s3 + $0x98] sm:$0xff] %v233_v39  ;;  %v243_v17 = vmax.f32 %v179_v0, 0.0  ;;  %v183_v18 = vadd.f32 %v379_v2, %v115_v3  ;;  %v119_v19 = vmul.f32 %v374_v1, %v51_v8  ;;  %v244_v21 = vmax.f32 %v180_v6, 0.0  ;;  %v65_v0 = vld [vmem:[%s893_s0 + $0x198] sm:$0xff] }
  0x1d   :  { %298 = vst [vmem:[%s896_s3 + $0xa0] sm:$0xff] %v234_v43  ;;  %v184_v22 = vadd.f32 %v379_v2, %v116_v7  ;;  %v120_v23 = vmul.f32 %v374_v1, %v52_v12  ;;  %v245_v25 = vmax.f32 %v181_v10, 0.0  ;;  %v185_v26 = vadd.f32 %v379_v2, %v117_v11  ;;  %v77_v3 = vld [vmem:[%s893_s0 + $0x1f8] sm:$0xff]  ;;  %v66_v7 = vld [vmem:[%s893_s0 + $0x1a0] sm:$0xff]  ;;  %v67_v11 = vld [vmem:[%s893_s0 + $0x1a8] sm:$0xff] }
  0x1e   :  { %299 = vst [vmem:[%s896_s3 + $0xa8] sm:$0xff] %v235_v47  ;;  %v121_v27 = vmul.f32 %v374_v1, %v53_v16  ;;  %v246_v29 = vmax.f32 %v182_v14, 0.0  ;;  %v186_v30 = vadd.f32 %v379_v2, %v118_v15  ;;  %v122_v31 = vmul.f32 %v374_v1, %v54_v20  ;;  %v68_v15 = vld [vmem:[%s893_s0 + $0x1b0] sm:$0xff]  ;;  %v69_v20 = vld [vmem:[%s893_s0 + $0x1b8] sm:$0xff] }
  0x1f   :  { %300 = vst [vmem:[%s896_s3 + $0xb0] sm:$0xff] %v236_v51  ;;  %v247_v33 = vmax.f32 %v183_v18, 0.0  ;;  %v187_v34 = vadd.f32 %v379_v2, %v119_v19  ;;  %v123_v35 = vmul.f32 %v374_v1, %v55_v24  ;;  %v248_v37 = vmax.f32 %v184_v22, 0.0  ;;  %v70_v24 = vld [vmem:[%s893_s0 + $0x1c0] sm:$0xff] }
  0x20   :  { %301 = vst [vmem:[%s896_s3 + $0xb8] sm:$0xff] %v237_v55  ;;  %v188_v38 = vadd.f32 %v379_v2, %v120_v23  ;;  %v124_v39 = vmul.f32 %v374_v1, %v56_v28  ;;  %v249_v41 = vmax.f32 %v185_v26, 0.0  ;;  %v189_v42 = vadd.f32 %v379_v2, %v121_v27 }
  0x21   :  { %302 = vst [vmem:[%s896_s3 + $0xc0] sm:$0xff] %v238_v59  ;;  %v125_v43 = vmul.f32 %v374_v1, %v57_v32  ;;  %v250_v45 = vmax.f32 %v186_v30, 0.0  ;;  %v190_v46 = vadd.f32 %v379_v2, %v122_v31  ;;  %v126_v47 = vmul.f32 %v374_v1, %v58_v36 }
  0x22   :  { %303 = vst [vmem:[%s896_s3 + $0xc8] sm:$0xff] %v239_v63  ;;  %v251_v49 = vmax.f32 %v187_v34, 0.0  ;;  %v191_v50 = vadd.f32 %v379_v2, %v123_v35  ;;  %v127_v51 = vmul.f32 %v374_v1, %v59_v40  ;;  %v252_v53 = vmax.f32 %v188_v38, 0.0 }
  0x23   :  { %304 = vst [vmem:[%s896_s3 + $0xd0] sm:$0xff] %v240_v5  ;;  %v192_v54 = vadd.f32 %v379_v2, %v124_v39  ;;  %v128_v55 = vmul.f32 %v374_v1, %v60_v44  ;;  %v253_v57 = vmax.f32 %v189_v42, 0.0  ;;  %v193_v58 = vadd.f32 %v379_v2, %v125_v43 }
  0x24   :  { %305 = vst [vmem:[%s896_s3 + $0xd8] sm:$0xff] %v241_v9  ;;  %v129_v59 = vmul.f32 %v374_v1, %v61_v48  ;;  %v254_v61 = vmax.f32 %v190_v46, 0.0  ;;  %v194_v62 = vadd.f32 %v379_v2, %v126_v47  ;;  %v130_v63 = vmul.f32 %v374_v1, %v62_v52 }
  0x25   :  { %306 = vst [vmem:[%s896_s3 + $0xe0] sm:$0xff] %v242_v13  ;;  %v255_v4 = vmax.f32 %v191_v50, 0.0  ;;  %v195_v5 = vadd.f32 %v379_v2, %v127_v51  ;;  %v131_v6 = vmul.f32 %v374_v1, %v63_v56  ;;  %v256_v8 = vmax.f32 %v192_v54, 0.0 }
  0x26   :  { %307 = vst [vmem:[%s896_s3 + $0xe8] sm:$0xff] %v243_v17  ;;  %v196_v9 = vadd.f32 %v379_v2, %v128_v55  ;;  %v132_v10 = vmul.f32 %v374_v1, %v64_v60  ;;  %v257_v12 = vmax.f32 %v193_v58, 0.0  ;;  %v197_v13 = vadd.f32 %v379_v2, %v129_v59 }
  0x27   :  { %308 = vst [vmem:[%s896_s3 + $0xf0] sm:$0xff] %v244_v21  ;;  %v133_v14 = vmul.f32 %v374_v1, %v65_v0  ;;  %v145_v16 = vmul.f32 %v374_v1, %v77_v3  ;;  %v258_v17 = vmax.f32 %v194_v62, 0.0  ;;  %v198_v18 = vadd.f32 %v379_v2, %v130_v63 }
  0x28   :  { %309 = vst [vmem:[%s896_s3 + $0xf8] sm:$0xff] %v245_v25  ;;  %v134_v19 = vmul.f32 %v374_v1, %v66_v7  ;;  %v259_v21 = vmax.f32 %v195_v5, 0.0  ;;  %v199_v22 = vadd.f32 %v379_v2, %v131_v6  ;;  %v135_v23 = vmul.f32 %v374_v1, %v67_v11 }
  0x29   :  { %310 = vst [vmem:[%s896_s3 + $0x100] sm:$0xff] %v246_v29  ;;  %v784_v25 = vadd.f32 %v379_v2, %v145_v16  ;;  %v260_v26 = vmax.f32 %v196_v9, 0.0  ;;  %v200_v27 = vadd.f32 %v379_v2, %v132_v10  ;;  %v136_v28 = vmul.f32 %v374_v1, %v68_v15  ;;  %v71_v29 = vld [vmem:[%s893_s0 + $0x1c8] sm:$0xff] }
  0x2a   :  { %311 = vst [vmem:[%s896_s3 + $0x108] sm:$0xff] %v247_v33  ;;  %v261_v30 = vmax.f32 %v197_v13, 0.0  ;;  %v201_v31 = vadd.f32 %v379_v2, %v133_v14  ;;  %v137_v32 = vmul.f32 %v374_v1, %v69_v20  ;;  %v72_v33 = vld [vmem:[%s893_s0 + $0x1d0] sm:$0xff]  ;;  %v262_v34 = vmax.f32 %v198_v18, 0.0 }
  0x2b   :  { %312 = vst [vmem:[%s896_s3 + $0x110] sm:$0xff] %v248_v37  ;;  %v202_v35 = vadd.f32 %v379_v2, %v134_v19  ;;  %v138_v36 = vmul.f32 %v374_v1, %v70_v24  ;;  %v73_v37 = vld [vmem:[%s893_s0 + $0x1d8] sm:$0xff]  ;;  %v263_v38 = vmax.f32 %v199_v22, 0.0  ;;  %v203_v39 = vadd.f32 %v379_v2, %v135_v23 }
  0x2c   :  { %313 = vst [vmem:[%s896_s3 + $0x118] sm:$0xff] %v249_v41  ;;  %v139_v40 = vmul.f32 %v374_v1, %v71_v29  ;;  %v74_v41 = vld [vmem:[%s893_s0 + $0x1e0] sm:$0xff]  ;;  %v264_v42 = vmax.f32 %v200_v27, 0.0  ;;  %v204_v43 = vadd.f32 %v379_v2, %v136_v28  ;;  %v140_v44 = vmul.f32 %v374_v1, %v72_v33 }
  0x2d   :  { %314 = vst [vmem:[%s896_s3 + $0x120] sm:$0xff] %v250_v45  ;;  %v75_v45 = vld [vmem:[%s893_s0 + $0x1e8] sm:$0xff]  ;;  %v265_v46 = vmax.f32 %v201_v31, 0.0  ;;  %v205_v47 = vadd.f32 %v379_v2, %v137_v32  ;;  %v141_v48 = vmul.f32 %v374_v1, %v73_v37  ;;  %v266_v50 = vmax.f32 %v202_v35, 0.0 }
  0x2e   :  { %315 = vst [vmem:[%s896_s3 + $0x128] sm:$0xff] %v251_v49  ;;  %v76_v49 = vld [vmem:[%s893_s0 + $0x1f0] sm:$0xff]  ;;  %v206_v51 = vadd.f32 %v379_v2, %v138_v36  ;;  %v142_v52 = vmul.f32 %v374_v1, %v74_v41  ;;  %v207_v54 = vadd.f32 %v379_v2, %v139_v40  ;;  %v143_v55 = vmul.f32 %v374_v1, %v75_v45 }
  0x2f   :  { %316 = vst [vmem:[%s896_s3 + $0x130] sm:$0xff] %v252_v53  ;;  %v267_v53 = vmax.f32 %v203_v39, 0.0  ;;  %v268_v56 = vmax.f32 %v204_v43, 0.0  ;;  %v144_v58 = vmul.f32 %v374_v1, %v76_v49  ;;  %v269_v59 = vmax.f32 %v205_v47, 0.0 }
  0x30   :  { %317 = vst [vmem:[%s896_s3 + $0x138] sm:$0xff] %v253_v57  ;;  %v208_v57 = vadd.f32 %v379_v2, %v140_v44  ;;  %v209_v60 = vadd.f32 %v379_v2, %v141_v48  ;;  %v210_v62 = vadd.f32 %v379_v2, %v142_v52  ;;  %v271_v63 = vmax.f32 %v207_v54, 0.0 }
  0x31   :  { %318 = vst [vmem:[%s896_s3 + $0x140] sm:$0xff] %v254_v61  ;;  %v270_v61 = vmax.f32 %v206_v51, 0.0  ;;  %v211_v1 = vadd.f32 %v379_v2, %v143_v55  ;;  %v212_v3 = vadd.f32 %v379_v2, %v144_v58  ;;  %v277_v7 = vmax.f32 %v784_v25, 0.0 }
  0x32   :  { %319 = vst [vmem:[%s896_s3 + $0x148] sm:$0xff] %v255_v4  ;;  %v272_v0 = vmax.f32 %v208_v57, 0.0  ;;  %v273_v4 = vmax.f32 %v209_v60, 0.0  ;;  %v274_v5 = vmax.f32 %v210_v62, 0.0 }
  0x33   :  { %320 = vst [vmem:[%s896_s3 + $0x150] sm:$0xff] %v256_v8  ;;  %v275_v6 = vmax.f32 %v211_v1, 0.0  ;;  %v276_v2 = vmax.f32 %v212_v3, 0.0 }
  0x34   :  { %321 = vst [vmem:[%s896_s3 + $0x158] sm:$0xff] %v257_v12 }
  0x35   :  { %322 = vst [vmem:[%s896_s3 + $0x160] sm:$0xff] %v258_v17 }
  0x36   :  { %323 = vst [vmem:[%s896_s3 + $0x168] sm:$0xff] %v259_v21 }
  0x37   :  { %324 = vst [vmem:[%s896_s3 + $0x170] sm:$0xff] %v260_v26 }
  0x38   :  { %325 = vst [vmem:[%s896_s3 + $0x178] sm:$0xff] %v261_v30 }
  0x39   :  { %326 = vst [vmem:[%s896_s3 + $0x180] sm:$0xff] %v262_v34 }
  0x3a   :  { %327 = vst [vmem:[%s896_s3 + $0x188] sm:$0xff] %v263_v38 }
  0x3b   :  { %328 = vst [vmem:[%s896_s3 + $0x190] sm:$0xff] %v264_v42 }
  0x3c   :  { %329 = vst [vmem:[%s896_s3 + $0x198] sm:$0xff] %v265_v46 }
  0x3d   :  { %330 = vst [vmem:[%s896_s3 + $0x1a0] sm:$0xff] %v266_v50 }
  0x3e   :  { %331 = vst [vmem:[%s896_s3 + $0x1a8] sm:$0xff] %v267_v53 }
  0x3f   :  { %332 = vst [vmem:[%s896_s3 + $0x1b0] sm:$0xff] %v268_v56 }
  0x40   :  { %333 = vst [vmem:[%s896_s3 + $0x1b8] sm:$0xff] %v269_v59 }
  0x41   :  { %334 = vst [vmem:[%s896_s3 + $0x1c0] sm:$0xff] %v270_v61 }
  0x42   :  { %335 = vst [vmem:[%s896_s3 + $0x1c8] sm:$0xff] %v271_v63 }
  0x43   :  { %336 = vst [vmem:[%s896_s3 + $0x1d0] sm:$0xff] %v272_v0 }
  0x44   :  { %337 = vst [vmem:[%s896_s3 + $0x1d8] sm:$0xff] %v273_v4 }
  0x45   :  { %338 = vst [vmem:[%s896_s3 + $0x1e0] sm:$0xff] %v274_v5 }
  0x46   :  { %339 = vst [vmem:[%s896_s3 + $0x1e8] sm:$0xff] %v275_v6 }
  0x47   :  { %340 = vst [vmem:[%s896_s3 + $0x1f0] sm:$0xff] %v276_v2 }
  0x48   :  { %341 = vst [vmem:[%s896_s3 + $0x1f8] sm:$0xff] %v277_v7 }

// kernel: basic_block_forward.7
= control target key start
LH: loop header
LB: loop body
LE: loop exit
PB: predicated region body
PF: predicated region fallthrough
CT: control target
= control target key end

     0   :  { %s1218_s0 = inlined_call_operand.vmem [shape: f32[512,128], index: 0, kind: input, shape index: {}]   ;;  %s1219_s1 = inlined_call_operand.vmem [shape: f32[1,128], index: 1, kind: input, shape index: {}]   ;;  %s1220_s2 = inlined_call_operand.vmem [shape: f32[1,128], index: 2, kind: input, shape index: {}]   ;;  %s1221_s3 = inlined_call_operand.vmem [shape: f32[512,128], index: 3, kind: input, shape index: {}]   ;;  %s1222_s4 = inlined_call_operand.vmem [shape: f32[512,128], index: 4, kind: output, shape index: {}]  }
   0x1   :  { %v17_v0 = vld [vmem:[%s1218_s0] sm:$0xff]  ;;  %v18_v4 = vld [vmem:[%s1218_s0 + $0x8] sm:$0xff]  ;;  %v19_v5 = vld [vmem:[%s1218_s0 + $0x10] sm:$0xff] }
   0x2   :  { %v510_v1 = vld [vmem:[%s1219_s1] ss:$0 sm:$0xff]  ;;  %v218_v8 = vld [vmem:[%s1221_s3 + $0x8] sm:$0xff]  ;;  %v20_v10 = vld [vmem:[%s1218_s0 + $0x18] sm:$0xff] }
   0x3   :  { %v515_v2 = vld [vmem:[%s1220_s2] ss:$0 sm:$0xff]  ;;  %v85_v3 = vmul.f32 %v510_v1, %v17_v0  ;;  %v86_v7 = vmul.f32 %v510_v1, %v18_v4  ;;  %v87_v9 = vmul.f32 %v510_v1, %v19_v5  ;;  %v219_v12 = vld [vmem:[%s1221_s3 + $0x10] sm:$0xff]  ;;  %v88_v13 = vmul.f32 %v510_v1, %v20_v10  ;;  %v22_v15 = vld [vmem:[%s1218_s0 + $0x28] sm:$0xff] }
   0x4   :  { %v217_v6 = vld [vmem:[%s1221_s3] sm:$0xff]  ;;  %v220_v18 = vld [vmem:[%s1221_s3 + $0x18] sm:$0xff]  ;;  %v90_v20 = vmul.f32 %v510_v1, %v22_v15  ;;  %v23_v21 = vld [vmem:[%s1218_s0 + $0x30] sm:$0xff] }
   0x5   :  { %v153_v11 = vadd.f32 %v515_v2, %v85_v3  ;;  %v21_v14 = vld [vmem:[%s1218_s0 + $0x20] sm:$0xff]  ;;  %v154_v16 = vadd.f32 %v515_v2, %v86_v7  ;;  %v155_v17 = vadd.f32 %v515_v2, %v87_v9  ;;  %v156_v23 = vadd.f32 %v515_v2, %v88_v13  ;;  %v222_v25 = vld [vmem:[%s1221_s3 + $0x28] sm:$0xff]  ;;  %v24_v27 = vld [vmem:[%s1218_s0 + $0x38] sm:$0xff] }
   0x6   :  { %v89_v19 = vmul.f32 %v510_v1, %v21_v14  ;;  %v221_v24 = vld [vmem:[%s1221_s3 + $0x20] sm:$0xff]  ;;  %v91_v26 = vmul.f32 %v510_v1, %v23_v21  ;;  %v158_v31 = vadd.f32 %v515_v2, %v90_v20  ;;  %v223_v32 = vld [vmem:[%s1221_s3 + $0x30] sm:$0xff]  ;;  %v92_v37 = vmul.f32 %v510_v1, %v24_v27  ;;  %v26_v38 = vld [vmem:[%s1218_s0 + $0x48] sm:$0xff] }
   0x7   :  { %v281_v22 = vadd.f32 %v217_v6, %v153_v11  ;;  %v282_v28 = vadd.f32 %v218_v8, %v154_v16  ;;  %v283_v29 = vadd.f32 %v219_v12, %v155_v17  ;;  %v25_v33 = vld [vmem:[%s1218_s0 + $0x40] sm:$0xff]  ;;  %v284_v35 = vadd.f32 %v220_v18, %v156_v23  ;;  %v27_v39 = vld [vmem:[%s1218_s0 + $0x50] sm:$0xff]  ;;  %v224_v44 = vld [vmem:[%s1221_s3 + $0x38] sm:$0xff] }
   0x8   :  { %v157_v30 = vadd.f32 %v515_v2, %v89_v19  ;;  %v159_v36 = vadd.f32 %v515_v2, %v91_v26  ;;  %v286_v43 = vadd.f32 %v222_v25, %v158_v31  ;;  %v28_v45 = vld [vmem:[%s1218_s0 + $0x58] sm:$0xff]  ;;  %v160_v48 = vadd.f32 %v515_v2, %v92_v37  ;;  %v29_v50 = vld [vmem:[%s1218_s0 + $0x60] sm:$0xff]  ;;  %v30_v51 = vld [vmem:[%s1218_s0 + $0x68] sm:$0xff] }
   0x9   :  { %v345_v34 = vmax.f32 %v281_v22, 0.0  ;;  %v346_v40 = vmax.f32 %v282_v28, 0.0  ;;  %v347_v41 = vmax.f32 %v283_v29, 0.0  ;;  %v348_v46 = vmax.f32 %v284_v35, 0.0  ;;  %v225_v54 = vld [vmem:[%s1221_s3 + $0x40] sm:$0xff]  ;;  %v31_v57 = vld [vmem:[%s1218_s0 + $0x70] sm:$0xff] }
   0xa   :  { %v285_v42 = vadd.f32 %v221_v24, %v157_v30  ;;  %v287_v47 = vadd.f32 %v223_v32, %v159_v36  ;;  %v93_v49 = vmul.f32 %v510_v1, %v25_v33  ;;  %v350_v53 = vmax.f32 %v286_v43, 0.0  ;;  %v226_v61 = vld [vmem:[%s1221_s3 + $0x48] sm:$0xff]  ;;  %v227_v62 = vld [vmem:[%s1221_s3 + $0x50] sm:$0xff]  ;;  %v228_v4 = vld [vmem:[%s1221_s3 + $0x58] sm:$0xff] }
   0xb   :  { %409 = vst [vmem:[%s1222_s4] sm:$0xff] %v345_v34  ;;  %v94_v55 = vmul.f32 %v510_v1, %v26_v38  ;;  %v95_v56 = vmul.f32 %v510_v1, %v27_v39  ;;  %v288_v59 = vadd.f32 %v224_v44, %v160_v48  ;;  %v96_v63 = vmul.f32 %v510_v1, %v28_v45  ;;  %v32_v7 = vld [vmem:[%s1218_s0 + $0x78] sm:$0xff]  ;;  %v229_v11 = vld [vmem:[%s1221_s3 + $0x60] sm:$0xff]  ;;  %v230_v12 = vld [vmem:[%s1221_s3 + $0x68] sm:$0xff] }
   0xc   :  { %410 = vst [vmem:[%s1222_s4 + $0x8] sm:$0xff] %v346_v40  ;;  %v349_v52 = vmax.f32 %v285_v42, 0.0  ;;  %v351_v58 = vmax.f32 %v287_v47, 0.0  ;;  %v161_v60 = vadd.f32 %v515_v2, %v93_v49  ;;  %v97_v5 = vmul.f32 %v510_v1, %v29_v50  ;;  %v231_v18 = vld [vmem:[%s1221_s3 + $0x70] sm:$0xff]  ;;  %v33_v19 = vld [vmem:[%s1218_s0 + $0x80] sm:$0xff]  ;;  %v34_v24 = vld [vmem:[%s1218_s0 + $0x88] sm:$0xff] }
   0xd   :  { %411 = vst [vmem:[%s1222_s4 + $0x10] sm:$0xff] %v347_v41  ;;  %v162_v0 = vadd.f32 %v515_v2, %v94_v55  ;;  %v163_v3 = vadd.f32 %v515_v2, %v95_v56  ;;  %v98_v6 = vmul.f32 %v510_v1, %v30_v51  ;;  %v352_v8 = vmax.f32 %v288_v59, 0.0  ;;  %v35_v25 = vld [vmem:[%s1218_s0 + $0x90] sm:$0xff]  ;;  %v232_v30 = vld [vmem:[%s1221_s3 + $0x78] sm:$0xff]  ;;  %v37_v36 = vld [vmem:[%s1218_s0 + $0xa0] sm:$0xff] }
   0xe   :  { %412 = vst [vmem:[%s1222_s4 + $0x18] sm:$0xff] %v348_v46  ;;  %v289_v9 = vadd.f32 %v225_v54, %v161_v60  ;;  %v164_v10 = vadd.f32 %v515_v2, %v96_v63  ;;  %v99_v13 = vmul.f32 %v510_v1, %v31_v57  ;;  %v165_v16 = vadd.f32 %v515_v2, %v97_v5  ;;  %v36_v31 = vld [vmem:[%s1218_s0 + $0x98] sm:$0xff]  ;;  %v38_v37 = vld [vmem:[%s1218_s0 + $0xa8] sm:$0xff]  ;;  %v233_v40 = vld [vmem:[%s1221_s3 + $0x80] sm:$0xff] }
   0xf   :  { %413 = vst [vmem:[%s1222_s4 + $0x20] sm:$0xff] %v349_v52  ;;  %v290_v14 = vadd.f32 %v226_v61, %v162_v0  ;;  %v291_v15 = vadd.f32 %v227_v62, %v163_v3  ;;  %v166_v17 = vadd.f32 %v515_v2, %v98_v6  ;;  %v100_v23 = vmul.f32 %v510_v1, %v32_v7  ;;  %v39_v43 = vld [vmem:[%s1218_s0 + $0xb0] sm:$0xff]  ;;  %v234_v47 = vld [vmem:[%s1221_s3 + $0x88] sm:$0xff]  ;;  %v236_v52 = vld [vmem:[%s1221_s3 + $0x98] sm:$0xff] }
  0x10   :  { %414 = vst [vmem:[%s1222_s4 + $0x28] sm:$0xff] %v350_v53  ;;  %v353_v20 = vmax.f32 %v289_v9, 0.0  ;;  %v292_v21 = vadd.f32 %v228_v4, %v164_v10  ;;  %v167_v22 = vadd.f32 %v515_v2, %v99_v13  ;;  %v293_v28 = vadd.f32 %v229_v11, %v165_v16  ;;  %v235_v48 = vld [vmem:[%s1221_s3 + $0x90] sm:$0xff]  ;;  %v40_v55 = vld [vmem:[%s1218_s0 + $0xb8] sm:$0xff]  ;;  %v237_v59 = vld [vmem:[%s1221_s3 + $0xa0] sm:$0xff] }
  0x11   :  { %415 = vst [vmem:[%s1222_s4 + $0x30] sm:$0xff] %v351_v58  ;;  %v354_v26 = vmax.f32 %v290_v14, 0.0  ;;  %v355_v27 = vmax.f32 %v291_v15, 0.0  ;;  %v294_v29 = vadd.f32 %v230_v12, %v166_v17  ;;  %v168_v34 = vadd.f32 %v515_v2, %v100_v23  ;;  %v238_v60 = vld [vmem:[%s1221_s3 + $0xa8] sm:$0xff]  ;;  %v239_v4 = vld [vmem:[%s1221_s3 + $0xb0] sm:$0xff]  ;;  %v41_v5 = vld [vmem:[%s1218_s0 + $0xc0] sm:$0xff] }
  0x12   :  { %416 = vst [vmem:[%s1222_s4 + $0x38] sm:$0xff] %v352_v8  ;;  %v356_v32 = vmax.f32 %v292_v21, 0.0  ;;  %v295_v33 = vadd.f32 %v231_v18, %v167_v22  ;;  %v101_v35 = vmul.f32 %v510_v1, %v33_v19  ;;  %v357_v38 = vmax.f32 %v293_v28, 0.0  ;;  %v42_v10 = vld [vmem:[%s1218_s0 + $0xc8] sm:$0xff]  ;;  %v43_v11 = vld [vmem:[%s1218_s0 + $0xd0] sm:$0xff]  ;;  %v240_v16 = vld [vmem:[%s1221_s3 + $0xb8] sm:$0xff] }
  0x13   :  { %417 = vst [vmem:[%s1222_s4 + $0x40] sm:$0xff] %v353_v20  ;;  %v358_v39 = vmax.f32 %v294_v29, 0.0  ;;  %v102_v41 = vmul.f32 %v510_v1, %v34_v24  ;;  %v103_v42 = vmul.f32 %v510_v1, %v35_v25  ;;  %v296_v45 = vadd.f32 %v232_v30, %v168_v34  ;;  %v44_v17 = vld [vmem:[%s1218_s0 + $0xd8] sm:$0xff]  ;;  %v45_v22 = vld [vmem:[%s1218_s0 + $0xe0] sm:$0xff]  ;;  %v46_v23 = vld [vmem:[%s1218_s0 + $0xe8] sm:$0xff] }
  0x14   :  { %418 = vst [vmem:[%s1222_s4 + $0x48] sm:$0xff] %v354_v26  ;;  %v359_v44 = vmax.f32 %v295_v33, 0.0  ;;  %v169_v46 = vadd.f32 %v515_v2, %v101_v35  ;;  %v104_v49 = vmul.f32 %v510_v1, %v36_v31  ;;  %v105_v53 = vmul.f32 %v510_v1, %v37_v36  ;;  %v241_v26 = vld [vmem:[%s1221_s3 + $0xc0] sm:$0xff]  ;;  %v47_v29 = vld [vmem:[%s1218_s0 + $0xf0] sm:$0xff]  ;;  %v242_v33 = vld [vmem:[%s1221_s3 + $0xc8] sm:$0xff] }
  0x15   :  { %419 = vst [vmem:[%s1222_s4 + $0x50] sm:$0xff] %v355_v27  ;;  %v170_v50 = vadd.f32 %v515_v2, %v102_v41  ;;  %v171_v51 = vadd.f32 %v515_v2, %v103_v42  ;;  %v106_v54 = vmul.f32 %v510_v1, %v38_v37  ;;  %v360_v56 = vmax.f32 %v296_v45, 0.0  ;;  %v243_v34 = vld [vmem:[%s1221_s3 + $0xd0] sm:$0xff]  ;;  %v48_v41 = vld [vmem:[%s1218_s0 + $0xf8] sm:$0xff]  ;;  %v245_v45 = vld [vmem:[%s1221_s3 + $0xe0] sm:$0xff] }
  0x16   :  { %420 = vst [vmem:[%s1222_s4 + $0x58] sm:$0xff] %v356_v32  ;;  %v297_v57 = vadd.f32 %v233_v40, %v169_v46  ;;  %v172_v58 = vadd.f32 %v515_v2, %v104_v49  ;;  %v107_v61 = vmul.f32 %v510_v1, %v39_v43  ;;  %v173_v0 = vadd.f32 %v515_v2, %v105_v53  ;;  %v246_v46 = vld [vmem:[%s1221_s3 + $0xe8] sm:$0xff]  ;;  %v49_v53 = vld [vmem:[%s1218_s0 + $0x100] sm:$0xff] }
  0x17   :  { %421 = vst [vmem:[%s1222_s4 + $0x60] sm:$0xff] %v357_v38  ;;  %v298_v62 = vadd.f32 %v234_v47, %v170_v50  ;;  %v299_v63 = vadd.f32 %v235_v48, %v171_v51  ;;  %v174_v3 = vadd.f32 %v515_v2, %v106_v54  ;;  %v108_v9 = vmul.f32 %v510_v1, %v40_v55  ;;  %v244_v38 = vld [vmem:[%s1221_s3 + $0xd8] sm:$0xff] }
  0x18   :  { %422 = vst [vmem:[%s1222_s4 + $0x68] sm:$0xff] %v358_v39  ;;  %v361_v6 = vmax.f32 %v297_v57, 0.0  ;;  %v300_v7 = vadd.f32 %v236_v52, %v172_v58  ;;  %v175_v8 = vadd.f32 %v515_v2, %v107_v61  ;;  %v301_v14 = vadd.f32 %v237_v59, %v173_v0  ;;  %v247_v52 = vld [vmem:[%s1221_s3 + $0xf0] sm:$0xff]  ;;  %v50_v58 = vld [vmem:[%s1218_s0 + $0x108] sm:$0xff]  ;;  %v248_v0 = vld [vmem:[%s1221_s3 + $0xf8] sm:$0xff] }
  0x19   :  { %423 = vst [vmem:[%s1222_s4 + $0x70] sm:$0xff] %v359_v44  ;;  %v362_v12 = vmax.f32 %v298_v62, 0.0  ;;  %v363_v13 = vmax.f32 %v299_v63, 0.0  ;;  %v302_v15 = vadd.f32 %v238_v60, %v174_v3  ;;  %v176_v20 = vadd.f32 %v515_v2, %v108_v9  ;;  %v51_v59 = vld [vmem:[%s1218_s0 + $0x110] sm:$0xff]  ;;  %v52_v3 = vld [vmem:[%s1218_s0 + $0x118] sm:$0xff]  ;;  %v54_v9 = vld [vmem:[%s1218_s0 + $0x128] sm:$0xff] }
  0x1a   :  { %424 = vst [vmem:[%s1222_s4 + $0x78] sm:$0xff] %v360_v56  ;;  %v364_v18 = vmax.f32 %v300_v7, 0.0  ;;  %v303_v19 = vadd.f32 %v239_v4, %v175_v8  ;;  %v109_v21 = vmul.f32 %v510_v1, %v41_v5  ;;  %v365_v24 = vmax.f32 %v301_v14, 0.0  ;;  %v53_v8 = vld [vmem:[%s1218_s0 + $0x120] sm:$0xff] }
  0x1b   :  { %425 = vst [vmem:[%s1222_s4 + $0x80] sm:$0xff] %v361_v6  ;;  %v366_v25 = vmax.f32 %v302_v15, 0.0  ;;  %v110_v27 = vmul.f32 %v510_v1, %v42_v10  ;;  %v111_v28 = vmul.f32 %v510_v1, %v43_v11  ;;  %v304_v31 = vadd.f32 %v240_v16, %v176_v20  ;;  %v55_v15 = vld [vmem:[%s1218_s0 + $0x130] sm:$0xff] }
  0x1c   :  { %426 = vst [vmem:[%s1222_s4 + $0x88] sm:$0xff] %v362_v12  ;;  %v367_v30 = vmax.f32 %v303_v19, 0.0  ;;  %v177_v32 = vadd.f32 %v515_v2, %v109_v21  ;;  %v112_v35 = vmul.f32 %v510_v1, %v44_v17  ;;  %v113_v39 = vmul.f32 %v510_v1, %v45_v22  ;;  %v249_v12 = vld [vmem:[%s1221_s3 + $0x100] sm:$0xff]  ;;  %v250_v19 = vld [vmem:[%s1221_s3 + $0x108] sm:$0xff]  ;;  %v251_v20 = vld [vmem:[%s1221_s3 + $0x110] sm:$0xff] }
  0x1d   :  { %427 = vst [vmem:[%s1222_s4 + $0x90] sm:$0xff] %v363_v13  ;;  %v178_v36 = vadd.f32 %v515_v2, %v110_v27  ;;  %v179_v37 = vadd.f32 %v515_v2, %v111_v28  ;;  %v114_v40 = vmul.f32 %v510_v1, %v46_v23  ;;  %v368_v42 = vmax.f32 %v304_v31, 0.0  ;;  %v56_v27 = vld [vmem:[%s1218_s0 + $0x138] sm:$0xff]  ;;  %v253_v31 = vld [vmem:[%s1221_s3 + $0x120] sm:$0xff] }
  0x1e   :  { %428 = vst [vmem:[%s1222_s4 + $0x98] sm:$0xff] %v364_v18  ;;  %v305_v43 = vadd.f32 %v241_v26, %v177_v32  ;;  %v180_v44 = vadd.f32 %v515_v2, %v112_v35  ;;  %v115_v47 = vmul.f32 %v510_v1, %v47_v29  ;;  %v181_v50 = vadd.f32 %v515_v2, %v113_v39  ;;  %v254_v32 = vld [vmem:[%s1221_s3 + $0x128] sm:$0xff]  ;;  %v57_v39 = vld [vmem:[%s1218_s0 + $0x140] sm:$0xff] }
  0x1f   :  { %429 = vst [vmem:[%s1222_s4 + $0xa0] sm:$0xff] %v365_v24  ;;  %v306_v48 = vadd.f32 %v242_v33, %v178_v36  ;;  %v307_v49 = vadd.f32 %v243_v34, %v179_v37  ;;  %v182_v51 = vadd.f32 %v515_v2, %v114_v40  ;;  %v116_v57 = vmul.f32 %v510_v1, %v48_v41  ;;  %v252_v24 = vld [vmem:[%s1221_s3 + $0x118] sm:$0xff] }
  0x20   :  { %430 = vst [vmem:[%s1222_s4 + $0xa8] sm:$0xff] %v366_v25  ;;  %v369_v54 = vmax.f32 %v305_v43, 0.0  ;;  %v308_v55 = vadd.f32 %v244_v38, %v180_v44  ;;  %v183_v56 = vadd.f32 %v515_v2, %v115_v47  ;;  %v309_v62 = vadd.f32 %v245_v45, %v181_v50  ;;  %v255_v38 = vld [vmem:[%s1221_s3 + $0x130] sm:$0xff]  ;;  %v58_v44 = vld [vmem:[%s1218_s0 + $0x148] sm:$0xff]  ;;  %v256_v50 = vld [vmem:[%s1221_s3 + $0x138] sm:$0xff] }
  0x21   :  { %431 = vst [vmem:[%s1222_s4 + $0xb0] sm:$0xff] %v367_v30  ;;  %v370_v60 = vmax.f32 %v306_v48, 0.0  ;;  %v371_v61 = vmax.f32 %v307_v49, 0.0  ;;  %v310_v63 = vadd.f32 %v246_v46, %v182_v51  ;;  %v184_v6 = vadd.f32 %v515_v2, %v116_v57  ;;  %v59_v45 = vld [vmem:[%s1218_s0 + $0x150] sm:$0xff]  ;;  %v60_v51 = vld [vmem:[%s1218_s0 + $0x158] sm:$0xff]  ;;  %v62_v57 = vld [vmem:[%s1218_s0 + $0x168] sm:$0xff] }
  0x22   :  { %432 = vst [vmem:[%s1222_s4 + $0xb8] sm:$0xff] %v368_v42  ;;  %v372_v4 = vmax.f32 %v308_v55, 0.0  ;;  %v311_v5 = vadd.f32 %v247_v52, %v183_v56  ;;  %v117_v7 = vmul.f32 %v510_v1, %v49_v53  ;;  %v373_v10 = vmax.f32 %v309_v62, 0.0  ;;  %v61_v56 = vld [vmem:[%s1218_s0 + $0x160] sm:$0xff] }
  0x23   :  { %433 = vst [vmem:[%s1222_s4 + $0xc0] sm:$0xff] %v369_v54  ;;  %v374_v11 = vmax.f32 %v310_v63, 0.0  ;;  %v118_v13 = vmul.f32 %v510_v1, %v50_v58  ;;  %v119_v14 = vmul.f32 %v510_v1, %v51_v59  ;;  %v312_v17 = vadd.f32 %v248_v0, %v184_v6  ;;  %v63_v63 = vld [vmem:[%s1218_s0 + $0x170] sm:$0xff] }
  0x24   :  { %434 = vst [vmem:[%s1222_s4 + $0xc8] sm:$0xff] %v370_v60  ;;  %v375_v16 = vmax.f32 %v311_v5, 0.0  ;;  %v185_v18 = vadd.f32 %v515_v2, %v117_v7  ;;  %v120_v21 = vmul.f32 %v510_v1, %v52_v3  ;;  %v121_v25 = vmul.f32 %v510_v1, %v53_v8  ;;  %v257_v60 = vld [vmem:[%s1221_s3 + $0x140] sm:$0xff]  ;;  %v258_v5 = vld [vmem:[%s1221_s3 + $0x148] sm:$0xff]  ;;  %v259_v6 = vld [vmem:[%s1221_s3 + $0x150] sm:$0xff] }
  0x25   :  { %435 = vst [vmem:[%s1222_s4 + $0xd0] sm:$0xff] %v371_v61  ;;  %v186_v22 = vadd.f32 %v515_v2, %v118_v13  ;;  %v187_v23 = vadd.f32 %v515_v2, %v119_v14  ;;  %v122_v26 = vmul.f32 %v510_v1, %v54_v9  ;;  %v376_v28 = vmax.f32 %v312_v17, 0.0  ;;  %v64_v13 = vld [vmem:[%s1218_s0 + $0x178] sm:$0xff]  ;;  %v261_v17 = vld [vmem:[%s1221_s3 + $0x160] sm:$0xff] }
  0x26   :  { %436 = vst [vmem:[%s1222_s4 + $0xd8] sm:$0xff] %v372_v4  ;;  %v313_v29 = vadd.f32 %v249_v12, %v185_v18  ;;  %v188_v30 = vadd.f32 %v515_v2, %v120_v21  ;;  %v123_v33 = vmul.f32 %v510_v1, %v55_v15  ;;  %v189_v36 = vadd.f32 %v515_v2, %v121_v25  ;;  %v262_v18 = vld [vmem:[%s1221_s3 + $0x168] sm:$0xff]  ;;  %v65_v25 = vld [vmem:[%s1218_s0 + $0x180] sm:$0xff] }
  0x27   :  { %437 = vst [vmem:[%s1222_s4 + $0xe0] sm:$0xff] %v373_v10  ;;  %v314_v34 = vadd.f32 %v250_v19, %v186_v22  ;;  %v315_v35 = vadd.f32 %v251_v20, %v187_v23  ;;  %v190_v37 = vadd.f32 %v515_v2, %v122_v26  ;;  %v124_v43 = vmul.f32 %v510_v1, %v56_v27  ;;  %v260_v10 = vld [vmem:[%s1221_s3 + $0x158] sm:$0xff] }
  0x28   :  { %438 = vst [vmem:[%s1222_s4 + $0xe8] sm:$0xff] %v374_v11  ;;  %v377_v40 = vmax.f32 %v313_v29, 0.0  ;;  %v316_v41 = vadd.f32 %v252_v24, %v188_v30  ;;  %v191_v42 = vadd.f32 %v515_v2, %v123_v33  ;;  %v317_v48 = vadd.f32 %v253_v31, %v189_v36  ;;  %v263_v24 = vld [vmem:[%s1221_s3 + $0x170] sm:$0xff]  ;;  %v66_v30 = vld [vmem:[%s1218_s0 + $0x188] sm:$0xff]  ;;  %v264_v36 = vld [vmem:[%s1221_s3 + $0x178] sm:$0xff] }
  0x29   :  { %439 = vst [vmem:[%s1222_s4 + $0xf0] sm:$0xff] %v375_v16  ;;  %v378_v46 = vmax.f32 %v314_v34, 0.0  ;;  %v379_v47 = vmax.f32 %v315_v35, 0.0  ;;  %v318_v49 = vadd.f32 %v254_v32, %v190_v37  ;;  %v192_v54 = vadd.f32 %v515_v2, %v124_v43  ;;  %v67_v31 = vld [vmem:[%s1218_s0 + $0x190] sm:$0xff]  ;;  %v68_v37 = vld [vmem:[%s1218_s0 + $0x198] sm:$0xff]  ;;  %v70_v43 = vld [vmem:[%s1218_s0 + $0x1a8] sm:$0xff] }
  0x2a   :  { %440 = vst [vmem:[%s1222_s4 + $0xf8] sm:$0xff] %v376_v28  ;;  %v380_v52 = vmax.f32 %v316_v41, 0.0  ;;  %v319_v53 = vadd.f32 %v255_v38, %v191_v42  ;;  %v125_v55 = vmul.f32 %v510_v1, %v57_v39  ;;  %v381_v58 = vmax.f32 %v317_v48, 0.0  ;;  %v69_v42 = vld [vmem:[%s1218_s0 + $0x1a0] sm:$0xff] }
  0x2b   :  { %441 = vst [vmem:[%s1222_s4 + $0x100] sm:$0xff] %v377_v40  ;;  %v382_v59 = vmax.f32 %v318_v49, 0.0  ;;  %v126_v61 = vmul.f32 %v510_v1, %v58_v44  ;;  %v127_v62 = vmul.f32 %v510_v1, %v59_v45  ;;  %v320_v3 = vadd.f32 %v256_v50, %v192_v54  ;;  %v71_v49 = vld [vmem:[%s1218_s0 + $0x1b0] sm:$0xff] }
  0x2c   :  { %442 = vst [vmem:[%s1222_s4 + $0x108] sm:$0xff] %v378_v46  ;;  %v383_v0 = vmax.f32 %v319_v53, 0.0  ;;  %v193_v4 = vadd.f32 %v515_v2, %v125_v55  ;;  %v128_v7 = vmul.f32 %v510_v1, %v60_v51  ;;  %v129_v11 = vmul.f32 %v510_v1, %v61_v56  ;;  %v265_v46 = vld [vmem:[%s1221_s3 + $0x180] sm:$0xff]  ;;  %v266_v53 = vld [vmem:[%s1221_s3 + $0x188] sm:$0xff]  ;;  %v267_v54 = vld [vmem:[%s1221_s3 + $0x190] sm:$0xff] }
  0x2d   :  { %443 = vst [vmem:[%s1222_s4 + $0x110] sm:$0xff] %v379_v47  ;;  %v194_v8 = vadd.f32 %v515_v2, %v126_v61  ;;  %v195_v9 = vadd.f32 %v515_v2, %v127_v62  ;;  %v130_v12 = vmul.f32 %v510_v1, %v62_v57  ;;  %v384_v14 = vmax.f32 %v320_v3, 0.0  ;;  %v72_v61 = vld [vmem:[%s1218_s0 + $0x1b8] sm:$0xff]  ;;  %v269_v3 = vld [vmem:[%s1221_s3 + $0x1a0] sm:$0xff] }
  0x2e   :  { %444 = vst [vmem:[%s1222_s4 + $0x118] sm:$0xff] %v380_v52  ;;  %v321_v15 = vadd.f32 %v257_v60, %v193_v4  ;;  %v196_v16 = vadd.f32 %v515_v2, %v128_v7  ;;  %v131_v19 = vmul.f32 %v510_v1, %v63_v63  ;;  %v197_v22 = vadd.f32 %v515_v2, %v129_v11  ;;  %v270_v4 = vld [vmem:[%s1221_s3 + $0x1a8] sm:$0xff]  ;;  %v73_v11 = vld [vmem:[%s1218_s0 + $0x1c0] sm:$0xff] }
  0x2f   :  { %445 = vst [vmem:[%s1222_s4 + $0x120] sm:$0xff] %v381_v58  ;;  %v322_v20 = vadd.f32 %v258_v5, %v194_v8  ;;  %v323_v21 = vadd.f32 %v259_v6, %v195_v9  ;;  %v198_v23 = vadd.f32 %v515_v2, %v130_v12  ;;  %v132_v29 = vmul.f32 %v510_v1, %v64_v13  ;;  %v268_v58 = vld [vmem:[%s1221_s3 + $0x198] sm:$0xff] }
  0x30   :  { %446 = vst [vmem:[%s1222_s4 + $0x128] sm:$0xff] %v382_v59  ;;  %v385_v26 = vmax.f32 %v321_v15, 0.0  ;;  %v324_v27 = vadd.f32 %v260_v10, %v196_v16  ;;  %v199_v28 = vadd.f32 %v515_v2, %v131_v19  ;;  %v325_v34 = vadd.f32 %v261_v17, %v197_v22  ;;  %v271_v10 = vld [vmem:[%s1221_s3 + $0x1b0] sm:$0xff]  ;;  %v74_v16 = vld [vmem:[%s1218_s0 + $0x1c8] sm:$0xff]  ;;  %v272_v22 = vld [vmem:[%s1221_s3 + $0x1b8] sm:$0xff] }
  0x31   :  { %447 = vst [vmem:[%s1222_s4 + $0x130] sm:$0xff] %v383_v0  ;;  %v386_v32 = vmax.f32 %v322_v20, 0.0  ;;  %v387_v33 = vmax.f32 %v323_v21, 0.0  ;;  %v326_v35 = vadd.f32 %v262_v18, %v198_v23  ;;  %v200_v40 = vadd.f32 %v515_v2, %v132_v29  ;;  %v75_v17 = vld [vmem:[%s1218_s0 + $0x1d0] sm:$0xff]  ;;  %v76_v23 = vld [vmem:[%s1218_s0 + $0x1d8] sm:$0xff]  ;;  %v78_v29 = vld [vmem:[%s1218_s0 + $0x1e8] sm:$0xff] }
  0x32   :  { %448 = vst [vmem:[%s1222_s4 + $0x138] sm:$0xff] %v384_v14  ;;  %v388_v38 = vmax.f32 %v324_v27, 0.0  ;;  %v327_v39 = vadd.f32 %v263_v24, %v199_v28  ;;  %v133_v41 = vmul.f32 %v510_v1, %v65_v25  ;;  %v389_v44 = vmax.f32 %v325_v34, 0.0  ;;  %v77_v28 = vld [vmem:[%s1218_s0 + $0x1e0] sm:$0xff] }
  0x33   :  { %449 = vst [vmem:[%s1222_s4 + $0x140] sm:$0xff] %v385_v26  ;;  %v390_v45 = vmax.f32 %v326_v35, 0.0  ;;  %v134_v47 = vmul.f32 %v510_v1, %v66_v30  ;;  %v135_v48 = vmul.f32 %v510_v1, %v67_v31  ;;  %v328_v51 = vadd.f32 %v264_v36, %v200_v40  ;;  %v79_v35 = vld [vmem:[%s1218_s0 + $0x1f0] sm:$0xff] }
  0x34   :  { %450 = vst [vmem:[%s1222_s4 + $0x148] sm:$0xff] %v386_v32  ;;  %v391_v50 = vmax.f32 %v327_v39, 0.0  ;;  %v201_v52 = vadd.f32 %v515_v2, %v133_v41  ;;  %v136_v55 = vmul.f32 %v510_v1, %v68_v37  ;;  %v137_v59 = vmul.f32 %v510_v1, %v69_v42  ;;  %v273_v32 = vld [vmem:[%s1221_s3 + $0x1c0] sm:$0xff]  ;;  %v274_v39 = vld [vmem:[%s1221_s3 + $0x1c8] sm:$0xff]  ;;  %v275_v40 = vld [vmem:[%s1221_s3 + $0x1d0] sm:$0xff] }
  0x35   :  { %451 = vst [vmem:[%s1222_s4 + $0x150] sm:$0xff] %v387_v33  ;;  %v202_v56 = vadd.f32 %v515_v2, %v134_v47  ;;  %v203_v57 = vadd.f32 %v515_v2, %v135_v48  ;;  %v138_v60 = vmul.f32 %v510_v1, %v70_v43  ;;  %v392_v62 = vmax.f32 %v328_v51, 0.0  ;;  %v80_v47 = vld [vmem:[%s1218_s0 + $0x1f8] sm:$0xff]  ;;  %v277_v51 = vld [vmem:[%s1221_s3 + $0x1e0] sm:$0xff] }
  0x36   :  { %452 = vst [vmem:[%s1222_s4 + $0x158] sm:$0xff] %v388_v38  ;;  %v329_v63 = vadd.f32 %v265_v46, %v201_v52  ;;  %v204_v0 = vadd.f32 %v515_v2, %v136_v55  ;;  %v139_v5 = vmul.f32 %v510_v1, %v71_v49  ;;  %v205_v8 = vadd.f32 %v515_v2, %v137_v59  ;;  %v278_v52 = vld [vmem:[%s1221_s3 + $0x1e8] sm:$0xff] }
  0x37   :  { %453 = vst [vmem:[%s1222_s4 + $0x160] sm:$0xff] %v389_v44  ;;  %v330_v6 = vadd.f32 %v266_v53, %v202_v56  ;;  %v331_v7 = vadd.f32 %v267_v54, %v203_v57  ;;  %v206_v9 = vadd.f32 %v515_v2, %v138_v60  ;;  %v140_v15 = vmul.f32 %v510_v1, %v72_v61  ;;  %v276_v44 = vld [vmem:[%s1221_s3 + $0x1d8] sm:$0xff] }
  0x38   :  { %454 = vst [vmem:[%s1222_s4 + $0x168] sm:$0xff] %v390_v45  ;;  %v393_v12 = vmax.f32 %v329_v63, 0.0  ;;  %v332_v13 = vadd.f32 %v268_v58, %v204_v0  ;;  %v207_v14 = vadd.f32 %v515_v2, %v139_v5  ;;  %v333_v20 = vadd.f32 %v269_v3, %v205_v8  ;;  %v279_v58 = vld [vmem:[%s1221_s3 + $0x1f0] sm:$0xff]  ;;  %v280_v5 = vld [vmem:[%s1221_s3 + $0x1f8] sm:$0xff] }
  0x39   :  { %455 = vst [vmem:[%s1222_s4 + $0x170] sm:$0xff] %v391_v50  ;;  %v394_v18 = vmax.f32 %v330_v6, 0.0  ;;  %v395_v19 = vmax.f32 %v331_v7, 0.0  ;;  %v334_v21 = vadd.f32 %v270_v4, %v206_v9  ;;  %v208_v26 = vadd.f32 %v515_v2, %v140_v15 }
  0x3a   :  { %456 = vst [vmem:[%s1222_s4 + $0x178] sm:$0xff] %v392_v62  ;;  %v396_v24 = vmax.f32 %v332_v13, 0.0  ;;  %v335_v25 = vadd.f32 %v271_v10, %v207_v14  ;;  %v141_v27 = vmul.f32 %v510_v1, %v73_v11  ;;  %v397_v30 = vmax.f32 %v333_v20, 0.0 }
  0x3b   :  { %457 = vst [vmem:[%s1222_s4 + $0x180] sm:$0xff] %v393_v12  ;;  %v398_v31 = vmax.f32 %v334_v21, 0.0  ;;  %v142_v33 = vmul.f32 %v510_v1, %v74_v16  ;;  %v143_v34 = vmul.f32 %v510_v1, %v75_v17  ;;  %v336_v37 = vadd.f32 %v272_v22, %v208_v26 }
  0x3c   :  { %458 = vst [vmem:[%s1222_s4 + $0x188] sm:$0xff] %v394_v18  ;;  %v399_v36 = vmax.f32 %v335_v25, 0.0  ;;  %v209_v38 = vadd.f32 %v515_v2, %v141_v27  ;;  %v144_v41 = vmul.f32 %v510_v1, %v76_v23  ;;  %v145_v45 = vmul.f32 %v510_v1, %v77_v28 }
  0x3d   :  { %459 = vst [vmem:[%s1222_s4 + $0x190] sm:$0xff] %v395_v19  ;;  %v210_v42 = vadd.f32 %v515_v2, %v142_v33  ;;  %v211_v43 = vadd.f32 %v515_v2, %v143_v34  ;;  %v146_v46 = vmul.f32 %v510_v1, %v78_v29  ;;  %v400_v48 = vmax.f32 %v336_v37, 0.0 }
  0x3e   :  { %460 = vst [vmem:[%s1222_s4 + $0x198] sm:$0xff] %v396_v24  ;;  %v337_v49 = vadd.f32 %v273_v32, %v209_v38  ;;  %v212_v50 = vadd.f32 %v515_v2, %v144_v41  ;;  %v147_v53 = vmul.f32 %v510_v1, %v79_v35  ;;  %v213_v56 = vadd.f32 %v515_v2, %v145_v45 }
  0x3f   :  { %461 = vst [vmem:[%s1222_s4 + $0x1a0] sm:$0xff] %v397_v30  ;;  %v338_v54 = vadd.f32 %v274_v39, %v210_v42  ;;  %v339_v55 = vadd.f32 %v275_v40, %v211_v43  ;;  %v214_v57 = vadd.f32 %v515_v2, %v146_v46  ;;  %v148_v62 = vmul.f32 %v510_v1, %v80_v47 }
  0x40   :  { %462 = vst [vmem:[%s1222_s4 + $0x1a8] sm:$0xff] %v398_v31  ;;  %v401_v59 = vmax.f32 %v337_v49, 0.0  ;;  %v340_v60 = vadd.f32 %v276_v44, %v212_v50  ;;  %v215_v61 = vadd.f32 %v515_v2, %v147_v53  ;;  %v341_v3 = vadd.f32 %v277_v51, %v213_v56 }
  0x41   :  { %463 = vst [vmem:[%s1222_s4 + $0x1b0] sm:$0xff] %v399_v36  ;;  %v402_v63 = vmax.f32 %v338_v54, 0.0  ;;  %v403_v0 = vmax.f32 %v339_v55, 0.0  ;;  %v342_v4 = vadd.f32 %v278_v52, %v214_v57  ;;  %v216_v1 = vadd.f32 %v515_v2, %v148_v62 }
  0x42   :  { %464 = vst [vmem:[%s1222_s4 + $0x1b8] sm:$0xff] %v400_v48  ;;  %v404_v6 = vmax.f32 %v340_v60, 0.0  ;;  %v343_v7 = vadd.f32 %v279_v58, %v215_v61  ;;  %v405_v8 = vmax.f32 %v341_v3, 0.0 }
  0x43   :  { %465 = vst [vmem:[%s1222_s4 + $0x1c0] sm:$0xff] %v401_v59  ;;  %v406_v9 = vmax.f32 %v342_v4, 0.0  ;;  %v344_v11 = vadd.f32 %v280_v5, %v216_v1 }
  0x44   :  { %466 = vst [vmem:[%s1222_s4 + $0x1c8] sm:$0xff] %v402_v63  ;;  %v407_v10 = vmax.f32 %v343_v7, 0.0 }
  0x45   :  { %467 = vst [vmem:[%s1222_s4 + $0x1d0] sm:$0xff] %v403_v0  ;;  %v408_v2 = vmax.f32 %v344_v11, 0.0 }
  0x46   :  { %468 = vst [vmem:[%s1222_s4 + $0x1d8] sm:$0xff] %v404_v6 }
  0x47   :  { %469 = vst [vmem:[%s1222_s4 + $0x1e0] sm:$0xff] %v405_v8 }
  0x48   :  { %470 = vst [vmem:[%s1222_s4 + $0x1e8] sm:$0xff] %v406_v9 }
  0x49   :  { %471 = vst [vmem:[%s1222_s4 + $0x1f0] sm:$0xff] %v407_v10 }
  0x4a   :  { %472 = vst [vmem:[%s1222_s4 + $0x1f8] sm:$0xff] %v408_v2 }

// kernel: basic_block_forward.4
= control target key start
LH: loop header
LB: loop body
LE: loop exit
PB: predicated region body
PF: predicated region fallthrough
CT: control target
= control target key end

     0   :  { %s4824_s12 = smov 0   ;;  %s5487_s0 = inlined_call_operand.vmem [shape: f32[2,16,16,128], index: 0, kind: input, shape index: {}]   ;;  %s5488_s1 = inlined_call_operand.vmem [shape: bf16[1152,128], index: 1, kind: input, shape index: {}]   ;;  %s5489_s2 = inlined_call_operand.vmem [shape: f32[512,128], index: 2, kind: output, shape index: {0}]   ;;  %s5490_s3 = inlined_call_operand.vmem [shape: f32[2,2,128], index: 3, kind: output, shape index: {1}]  }
   0x1 LB: > { %s4830_s13 = sadd.s32 4294967295, %s4800_s12   ;;  %p3671_p0 = scmp.ge.s32.totalorder %s4800_s12, 1  ;;  %s4800_s12 = sphi %s4824_s12, %s14_s12  }
   0x2   : > { %p140_p1 = scmp.lt.s32.totalorder %s4800_s12, 3 }
   0x4   : > { %p141_p2 = pnand %p3671_p0, %p140_p1 }
   0x5   : > { %p168_p3 = scmp.lt.s32.totalorder (!%p141_p2), %s4830_s13, 1  ;;  %s3674_s24 = sshll.u32 (!%p141_p2), %s4830_s13, 5 }
   0x6   : > { %144 = sbr.rel (%p141_p2) target bundleno = 814 (0x32e), region = 28  ;;  %p174_p4 = scmp.lt.s32.totalorder (!%p141_p2), %s3674_s24, 63 }
   0xb   : > { %v4695_v0 = vld [vmem:[%s5488_s1 + $0x38] sm:$0xff]  ;;  %v4802_v1 = vmov 0.0   ;;  %v4694_v2 = vld [vmem:[%s5488_s1 + $0x30] sm:$0xff]  ;;  %s4843_s18 = scalar_select %p168_p3, %s4830_s13, 1  ;;  %v4693_v3 = vld [vmem:[%s5488_s1 + $0x28] sm:$0xff]  ;;  %v4803_v30 = vmov 0.0|0.0  }
   0xc   : > { %195 = vst [vmem:[#allocation2 + $0x60] sm:$0xff] %v4802_v1  ;;  %4760 = vmatpush.bf16.msra.mxu1 %v4695_v0  ;;  %4761 = vmatpush.bf16.msra.mxu2 %v4695_v0  ;;  %v4692_v6 = vld [vmem:[%s5488_s1 + $0x20] sm:$0xff]  ;;  %v4691_v7 = vld [vmem:[%s5488_s1 + $0x18] sm:$0xff]  ;;  %v4690_v12 = vld [vmem:[%s5488_s1 + $0x10] sm:$0xff]  ;;  %s5492_s24 = smov (!%p174_p4, %s3674_s24), 63 }
   0xd   : > { %196 = vst [vmem:[#allocation2 + $0x68] sm:$0xff] %v4802_v1  ;;  %4762 = vmatpush.bf16.msra.mxu3 %v4695_v0  ;;  %2639 = vmatpush.bf16.msra.mxu0 %v4695_v0  ;;  %s4543_s19 = sshll.u32 %s4843_s18, 8  ;;  %v4689_v13 = vld [vmem:[%s5488_s1 + $0x8] sm:$0xff]  ;;  %v4688_v14 = vld [vmem:[%s5488_s1] sm:$0xff]  ;;  %v4711_v18 = vld [vmem:[%s5488_s1 + $0xb8] sm:$0xff]  ;;  %s3675_s13 = sshll.u32 %s5492_s24, 3 }
   0xe   : > { %197 = vst [vmem:[#allocation2 + $0x70] sm:$0x3] %v4802_v1  ;;  %s4852_s22 = scalar_lea.vmem %s5487_s0, %s4543_s19  ;;  %v4719_v19 = vld [vmem:[%s5488_s1 + $0xf8] sm:$0xff]  ;;  %v4710_v22 = vld [vmem:[%s5488_s1 + $0xb0] sm:$0xff]  ;;  %v4709_v35 = vld [vmem:[%s5488_s1 + $0xa8] sm:$0xff]  ;;  %s5415_s27 = scalar_lea.vmem %s5489_s2, %s3675_s13 }
   0xf   : > { %183 = vst [vmem:[#allocation2] sm:$0xff] %v4802_v1  ;;  %v243_v4 = vld [vmem:[%s4852_s22 + $0x30] sm:$0xff]  ;;  %v244_v5 = vld [vmem:[%s4852_s22 + $0x38] sm:$0xff]  ;;  %v4950_v29 = vld [vmem:[%s4852_s22 + $0x40] sm:$0xff]  ;;  %s3676_s28 = sshll.u32 %s4843_s18, 1 }
  0x10   : > { %184 = vst [vmem:[#allocation2 + $0x8] sm:$0xff] %v4802_v1  ;;  %4763 = vmatpush.bf16.msra.mxu1 %v4694_v2  ;;  %4764 = vmatpush.bf16.msra.mxu2 %v4694_v2  ;;  %v4703_v20 = vld [vmem:[%s5488_s1 + $0x78] sm:$0xff]  ;;  %v4718_v23 = vld [vmem:[%s5488_s1 + $0xf0] sm:$0xff]  ;;  %v4953_v31 = vld [vmem:[%s4852_s22 + $0x48] sm:$0xff]  ;;  %s182_s4 = scalar_lea.vmem %s5490_s3, %s3676_s28 }
  0x11   : > { %185 = vst [vmem:[#allocation2 + $0x10] sm:$0x3] %v4802_v1  ;;  %4765 = vmatpush.bf16.msra.mxu3 %v4694_v2  ;;  %2640 = vmatpush.bf16.msra.mxu0 %v4694_v2  ;;  %v4727_v21 = vld [vmem:[%s5488_s1 + $0x138] sm:$0xff]  ;;  %v4702_v24 = vld [vmem:[%s5488_s1 + $0x70] sm:$0xff]  ;;  %v253_v32 = vld [vmem:[%s4852_s22 + $0x80] sm:$0xff] }
  0x12   : > { %276 = vst [vmem:[#allocation2 + $0x61] sm:$0xff] %v243_v4  ;;  %v251_v25 = vld [vmem:[%s4852_s22 + $0x70] sm:$0xff]  ;;  %v252_v26 = vld [vmem:[%s4852_s22 + $0x78] sm:$0xff]  ;;  %v254_v33 = vld [vmem:[%s4852_s22 + $0x88] sm:$0xff] }
  0x13   : > { %277 = vst [vmem:[#allocation2 + $0x69] sm:$0xff] %v244_v5  ;;  %v259_v27 = vld [vmem:[%s4852_s22 + $0xb0] sm:$0xff]  ;;  %v260_v28 = vld [vmem:[%s4852_s22 + $0xb8] sm:$0xff]  ;;  %v261_v40 = vld [vmem:[%s4852_s22 + $0xc0] sm:$0xff] }
  0x14   : > { %186 = vst [vmem:[#allocation2 + $0x18] sm:$0xff] %v4802_v1  ;;  %4766 = vmatpush.bf16.msra.mxu1 %v4693_v3  ;;  %4767 = vmatpush.bf16.msra.mxu2 %v4693_v3  ;;  %v4717_v41 = vld [vmem:[%s5488_s1 + $0xe8] sm:$0xff]  ;;  %v4726_v42 = vld [vmem:[%s5488_s1 + $0x130] sm:$0xff]  ;;  %v4708_v46 = vld [vmem:[%s5488_s1 + $0xa0] sm:$0xff] }
  0x15   : > { %187 = vst [vmem:[#allocation2 + $0x20] sm:$0xff] %v4802_v1  ;;  %4768 = vmatpush.bf16.msra.mxu3 %v4693_v3  ;;  %2641 = vmatpush.bf16.msra.mxu0 %v4693_v3  ;;  %v4701_v45 = vld [vmem:[%s5488_s1 + $0x68] sm:$0xff]  ;;  %v4716_v50 = vld [vmem:[%s5488_s1 + $0xe0] sm:$0xff]  ;;  %v4998_v5 = vld [vmem:[%s4852_s22 + $0x50] sm:$0xff] }
  0x16   : > { %188 = vst [vmem:[#allocation2 + $0x28] sm:$0x3] %v4802_v1  ;;  %v262_v49 = vld [vmem:[%s4852_s22 + $0xc8] sm:$0xff]  ;;  %v4700_v53 = vld [vmem:[%s5488_s1 + $0x60] sm:$0xff] }
  0x17   : > { %189 = vst [vmem:[#allocation2 + $0x30] sm:$0xff] %v4802_v1  ;;  %v4725_v52 = vld [vmem:[%s5488_s1 + $0x128] sm:$0xff]  ;;  %v4992_v0 = vld [vmem:[%s4852_s22] sm:$0xff] }
  0x18   : > { %190 = vst [vmem:[#allocation2 + $0x38] sm:$0xff] %v4802_v1  ;;  %4769 = vmatpush.bf16.msra.mxu1 %v4692_v6  ;;  %4770 = vmatpush.bf16.msra.mxu2 %v4692_v6  ;;  %v4995_v2 = vld [vmem:[%s4852_s22 + $0x8] sm:$0xff] }
  0x19   : > { %v310_v8 = vld [vmem:[#allocation2 + $0x60] sm:$0xff]  ;;  %191 = vst [vmem:[#allocation2 + $0x40] sm:$0x3] %v4802_v1  ;;  %4771 = vmatpush.bf16.msra.mxu3 %v4692_v6  ;;  %2642 = vmatpush.bf16.msra.mxu0 %v4692_v6 }
  0x1a   : > { %v311_v9 = vld [vmem:[#allocation2 + $0x68] sm:$0xff]  ;;  %v342_v10 = vpack.c.bf16 %v310_v8, %v310_v8  ;;  %192 = vst [vmem:[#allocation2 + $0x48] sm:$0xff] %v4802_v1 }
  0x1b   : > { %v343_v11 = vpack.c.bf16 %v311_v9, %v311_v9  ;;  %193 = vst [vmem:[#allocation2 + $0x50] sm:$0xff] %v4802_v1 }
  0x1c   : > { %374 = vst [vmem:[#allocation3 + $0x120] sm:$0xf] %v342_v10  ;;  %4772 = vmatpush.bf16.msra.mxu1 %v4691_v7  ;;  %4773 = vmatpush.bf16.msra.mxu2 %v4691_v7 }
  0x1d   : > { %375 = vst [vmem:[#allocation3 + $0x144] sm:$0xf] %v343_v11  ;;  %4774 = vmatpush.bf16.msra.mxu3 %v4691_v7  ;;  %2643 = vmatpush.bf16.msra.mxu0 %v4691_v7  ;;  %v5002_v7 = vld [vmem:[%s4852_s22 + $0x58] sm:$0xff] }
  0x1e   : > { %194 = vst [vmem:[#allocation2 + $0x58] sm:$0x3] %v4802_v1 }
  0x1f   : > { %198 = vst [vmem:[#allocation2 + $0x78] sm:$0xff] %v4802_v1 }
  0x20   : > { %199 = vst [vmem:[#allocation2 + $0x80] sm:$0xff] %v4802_v1  ;;  %4775 = vmatpush.bf16.msra.mxu1 %v4690_v12  ;;  %4776 = vmatpush.bf16.msra.mxu2 %v4690_v12 }
  0x21   : > { %200 = vst [vmem:[#allocation2 + $0x88] sm:$0x3] %v4802_v1  ;;  %4777 = vmatpush.bf16.msra.mxu3 %v4690_v12  ;;  %2644 = vmatpush.bf16.msra.mxu0 %v4690_v12 }
  0x22   : > { %201 = vst [vmem:[#allocation2 + $0x90] sm:$0xff] %v4802_v1 }
  0x23   : > { %202 = vst [vmem:[#allocation2 + $0x98] sm:$0xff] %v4802_v1  ;;  %v3823_v15 = vld [vmem:[#allocation3 + $0x120] sm:$0xf] }
  0x24   : > { %203 = vst [vmem:[#allocation2 + $0xa0] sm:$0x3] %v4802_v1  ;;  %4778 = vmatpush.bf16.msra.mxu1 %v4689_v13  ;;  %4779 = vmatpush.bf16.msra.mxu2 %v4689_v13  ;;  %v4584_v16 = vld [vmem:[#allocation3 + $0x140] sm:$0xf0] }
  0x25   : > { %204 = vst [vmem:[#allocation2 + $0xa8] sm:$0xff] %v4802_v1  ;;  %4780 = vmatpush.bf16.msra.mxu3 %v4689_v13  ;;  %2645 = vmatpush.bf16.msra.mxu0 %v4689_v13  ;;  %v3824_v17 = vor.u32 %v4584_v16, %v3823_v15  ;;  %v4707_v15 = vld [vmem:[%s5488_s1 + $0x98] sm:$0xff] }
  0x26   : > { %205 = vst [vmem:[#allocation2 + $0xb0] sm:$0xff] %v4802_v1 }
  0x27   : > { %206 = vst [vmem:[#allocation2 + $0xb8] sm:$0x3] %v4802_v1 }
  0x28   : > { %207 = vst [vmem:[#allocation2 + $0xc0] sm:$0xff] %v4802_v1  ;;  %4781 = vmatpush.bf16.msra.mxu1 %v4688_v14  ;;  %4782 = vmatpush.bf16.msra.mxu2 %v4688_v14 }
  0x29   : > { %208 = vst [vmem:[#allocation2 + $0xc8] sm:$0xff] %v4802_v1  ;;  %4783 = vmatpush.bf16.msra.mxu3 %v4688_v14  ;;  %2646 = vmatpush.bf16.msra.mxu0 %v4688_v14  ;;  %v255_v14 = vld [vmem:[%s4852_s22 + $0x90] sm:$0xff] }
  0x2a   : > { %209 = vst [vmem:[#allocation2 + $0xd0] sm:$0x3] %v4802_v1 }
  0x2b   : > { %210 = vst [vmem:[#allocation2 + $0xd8] sm:$0xff] %v4802_v1  ;;  %2667 = vmatmul.bf16.vlgmr.msra.gmra.mxu1 %v3824_v17  ;;  %v256_v17 = vld [vmem:[%s4852_s22 + $0x98] sm:$0xff] }
  0x2c   : > { %211 = vst [vmem:[#allocation2 + $0xe0] sm:$0xff] %v4802_v1  ;;  %2817 = vmatpush.bf16.msrb.mxu2 %v4711_v18  ;;  %2728 = vmatpush.bf16.msrb.mxu1 %v4703_v20  ;;  %v4715_v20 = vld [vmem:[%s5488_s1 + $0xd8] sm:$0xff] }
  0x2d   : > { %212 = vst [vmem:[#allocation2 + $0xe8] sm:$0x3] %v4802_v1  ;;  %2906 = vmatpush.bf16.msrb.mxu3 %v4719_v19  ;;  %2995 = vmatpush.bf16.msrb.mxu0 %v4727_v21  ;;  %v263_v19 = vld [vmem:[%s4852_s22 + $0xd0] sm:$0xff]  ;;  %v4724_v21 = vld [vmem:[%s5488_s1 + $0x120] sm:$0xff] }
  0x2e   : > { %213 = vst [vmem:[#allocation2 + $0xf0] sm:$0xff] %v4802_v1 }
  0x2f   : > { %214 = vst [vmem:[#allocation2 + $0xf8] sm:$0xff] %v4802_v1 }
  0x30   : > { %215 = vst [vmem:[#allocation2 + $0x100] sm:$0x3] %v4802_v1  ;;  %2818 = vmatpush.bf16.msrb.mxu2 %v4710_v22  ;;  %2729 = vmatpush.bf16.msrb.mxu1 %v4702_v24  ;;  %v264_v22 = vld [vmem:[%s4852_s22 + $0xd8] sm:$0xff]  ;;  %v4706_v24 = vld [vmem:[%s5488_s1 + $0x90] sm:$0xff] }
  0x31   : > { %216 = vst [vmem:[#allocation2 + $0x108] sm:$0xff] %v4802_v1  ;;  %2907 = vmatpush.bf16.msrb.mxu3 %v4718_v23  ;;  %2996 = vmatpush.bf16.msrb.mxu0 %v4726_v42  ;;  %v4699_v23 = vld [vmem:[%s5488_s1 + $0x58] sm:$0xff] }
  0x32   : > { %217 = vst [vmem:[#allocation2 + $0x110] sm:$0xff] %v4802_v1 }
  0x33   : > { %218 = vst [vmem:[#allocation2 + $0x118] sm:$0x3] %v4802_v1 }
  0x34   : > { %219 = vst [vmem:[#allocation2 + $0x120] sm:$0xff] %v4802_v1  ;;  %2819 = vmatpush.bf16.msrb.mxu2 %v4709_v35  ;;  %2730 = vmatpush.bf16.msrb.mxu1 %v4701_v45 }
  0x35   : > { %220 = vst [vmem:[#allocation2 + $0x128] sm:$0xff] %v4802_v1  ;;  %2908 = vmatpush.bf16.msrb.mxu3 %v4717_v41  ;;  %2997 = vmatpush.bf16.msrb.mxu0 %v4725_v52  ;;  %v5049_v41 = vld [vmem:[%s4852_s22 + $0x18] sm:$0xff] }
  0x36   : > { %221 = vst [vmem:[#allocation2 + $0x130] sm:$0x3] %v4802_v1 }
  0x37   : > { %222 = vst [vmem:[#allocation2 + $0x138] sm:$0xff] %v4802_v1 }
  0x38   : > { %223 = vst [vmem:[#allocation2 + $0x140] sm:$0xff] %v4802_v1  ;;  %2820 = vmatpush.bf16.msrb.mxu2 %v4708_v46  ;;  %2731 = vmatpush.bf16.msrb.mxu1 %v4700_v53 }
  0x39   : > { %224 = vst [vmem:[#allocation2 + $0x148] sm:$0x3] %v4802_v1  ;;  %2909 = vmatpush.bf16.msrb.mxu3 %v4716_v50  ;;  %2998 = vmatpush.bf16.msrb.mxu0 %v4724_v21  ;;  %v5101_v21 = vld [vmem:[%s4852_s22 + $0x28] sm:$0xff] }
  0x3a   : > { %225 = vst [vmem:[#allocation2 + $0x150] sm:$0xff] %v4802_v1 }
  0x3b   : > { %226 = vst [vmem:[#allocation2 + $0x158] sm:$0xff] %v4802_v1 }
  0x3c   : > { %227 = vst [vmem:[#allocation2 + $0x160] sm:$0x3] %v4802_v1  ;;  %2821 = vmatpush.bf16.msrb.mxu2 %v4707_v15  ;;  %2732 = vmatpush.bf16.msrb.mxu1 %v4699_v23  ;;  %v265_v15 = vld [vmem:[%s4852_s22 + $0xe0] sm:$0xff] }
  0x3d   : > { %228 = vst [vmem:[#allocation2 + $0x168] sm:$0xff] %v4802_v1  ;;  %2910 = vmatpush.bf16.msrb.mxu3 %v4715_v20  ;;  %v5098_v20 = vld [vmem:[%s4852_s22 + $0x20] sm:$0xff] }
  0x3e   : > { %229 = vst [vmem:[#allocation2 + $0x170] sm:$0xff] %v4802_v1 }
  0x3f   : > { %230 = vst [vmem:[#allocation2 + $0x178] sm:$0x3] %v4802_v1 }
  0x40   : > { %231 = vst [vmem:[#allocation2 + $0x180] sm:$0xff] %v4802_v1  ;;  %2822 = vmatpush.bf16.msrb.mxu2 %v4706_v24  ;;  %v4720_v24 = vld [vmem:[%s5488_s1 + $0x100] sm:$0xff] }
  0x41   : > { %232 = vst [vmem:[#allocation2 + $0x188] sm:$0xff] %v4802_v1 }
  0x42   : > { %233 = vst [vmem:[#allocation2 + $0x190] sm:$0x3] %v4802_v1 }
  0x43   : > { %234 = vst [vmem:[#allocation2 + $0x198] sm:$0xff] %v4802_v1 }
  0x44   : > { %235 = vst [vmem:[#allocation2 + $0x1a0] sm:$0xff] %v4802_v1 }
  0x45   : > { %236 = vst [vmem:[#allocation2 + $0x1a8] sm:$0x3] %v4802_v1 }
  0x46   : > { %284 = vst [vmem:[#allocation2 + $0xc1] sm:$0xff] %v251_v25 }
  0x47   : > { %285 = vst [vmem:[#allocation2 + $0xc9] sm:$0xff] %v252_v26  ;;  %v4714_v26 = vld [vmem:[%s5488_s1 + $0xd0] sm:$0xff] }
  0x48   : > { %292 = vst [vmem:[#allocation2 + $0x121] sm:$0xff] %v259_v27  ;;  %2911 = vmatpush.bf16.msrb.mxu3 %v4714_v26 }
  0x49   : > { %293 = vst [vmem:[#allocation2 + $0x129] sm:$0xff] %v260_v28 }
  0x4a   : > { %366 = vst [vmem:[#allocation3] sm:$0xf] %v4803_v30 }
  0x4b   : > { %367 = vst [vmem:[#allocation3 + $0x24] sm:$0xf] %v4803_v30  ;;  %v4723_v30 = vld [vmem:[%s5488_s1 + $0x118] sm:$0xff] }
  0x4c   : > { %278 = vst [vmem:[#allocation2 + $0x79] sm:$0xff] %v4950_v29  ;;  %2999 = vmatpush.bf16.msrb.mxu0 %v4723_v30 }
  0x4d   : > { %v318_v34 = vld [vmem:[#allocation2 + $0xc0] sm:$0xff]  ;;  %279 = vst [vmem:[#allocation2 + $0x81] sm:$0xff] %v4953_v31 }
  0x4e   : > { %v319_v36 = vld [vmem:[#allocation2 + $0xc8] sm:$0xff]  ;;  %v350_v37 = vpack.c.bf16 %v318_v34, %v318_v34  ;;  %286 = vst [vmem:[#allocation2 + $0xd9] sm:$0xff] %v253_v32  ;;  %v4698_v32 = vld [vmem:[%s5488_s1 + $0x50] sm:$0xff] }
  0x4f   : > { %v351_v38 = vpack.c.bf16 %v319_v36, %v319_v36  ;;  %v326_v39 = vld [vmem:[#allocation2 + $0x120] sm:$0xff]  ;;  %287 = vst [vmem:[#allocation2 + $0xe1] sm:$0xff] %v254_v33  ;;  %2733 = vmatpush.bf16.msrb.mxu1 %v4698_v32 }
  0x50   : > { %382 = vst [vmem:[#allocation3 + $0x240] sm:$0xf] %v350_v37  ;;  %v327_v43 = vld [vmem:[#allocation2 + $0x128] sm:$0xff]  ;;  %v358_v44 = vpack.c.bf16 %v326_v39, %v326_v39 }
  0x51   : > { %383 = vst [vmem:[#allocation3 + $0x264] sm:$0xf] %v351_v38  ;;  %v359_v47 = vpack.c.bf16 %v327_v43, %v327_v43  ;;  %v3679_v48 = vld [vmem:[#allocation3] sm:$0xf] }
  0x52   : > { %390 = vst [vmem:[#allocation3 + $0x360] sm:$0xf] %v358_v44  ;;  %v4548_v51 = vld [vmem:[#allocation3 + $0x20] sm:$0xf0] }
  0x53   : > { %391 = vst [vmem:[#allocation3 + $0x384] sm:$0xf] %v359_v47  ;;  %v3680_v54 = vor.u32 %v4548_v51, %v3679_v48  ;;  %v312_v55 = vld [vmem:[#allocation2 + $0x78] sm:$0xff] }
  0x54   : > { %v313_v56 = vld [vmem:[#allocation2 + $0x80] sm:$0xff]  ;;  %v4985_v57 = vpack.c.bf16 %v312_v55, %v312_v55  ;;  %294 = vst [vmem:[#allocation2 + $0x139] sm:$0xff] %v261_v40  ;;  %v5046_v40 = vld [vmem:[%s4852_s22 + $0x10] sm:$0xff] }
  0x55   : > { %2647 = vmatmul.bf16.vlgmr.msra.gmra.mxu0 %v3680_v54  ;;  %v4987_v58 = vpack.c.bf16 %v313_v56, %v313_v56  ;;  %v320_v59 = vld [vmem:[#allocation2 + $0xd8] sm:$0xff]  ;;  %295 = vst [vmem:[#allocation2 + $0x141] sm:$0xff] %v262_v49  ;;  %v5056_v55 = vld [vmem:[%s4852_s22 + $0x60] sm:$0xff] }
  0x56   : > { %376 = vst [vmem:[#allocation3 + $0x168] sm:$0xf] %v4985_v57  ;;  %v321_v60 = vld [vmem:[#allocation2 + $0xe0] sm:$0xff]  ;;  %v352_v61 = vpack.c.bf16 %v320_v59, %v320_v59  ;;  %v5059_v59 = vld [vmem:[%s4852_s22 + $0x68] sm:$0xff] }
  0x57   : > { %v3967_v62 = vld [vmem:[#allocation3 + $0x240] sm:$0xf]  ;;  %377 = vst [vmem:[#allocation3 + $0x18c] sm:$0xf] %v4987_v58  ;;  %v353_v63 = vpack.c.bf16 %v321_v60, %v321_v60 }
  0x58   : > { %v4620_v1 = vld [vmem:[#allocation3 + $0x260] sm:$0xf0]  ;;  %384 = vst [vmem:[#allocation3 + $0x288] sm:$0xf] %v352_v61 }
  0x59   : > { %v3968_v3 = vor.u32 %v4620_v1, %v3967_v62  ;;  %v4111_v4 = vld [vmem:[#allocation3 + $0x360] sm:$0xf]  ;;  %385 = vst [vmem:[#allocation3 + $0x2ac] sm:$0xf] %v353_v63  ;;  %v257_v62 = vld [vmem:[%s4852_s22 + $0xa0] sm:$0xff]  ;;  %v4705_v63 = vld [vmem:[%s5488_s1 + $0x88] sm:$0xff] }
  0x5a   : > { %v4656_v6 = vld [vmem:[#allocation3 + $0x380] sm:$0xf0]  ;;  %270 = vst [vmem:[#allocation2 + $0x19] sm:$0xff] %v4992_v0  ;;  %2823 = vmatpush.bf16.msrb.mxu2 %v4705_v63  ;;  %v4743_v63 = vld [vmem:[%s5488_s1 + $0x1b8] sm:$0xff] }
  0x5b   : > { %2687 = vmatmul.bf16.vlgmr.msra.gmra.mxu2 %v3968_v3  ;;  %v4112_v8 = vor.u32 %v4656_v6, %v4111_v4  ;;  %v328_v9 = vld [vmem:[#allocation2 + $0x138] sm:$0xff]  ;;  %271 = vst [vmem:[#allocation2 + $0x21] sm:$0xff] %v4995_v2  ;;  %v258_v3 = vld [vmem:[%s4852_s22 + $0xa8] sm:$0xff] }
  0x5c   : > { %v329_v10 = vld [vmem:[#allocation2 + $0x140] sm:$0xff]  ;;  %v360_v11 = vpack.c.bf16 %v328_v9, %v328_v9  ;;  %280 = vst [vmem:[#allocation2 + $0x91] sm:$0xff] %v4998_v5  ;;  %v4722_v9 = vld [vmem:[%s5488_s1 + $0x110] sm:$0xff] }
  0x5d   : > { %2707 = vmatmul.bf16.vlgmr.msra.gmra.mxu3 %v4112_v8  ;;  %v3859_v12 = vld [vmem:[#allocation3 + $0x168] sm:$0xf]  ;;  %v361_v13 = vpack.c.bf16 %v329_v10, %v329_v10  ;;  %281 = vst [vmem:[#allocation2 + $0x99] sm:$0xff] %v5002_v7  ;;  %v4713_v8 = vld [vmem:[%s5488_s1 + $0xc8] sm:$0xff]  ;;  %3000 = vmatpush.bf16.msrb.mxu0 %v4722_v9 }
  0x5e   : > { %v4593_v16 = vld [vmem:[#allocation3 + $0x188] sm:$0xf0]  ;;  %392 = vst [vmem:[#allocation3 + $0x3a8] sm:$0xf] %v360_v11  ;;  %2912 = vmatpush.bf16.msrb.mxu3 %v4713_v8 }
  0x5f   : > { %v3860_v18 = vor.u32 %v4593_v16, %v3859_v12  ;;  %393 = vst [vmem:[#allocation3 + $0x3cc] sm:$0xf] %v361_v13  ;;  %v4003_v33 = vld [vmem:[#allocation3 + $0x288] sm:$0xf]  ;;  %v4697_v12 = vld [vmem:[%s5488_s1 + $0x48] sm:$0xff]  ;;  %v4704_v13 = vld [vmem:[%s5488_s1 + $0x80] sm:$0xff] }
  0x60   : > { %288 = vst [vmem:[#allocation2 + $0xf1] sm:$0xff] %v255_v14  ;;  %v4629_v36 = vld [vmem:[#allocation3 + $0x2a8] sm:$0xf0]  ;;  %v4712_v16 = vld [vmem:[%s5488_s1 + $0xc0] sm:$0xff]  ;;  %2734 = vmatpush.bf16.msrb.mxu1 %v4697_v12  ;;  %2824 = vmatpush.bf16.msrb.mxu2 %v4704_v13 }
  0x61   : > { %2672 = vmatmul.bf16.gmra.mxu1 %v3860_v18  ;;  %v304_v25 = vld [vmem:[#allocation2 + $0x18] sm:$0xff]  ;;  %289 = vst [vmem:[#allocation2 + $0xf9] sm:$0xff] %v256_v17  ;;  %v4004_v44 = vor.u32 %v4629_v36, %v4003_v33  ;;  %v266_v17 = vld [vmem:[%s4852_s22 + $0xe8] sm:$0xff] }
  0x62   : > { %v305_v27 = vld [vmem:[#allocation2 + $0x20] sm:$0xff]  ;;  %v5029_v28 = vpack.c.bf16 %v304_v25, %v304_v25  ;;  %296 = vst [vmem:[#allocation2 + $0x151] sm:$0xff] %v263_v19  ;;  %v4721_v18 = vld [vmem:[%s5488_s1 + $0x108] sm:$0xff]  ;;  %2913 = vmatpush.bf16.msrb.mxu3 %v4712_v16  ;;  %v4735_v12 = vld [vmem:[%s5488_s1 + $0x178] sm:$0xff] }
  0x63   : > { %v5037_v34 = vpack.c.bf16 %v305_v27, %v305_v27  ;;  %v314_v35 = vld [vmem:[#allocation2 + $0x90] sm:$0xff]  ;;  %297 = vst [vmem:[#allocation2 + $0x159] sm:$0xff] %v264_v22  ;;  %v4696_v19 = vld [vmem:[%s5488_s1 + $0x40] sm:$0xff]  ;;  %3001 = vmatpush.bf16.msrb.mxu0 %v4721_v18 }
  0x64   : > { %368 = vst [vmem:[#allocation3 + $0x48] sm:$0xf] %v5029_v28  ;;  %v315_v37 = vld [vmem:[#allocation2 + $0x98] sm:$0xff]  ;;  %v5040_v38 = vpack.c.bf16 %v314_v35, %v314_v35  ;;  %v398_v27 = vld [vmem:[#allocation2 + $0x1] sm:$0xff]  ;;  %2735 = vmatpush.bf16.msrb.mxu1 %v4696_v19  ;;  %v399_v35 = vld [vmem:[#allocation2 + $0x9] sm:$0xff]  ;;  %3173 = vmatpush.bf16.msra.mxu2 %v4743_v63  ;;  %v719_v19 = vpack.c.bf16 %v4995_v2, %v4995_v2 }
  0x65   : > { %369 = vst [vmem:[#allocation3 + $0x6c] sm:$0xf] %v5037_v34  ;;  %v5043_v39 = vpack.c.bf16 %v315_v37, %v315_v37  ;;  %v4147_v42 = vld [vmem:[#allocation3 + $0x3a8] sm:$0xf]  ;;  %v720_v2 = vpack.c.bf16 %v5046_v40, %v5046_v40  ;;  %v596_v63 = vld [vmem:[#allocation2 + $0x60] sm:$0xff] }
  0x66   : > { %v4665_v43 = vld [vmem:[#allocation3 + $0x3c8] sm:$0xf0]  ;;  %378 = vst [vmem:[#allocation3 + $0x1b0] sm:$0xf] %v5040_v38 }
  0x67   : > { %379 = vst [vmem:[#allocation3 + $0x1d4] sm:$0xf] %v5043_v39  ;;  %v322_v45 = vld [vmem:[#allocation2 + $0xf0] sm:$0xff]  ;;  %v4148_v48 = vor.u32 %v4665_v43, %v4147_v42  ;;  %3002 = vmatpush.bf16.msrb.mxu0 %v4720_v24  ;;  %v497_v24 = vld [vmem:[#allocation2 + $0x22] sm:$0xff] }
  0x68   : > { %v323_v46 = vld [vmem:[#allocation2 + $0xf8] sm:$0xff]  ;;  %v354_v47 = vpack.c.bf16 %v322_v45, %v322_v45  ;;  %272 = vst [vmem:[#allocation2 + $0x31] sm:$0xff] %v5046_v40  ;;  %v430_v45 = vpack.c.bf16 %v398_v27, %v398_v27  ;;  %3084 = vmatpush.bf16.msra.mxu1 %v4735_v12 }
  0x69   : > { %v355_v49 = vpack.c.bf16 %v323_v46, %v323_v46  ;;  %v330_v50 = vld [vmem:[#allocation2 + $0x150] sm:$0xff]  ;;  %273 = vst [vmem:[#allocation2 + $0x39] sm:$0xff] %v5049_v41 }
  0x6a   : > { %386 = vst [vmem:[#allocation3 + $0x2d0] sm:$0xf] %v354_v47  ;;  %v331_v51 = vld [vmem:[#allocation2 + $0x158] sm:$0xff]  ;;  %v362_v52 = vpack.c.bf16 %v330_v50, %v330_v50 }
  0x6b   : > { %2692 = vmatmul.bf16.gmra.mxu2 %v4004_v44  ;;  %v3715_v53 = vld [vmem:[#allocation3 + $0x48] sm:$0xf]  ;;  %387 = vst [vmem:[#allocation3 + $0x2f4] sm:$0xf] %v355_v49  ;;  %v363_v54 = vpack.c.bf16 %v331_v51, %v331_v51  ;;  %v431_v49 = vpack.c.bf16 %v399_v35, %v399_v35 }
  0x6c   : > { %v4557_v56 = vld [vmem:[#allocation3 + $0x68] sm:$0xf0]  ;;  %394 = vst [vmem:[#allocation3 + $0x3f0] sm:$0xf] %v362_v52 }
  0x6d   : > { %2712 = vmatmul.bf16.gmra.mxu3 %v4148_v48  ;;  %v3716_v60 = vor.u32 %v4557_v56, %v3715_v53  ;;  %v3895_v61 = vld [vmem:[#allocation3 + $0x1b0] sm:$0xf]  ;;  %395 = vst [vmem:[#allocation3 + $0x414] sm:$0xf] %v363_v54 }
  0x6e   : > { %v4602_v1 = vld [vmem:[#allocation3 + $0x1d0] sm:$0xf0]  ;;  %282 = vst [vmem:[#allocation2 + $0xa9] sm:$0xff] %v5056_v55 }
  0x6f   : > { %2652 = vmatmul.bf16.gmra.mxu0 %v3716_v60  ;;  %v3896_v4 = vor.u32 %v4602_v1, %v3895_v61  ;;  %v306_v6 = vld [vmem:[#allocation2 + $0x30] sm:$0xff]  ;;  %283 = vst [vmem:[#allocation2 + $0xb1] sm:$0xff] %v5059_v59  ;;  %v494_v53 = vld [vmem:[#allocation2 + $0x2] sm:$0xff] }
  0x70   : > { %v307_v10 = vld [vmem:[#allocation2 + $0x38] sm:$0xff]  ;;  %v5074_v11 = vpack.c.bf16 %v306_v6, %v306_v6  ;;  %290 = vst [vmem:[#allocation2 + $0x109] sm:$0xff] %v257_v62  ;;  %v495_v60 = vld [vmem:[#allocation2 + $0xa] sm:$0xff] }
  0x71   : > { %2677 = vmatmul.bf16.gmra.mxu1 %v3896_v4  ;;  %v5082_v14 = vpack.c.bf16 %v307_v10, %v307_v10  ;;  %291 = vst [vmem:[#allocation2 + $0x111] sm:$0xff] %v258_v3  ;;  %v4039_v22 = vld [vmem:[#allocation3 + $0x2d0] sm:$0xf]  ;;  %v526_v4 = vpack.c.bf16 %v494_v53, %v494_v53  ;;  %v527_v9 = vpack.c.bf16 %v495_v60, %v495_v60  ;;  %v4751_v10 = vld [vmem:[%s5488_s1 + $0x1f8] sm:$0xff]  ;;  %v4742_v60 = vld [vmem:[%s5488_s1 + $0x1b0] sm:$0xff] }
  0x72   : > { %370 = vst [vmem:[#allocation3 + $0x90] sm:$0xf] %v5074_v11  ;;  %v4638_v23 = vld [vmem:[#allocation3 + $0x2f0] sm:$0xf0]  ;;  %3262 = vmatpush.bf16.msra.mxu3 %v4751_v10  ;;  %v499_v40 = vld [vmem:[#allocation2 + $0x3a] sm:$0xff]  ;;  %3174 = vmatpush.bf16.msra.mxu2 %v4742_v60 }
  0x73   : > { %371 = vst [vmem:[#allocation3 + $0xb4] sm:$0xf] %v5082_v14  ;;  %v4183_v25 = vld [vmem:[#allocation3 + $0x3f0] sm:$0xf]  ;;  %v4040_v36 = vor.u32 %v4638_v23, %v4039_v22 }
  0x74   : > { %298 = vst [vmem:[#allocation2 + $0x169] sm:$0xff] %v265_v15  ;;  %v4674_v30 = vld [vmem:[#allocation3 + $0x410] sm:$0xf0]  ;;  %v4759_v15 = vld [vmem:[%s5488_s1 + $0x238] sm:$0xff] }
  0x75   : > { %v316_v26 = vld [vmem:[#allocation2 + $0xa8] sm:$0xff]  ;;  %299 = vst [vmem:[#allocation2 + $0x171] sm:$0xff] %v266_v17  ;;  %v4184_v46 = vor.u32 %v4674_v30, %v4183_v25  ;;  %v718_v17 = vpack.c.bf16 %v4992_v0, %v4992_v0  ;;  %3351 = vmatpush.bf16.msra.mxu0 %v4759_v15  ;;  %v496_v22 = vld [vmem:[#allocation2 + $0x1a] sm:$0xff]  ;;  %v529_v0 = vpack.c.bf16 %v497_v24, %v497_v24 }
  0x76   : > { %v317_v32 = vld [vmem:[#allocation2 + $0xb0] sm:$0xff]  ;;  %v5106_v33 = vpack.c.bf16 %v316_v26, %v316_v26  ;;  %274 = vst [vmem:[#allocation2 + $0x49] sm:$0xff] %v5098_v20  ;;  %v528_v27 = vpack.c.bf16 %v496_v22, %v496_v22 }
  0x77   : > { %v5109_v37 = vpack.c.bf16 %v317_v32, %v317_v32  ;;  %v324_v42 = vld [vmem:[#allocation2 + $0x108] sm:$0xff]  ;;  %275 = vst [vmem:[#allocation2 + $0x51] sm:$0xff] %v5101_v21 }
  0x78   : > { %380 = vst [vmem:[#allocation3 + $0x1f8] sm:$0xf] %v5106_v33  ;;  %v325_v43 = vld [vmem:[#allocation2 + $0x110] sm:$0xff]  ;;  %v356_v44 = vpack.c.bf16 %v324_v42, %v324_v42 }
  0x79   : > { %v3751_v47 = vld [vmem:[#allocation3 + $0x90] sm:$0xf]  ;;  %381 = vst [vmem:[#allocation3 + $0x21c] sm:$0xf] %v5109_v37  ;;  %v357_v48 = vpack.c.bf16 %v325_v43, %v325_v43 }
  0x7a   : > { %v4566_v50 = vld [vmem:[#allocation3 + $0xb0] sm:$0xf0]  ;;  %388 = vst [vmem:[#allocation3 + $0x318] sm:$0xf] %v356_v44 }
  0x7b   : > { %2697 = vmatmul.bf16.gmra.mxu2 %v4040_v36  ;;  %v3752_v51 = vor.u32 %v4566_v50, %v3751_v47  ;;  %389 = vst [vmem:[#allocation3 + $0x33c] sm:$0xf] %v357_v48  ;;  %v332_v52 = vld [vmem:[#allocation2 + $0x168] sm:$0xff]  ;;  %v531_v47 = vpack.c.bf16 %v499_v40, %v499_v40 }
  0x7c   : > { %v333_v54 = vld [vmem:[#allocation2 + $0x170] sm:$0xff]  ;;  %v364_v56 = vpack.c.bf16 %v332_v52, %v332_v52  ;;  %462 = vst [vmem:[#allocation3 + $0x4] sm:$0xf] %v430_v45 }
  0x7d   : > { %2717 = vmatmul.bf16.gmra.mxu3 %v4184_v46  ;;  %v365_v61 = vpack.c.bf16 %v333_v54, %v333_v54  ;;  %v308_v62 = vld [vmem:[#allocation2 + $0x48] sm:$0xff]  ;;  %463 = vst [vmem:[#allocation3 + $0x28] sm:$0xf] %v431_v49  ;;  %v498_v45 = vld [vmem:[#allocation2 + $0x32] sm:$0xff] }
  0x7e   : > { %396 = vst [vmem:[#allocation3 + $0x438] sm:$0xf] %v364_v56  ;;  %v309_v1 = vld [vmem:[#allocation2 + $0x50] sm:$0xff]  ;;  %v340_v3 = vpack.c.bf16 %v308_v62, %v308_v62  ;;  %v530_v46 = vpack.c.bf16 %v498_v45, %v498_v45 }
  0x7f   : > { %2657 = vmatmul.bf16.gmra.mxu0 %v3752_v51  ;;  %v3931_v6 = vld [vmem:[#allocation3 + $0x1f8] sm:$0xf]  ;;  %397 = vst [vmem:[#allocation3 + $0x45c] sm:$0xf] %v365_v61  ;;  %v5117_v8 = vpack.c.bf16 %v309_v1, %v309_v1 }
  0x80   : > { %v4611_v13 = vld [vmem:[#allocation3 + $0x218] sm:$0xf0]  ;;  %372 = vst [vmem:[#allocation3 + $0xd8] sm:$0xf] %v340_v3 }
  0x81   : > { %v3932_v16 = vor.u32 %v4611_v13, %v3931_v6  ;;  %373 = vst [vmem:[#allocation3 + $0xfc] sm:$0xf] %v5117_v8  ;;  %v4075_v18 = vld [vmem:[#allocation3 + $0x318] sm:$0xf] }
  0x82   : > { %558 = vst [vmem:[#allocation3 + $0x8] sm:$0xf] %v526_v4  ;;  %v4647_v23 = vld [vmem:[#allocation3 + $0x338] sm:$0xf0]  ;;  %v628_v4 = vpack.c.bf16 %v596_v63, %v596_v63 }
  0x83   : > { %2682 = vmatmul.bf16.gmra.mxu1 %v3932_v16  ;;  %559 = vst [vmem:[#allocation3 + $0x2c] sm:$0xf] %v527_v9  ;;  %v4076_v30 = vor.u32 %v4647_v23, %v4075_v18  ;;  %v4544_v42 = vld [vmem:[#allocation3 + $0x4] sm:$0xf]  ;;  %v597_v1 = vld [vmem:[#allocation2 + $0x68] sm:$0xff] }
  0x84   : > { %654 = vst [vmem:[#allocation3 + $0xc] sm:$0xf] %v5029_v28  ;;  %v3681_v43 = vld [vmem:[#allocation3 + $0x24] sm:$0xf0]  ;;  %v629_v6 = vpack.c.bf16 %v597_v1, %v597_v1  ;;  %v693_v9 = vld [vmem:[#allocation2 + $0x69] sm:$0xff] }
  0x85   : > { %655 = vst [vmem:[#allocation3 + $0x30] sm:$0xf] %v5037_v34  ;;  %v4219_v25 = vld [vmem:[#allocation3 + $0x438] sm:$0xf]  ;;  %v721_v34 = vpack.c.bf16 %v5049_v41, %v5049_v41  ;;  %v3684_v44 = vor.u32 %v4544_v42, %v3681_v43  ;;  %v722_v41 = vpack.c.bf16 %v5098_v20, %v5098_v20 }
  0x86   : > { %v4683_v26 = vld [vmem:[#allocation3 + $0x458] sm:$0xf0]  ;;  %750 = vst [vmem:[#allocation3 + $0x10] sm:$0xf] %v718_v17 }
  0x87   : > { %751 = vst [vmem:[#allocation3 + $0x34] sm:$0xf] %v719_v19  ;;  %v3787_v32 = vld [vmem:[#allocation3 + $0xd8] sm:$0xf]  ;;  %v4220_v36 = vor.u32 %v4683_v26, %v4219_v25 }
  0x88   : > { %v4575_v35 = vld [vmem:[#allocation3 + $0xf8] sm:$0xf0]  ;;  %464 = vst [vmem:[#allocation3 + $0x4c] sm:$0xf] %v718_v17 }
  0x89   : > { %465 = vst [vmem:[#allocation3 + $0x70] sm:$0xf] %v719_v19  ;;  %v3788_v28 = vor.u32 %v4575_v35, %v3787_v32  ;;  %v726_v35 = vpack.c.bf16 %v4950_v29, %v4950_v29  ;;  %v4741_v29 = vld [vmem:[%s5488_s1 + $0x1a8] sm:$0xff] }
  0x8a   : > { %560 = vst [vmem:[#allocation3 + $0x50] sm:$0xf] %v528_v27  ;;  %v4549_v48 = vld [vmem:[#allocation3 + $0x28] sm:$0xf0]  ;;  %v502_v27 = vld [vmem:[#allocation2 + $0x62] sm:$0xff]  ;;  %3175 = vmatpush.bf16.msra.mxu2 %v4741_v29 }
  0x8b   : > { %2702 = vmatmul.bf16.gmra.mxu2 %v4076_v30  ;;  %561 = vst [vmem:[#allocation3 + $0x74] sm:$0xf] %v529_v0  ;;  %v4545_v49 = vld [vmem:[#allocation3 + $0xc] sm:$0xf]  ;;  %v503_v30 = vld [vmem:[#allocation2 + $0x6a] sm:$0xff]  ;;  %v534_v0 = vpack.c.bf16 %v502_v27, %v502_v27  ;;  %v4740_v27 = vld [vmem:[%s5488_s1 + $0x1a0] sm:$0xff] }
  0x8c   : > { %656 = vst [vmem:[#allocation3 + $0x54] sm:$0xf] %v5074_v11  ;;  %v723_v11 = vpack.c.bf16 %v5101_v21, %v5101_v21  ;;  %v3689_v50 = vld [vmem:[#allocation3 + $0x2c] sm:$0xf0]  ;;  %v535_v32 = vpack.c.bf16 %v503_v30, %v503_v30  ;;  %v701_v29 = vld [vmem:[#allocation2 + $0xc9] sm:$0xff] }
  0x8d   : > { %2722 = vmatmul.bf16.gmra.mxu3 %v4220_v36  ;;  %657 = vst [vmem:[#allocation3 + $0x78] sm:$0xf] %v5082_v14  ;;  %v3687_v14 = vld [vmem:[#allocation3 + $0x8] sm:$0xf]  ;;  %v3695_v52 = vld [vmem:[#allocation3 + $0x10] sm:$0xf]  ;;  %v3692_v54 = vor.u32 %v4545_v49, %v3689_v50  ;;  %v727_v36 = vpack.c.bf16 %v4953_v31, %v4953_v31 }
  0x8e   : > { %752 = vst [vmem:[#allocation3 + $0x58] sm:$0xf] %v720_v2  ;;  %v3688_v51 = vor.u32 %v4549_v48, %v3687_v14  ;;  %v4550_v53 = vld [vmem:[#allocation3 + $0x30] sm:$0xf0]  ;;  %v4733_v14 = vld [vmem:[%s5488_s1 + $0x168] sm:$0xff]  ;;  %v408_v49 = vld [vmem:[#allocation2 + $0x79] sm:$0xff]  ;;  %3176 = vmatpush.bf16.msra.mxu2 %v4740_v27 }
  0x8f   : > { %2662 = vmatmul.bf16.gmra.mxu0 %v3788_v28  ;;  %753 = vst [vmem:[#allocation3 + $0x7c] sm:$0xf] %v721_v34  ;;  %v3696_v20 = vor.u32 %v4550_v53, %v3695_v52  ;;  %v4553_v21 = vld [vmem:[#allocation3 + $0x4c] sm:$0xf]  ;;  %v4757_v48 = vld [vmem:[%s5488_s1 + $0x228] sm:$0xff] }
  0x90   : > { %466 = vst [vmem:[#allocation3 + $0x94] sm:$0xf] %v720_v2  ;;  %v3717_v56 = vld [vmem:[#allocation3 + $0x6c] sm:$0xf0] }
  0x91   : > { %467 = vst [vmem:[#allocation3 + $0xb8] sm:$0xf] %v721_v34  ;;  %v3720_v61 = vor.u32 %v4553_v21, %v3717_v56  ;;  %v3723_v12 = vld [vmem:[#allocation3 + $0x50] sm:$0xf]  ;;  %v728_v56 = vpack.c.bf16 %v4998_v5, %v4998_v5 }
  0x92   : > { %658 = vst [vmem:[#allocation3 + $0x9c] sm:$0xf] %v340_v3  ;;  %v4558_v13 = vld [vmem:[#allocation3 + $0x70] sm:$0xf0]  ;;  %v504_v52 = vld [vmem:[#allocation2 + $0x7a] sm:$0xff] }
  0x93   : > { %2736 = vmatmul.bf16.vlgmr.msrb.gmra.mxu1 %v3684_v44  ;;  %562 = vst [vmem:[#allocation3 + $0x98] sm:$0xf] %v530_v46  ;;  %v4554_v15 = vld [vmem:[#allocation3 + $0x54] sm:$0xf]  ;;  %v3724_v17 = vor.u32 %v4558_v13, %v3723_v12  ;;  %v730_v12 = vpack.c.bf16 %v5056_v55, %v5056_v55  ;;  %v731_v13 = vpack.c.bf16 %v5059_v59, %v5059_v59 }
  0x94   : > { %563 = vst [vmem:[#allocation3 + $0xbc] sm:$0xf] %v531_v47  ;;  %v3725_v16 = vld [vmem:[#allocation3 + $0x74] sm:$0xf0] }
  0x95   : > { %659 = vst [vmem:[#allocation3 + $0xc0] sm:$0xf] %v5117_v8  ;;  %v692_v8 = vld [vmem:[#allocation2 + $0x61] sm:$0xff]  ;;  %v3728_v22 = vor.u32 %v4554_v15, %v3725_v16 }
  0x96   : > { %754 = vst [vmem:[#allocation3 + $0xa0] sm:$0xf] %v722_v41  ;;  %v724_v10 = vpack.c.bf16 %v692_v8, %v692_v8  ;;  %v3731_v18 = vld [vmem:[#allocation3 + $0x58] sm:$0xf]  ;;  %v4559_v19 = vld [vmem:[#allocation3 + $0x78] sm:$0xf0] }
  0x97   : > { %755 = vst [vmem:[#allocation3 + $0xc4] sm:$0xf] %v723_v11  ;;  %v3732_v23 = vor.u32 %v4559_v19, %v3731_v18  ;;  %v4562_v24 = vld [vmem:[#allocation3 + $0x94] sm:$0xf]  ;;  %v507_v8 = vld [vmem:[#allocation2 + $0x9a] sm:$0xff] }
  0x98   : > { %468 = vst [vmem:[#allocation3 + $0xdc] sm:$0xf] %v722_v41  ;;  %v3753_v25 = vld [vmem:[#allocation3 + $0xb4] sm:$0xf0] }
  0x99   : > { %469 = vst [vmem:[#allocation3 + $0x100] sm:$0xf] %v723_v11  ;;  %v3756_v26 = vor.u32 %v4562_v24, %v3753_v25  ;;  %v4563_v34 = vld [vmem:[#allocation3 + $0x9c] sm:$0xf]  ;;  %v409_v50 = vld [vmem:[#allocation2 + $0x81] sm:$0xff] }
  0x9a   : > { %662 = vst [vmem:[#allocation3 + $0x12c] sm:$0xf] %v4985_v57  ;;  %v4750_v57 = vld [vmem:[%s5488_s1 + $0x1f0] sm:$0xff]  ;;  %v3759_v2 = vld [vmem:[#allocation3 + $0x98] sm:$0xf] }
  0x9b   : > { %2825 = vmatmul.bf16.vlgmr.msrb.gmra.mxu2 %v3688_v51  ;;  %663 = vst [vmem:[#allocation3 + $0x150] sm:$0xf] %v4987_v58  ;;  %v4734_v58 = vld [vmem:[%s5488_s1 + $0x170] sm:$0xff]  ;;  %3263 = vmatpush.bf16.msra.mxu3 %v4750_v57  ;;  %v4567_v28 = vld [vmem:[#allocation3 + $0xb8] sm:$0xf0]  ;;  %v440_v51 = vpack.c.bf16 %v408_v49, %v408_v49  ;;  %v505_v53 = vld [vmem:[#allocation2 + $0x82] sm:$0xff]  ;;  %v729_v57 = vpack.c.bf16 %v5002_v7, %v5002_v7 }
  0x9c   : > { %664 = vst [vmem:[#allocation3 + $0x174] sm:$0xf] %v5040_v38  ;;  %v4758_v38 = vld [vmem:[%s5488_s1 + $0x230] sm:$0xff]  ;;  %3085 = vmatpush.bf16.msra.mxu1 %v4734_v58  ;;  %v3760_v43 = vor.u32 %v4567_v28, %v3759_v2  ;;  %v4749_v11 = vld [vmem:[%s5488_s1 + $0x1e8] sm:$0xff]  ;;  %v537_v21 = vpack.c.bf16 %v505_v53, %v505_v53  ;;  %v4732_v2 = vld [vmem:[%s5488_s1 + $0x160] sm:$0xff]  ;;  %v733_v49 = vpack.c.bf16 %v701_v29, %v701_v29 }
  0x9d   : > { %2914 = vmatmul.bf16.vlgmr.msrb.gmra.mxu3 %v3692_v54  ;;  %665 = vst [vmem:[#allocation3 + $0x198] sm:$0xf] %v5043_v39  ;;  %v500_v39 = vld [vmem:[#allocation2 + $0x4a] sm:$0xff]  ;;  %3352 = vmatpush.bf16.msra.mxu0 %v4758_v38  ;;  %v441_v54 = vpack.c.bf16 %v409_v50, %v409_v50  ;;  %v512_v29 = vld [vmem:[#allocation2 + $0xda] sm:$0xff] }
  0x9e   : > { %666 = vst [vmem:[#allocation3 + $0x1bc] sm:$0xf] %v5106_v33  ;;  %v501_v33 = vld [vmem:[#allocation2 + $0x52] sm:$0xff]  ;;  %v532_v62 = vpack.c.bf16 %v500_v39, %v500_v39  ;;  %v508_v28 = vld [vmem:[#allocation2 + $0xaa] sm:$0xff] }
  0x9f   : > { %3003 = vmatmul.bf16.vlgmr.msrb.gmra.mxu0 %v3696_v20  ;;  %667 = vst [vmem:[#allocation3 + $0x1e0] sm:$0xf] %v5109_v37  ;;  %v533_v3 = vpack.c.bf16 %v501_v33, %v501_v33  ;;  %v725_v37 = vpack.c.bf16 %v693_v9, %v693_v9  ;;  %v3761_v42 = vld [vmem:[#allocation3 + $0xbc] sm:$0xf0]  ;;  %v4568_v45 = vld [vmem:[#allocation3 + $0xc0] sm:$0xf0]  ;;  %3264 = vmatpush.bf16.msra.mxu3 %v4749_v11 }
  0xa0   : > { %564 = vst [vmem:[#allocation3 + $0xe0] sm:$0xf] %v532_v62  ;;  %v3767_v44 = vld [vmem:[#allocation3 + $0xa0] sm:$0xf]  ;;  %v3764_v40 = vor.u32 %v4563_v34, %v3761_v42  ;;  %v4571_v47 = vld [vmem:[#allocation3 + $0xdc] sm:$0xf]  ;;  %3086 = vmatpush.bf16.msra.mxu1 %v4733_v14  ;;  %v536_v20 = vpack.c.bf16 %v504_v52, %v504_v52  ;;  %v540_v42 = vpack.c.bf16 %v508_v28, %v508_v28 }
  0xa1   : > { %565 = vst [vmem:[#allocation3 + $0x104] sm:$0xf] %v533_v3  ;;  %v3768_v46 = vor.u32 %v4568_v45, %v3767_v44  ;;  %v3789_v41 = vld [vmem:[#allocation3 + $0xfc] sm:$0xf0]  ;;  %3353 = vmatpush.bf16.msra.mxu0 %v4757_v48  ;;  %v604_v44 = vld [vmem:[#allocation2 + $0xc0] sm:$0xff]  ;;  %v605_v45 = vld [vmem:[#allocation2 + $0xc8] sm:$0xff] }
  0xa2   : > { %660 = vst [vmem:[#allocation3 + $0xe4] sm:$0xf] %v628_v4  ;;  %v3792_v31 = vor.u32 %v4571_v47, %v3789_v41  ;;  %v3833_v18 = vld [vmem:[#allocation3 + $0x14c] sm:$0xf0]  ;;  %v509_v34 = vld [vmem:[#allocation2 + $0xb2] sm:$0xff]  ;;  %v637_v47 = vpack.c.bf16 %v605_v45, %v605_v45 }
  0xa3   : > { %2741 = vmatmul.bf16.gmra.mxu1 %v3720_v61  ;;  %661 = vst [vmem:[#allocation3 + $0x108] sm:$0xf] %v629_v6  ;;  %v506_v6 = vld [vmem:[#allocation2 + $0x92] sm:$0xff]  ;;  %v700_v41 = vld [vmem:[#allocation2 + $0xc1] sm:$0xff] }
  0xa4   : > { %756 = vst [vmem:[#allocation3 + $0xe8] sm:$0xf] %v724_v10  ;;  %v538_v9 = vpack.c.bf16 %v506_v6, %v506_v6  ;;  %3087 = vmatpush.bf16.msra.mxu1 %v4732_v2  ;;  %v732_v11 = vpack.c.bf16 %v700_v41, %v700_v41  ;;  %v4756_v48 = vld [vmem:[%s5488_s1 + $0x220] sm:$0xff]  ;;  %v3869_v52 = vld [vmem:[#allocation3 + $0x194] sm:$0xf0] }
  0xa5   : > { %757 = vst [vmem:[#allocation3 + $0x10c] sm:$0xf] %v725_v37  ;;  %3354 = vmatpush.bf16.msra.mxu0 %v4756_v48  ;;  %v544_v48 = vpack.c.bf16 %v512_v29, %v512_v29 }
  0xa6   : > { %470 = vst [vmem:[#allocation3 + $0x124] sm:$0xf] %v724_v10  ;;  %v539_v10 = vpack.c.bf16 %v507_v8, %v507_v8  ;;  %v607_v8 = vld [vmem:[#allocation2 + $0xe0] sm:$0xff] }
  0xa7   : > { %471 = vst [vmem:[#allocation3 + $0x148] sm:$0xf] %v725_v37  ;;  %v3795_v60 = vld [vmem:[#allocation3 + $0xe0] sm:$0xf] }
  0xa8   : > { %566 = vst [vmem:[#allocation3 + $0x128] sm:$0xf] %v534_v0  ;;  %v4576_v61 = vld [vmem:[#allocation3 + $0x100] sm:$0xf0]  ;;  %v5184_v1 = vpop.f32.mrf.mxu1 }
  0xa9   : > { %567 = vst [vmem:[#allocation3 + $0x14c] sm:$0xf] %v535_v32  ;;  %v4572_v58 = vld [vmem:[#allocation3 + $0xe4] sm:$0xf]  ;;  %v3796_v39 = vor.u32 %v4576_v61, %v3795_v60 }
  0xaa   : > { %758 = vst [vmem:[#allocation3 + $0x130] sm:$0xf] %v726_v35  ;;  %v3797_v38 = vld [vmem:[#allocation3 + $0x104] sm:$0xf0]  ;;  %v4748_v35 = vld [vmem:[%s5488_s1 + $0x1e0] sm:$0xff] }
  0xab   : > { %2830 = vmatmul.bf16.gmra.mxu2 %v3724_v17  ;;  %759 = vst [vmem:[#allocation3 + $0x154] sm:$0xf] %v727_v36  ;;  %v3803_v33 = vld [vmem:[#allocation3 + $0xe8] sm:$0xf]  ;;  %v3800_v63 = vor.u32 %v4572_v58, %v3797_v38  ;;  %v4581_v17 = vld [vmem:[#allocation3 + $0x12c] sm:$0xf]  ;;  %3265 = vmatpush.bf16.msra.mxu3 %v4748_v35 }
  0xac   : > { %472 = vst [vmem:[#allocation3 + $0x16c] sm:$0xf] %v440_v51  ;;  %v4577_v62 = vld [vmem:[#allocation3 + $0x108] sm:$0xf0]  ;;  %v3836_v55 = vor.u32 %v4581_v17, %v3833_v18  ;;  %v4590_v51 = vld [vmem:[#allocation3 + $0x174] sm:$0xf] }
  0xad   : > { %2919 = vmatmul.bf16.gmra.mxu3 %v3728_v22  ;;  %473 = vst [vmem:[#allocation3 + $0x190] sm:$0xf] %v441_v54  ;;  %v3804_v5 = vor.u32 %v4577_v62, %v3803_v33  ;;  %v4580_v3 = vld [vmem:[#allocation3 + $0x124] sm:$0xf]  ;;  %v3872_v60 = vor.u32 %v4590_v51, %v3869_v52  ;;  %v609_v51 = vld [vmem:[#allocation2 + $0xf8] sm:$0xff] }
  0xae   : > { %568 = vst [vmem:[#allocation3 + $0x170] sm:$0xf] %v536_v20  ;;  %v3825_v4 = vld [vmem:[#allocation3 + $0x144] sm:$0xf0] }
  0xaf   : > { %3008 = vmatmul.bf16.gmra.mxu0 %v3732_v23  ;;  %569 = vst [vmem:[#allocation3 + $0x194] sm:$0xf] %v537_v21  ;;  %v3828_v7 = vor.u32 %v4580_v3, %v3825_v4  ;;  %v3831_v37 = vld [vmem:[#allocation3 + $0x128] sm:$0xf]  ;;  %v511_v3 = vld [vmem:[#allocation2 + $0xca] sm:$0xff] }
  0xb0   : > { %760 = vst [vmem:[#allocation3 + $0x178] sm:$0xf] %v728_v56  ;;  %v4585_v15 = vld [vmem:[#allocation3 + $0x148] sm:$0xf0]  ;;  %v5190_v16 = vpop.f32.mrf.mxu1  ;;  %v543_v6 = vpack.c.bf16 %v511_v3, %v511_v3 }
  0xb1   : > { %761 = vst [vmem:[#allocation3 + $0x19c] sm:$0xf] %v729_v57  ;;  %v3832_v19 = vor.u32 %v4585_v15, %v3831_v37  ;;  %v3839_v23 = vld [vmem:[#allocation3 + $0x130] sm:$0xf]  ;;  %v606_v4 = vld [vmem:[#allocation2 + $0xd8] sm:$0xff] }
  0xb2   : > { %474 = vst [vmem:[#allocation3 + $0x1b4] sm:$0xf] %v728_v56  ;;  %v4586_v24 = vld [vmem:[#allocation3 + $0x150] sm:$0xf0] }
  0xb3   : > { %2746 = vmatmul.bf16.gmra.mxu1 %v3756_v26  ;;  %475 = vst [vmem:[#allocation3 + $0x1d8] sm:$0xf] %v729_v57  ;;  %v3840_v25 = vor.u32 %v4586_v24, %v3839_v23  ;;  %v4589_v59 = vld [vmem:[#allocation3 + $0x16c] sm:$0xf]  ;;  %v4599_v24 = vld [vmem:[#allocation3 + $0x1bc] sm:$0xf] }
  0xb4   : > { %570 = vst [vmem:[#allocation3 + $0x1b8] sm:$0xf] %v538_v9  ;;  %v3861_v26 = vld [vmem:[#allocation3 + $0x18c] sm:$0xf0]  ;;  %v638_v9 = vpack.c.bf16 %v606_v4, %v606_v4 }
  0xb5   : > { %571 = vst [vmem:[#allocation3 + $0x1dc] sm:$0xf] %v539_v10  ;;  %v3864_v32 = vor.u32 %v4589_v59, %v3861_v26  ;;  %v639_v10 = vpack.c.bf16 %v607_v8, %v607_v8 }
  0xb6   : > { %762 = vst [vmem:[#allocation3 + $0x1c0] sm:$0xf] %v730_v12  ;;  %v4594_v14 = vld [vmem:[#allocation3 + $0x190] sm:$0xf0] }
  0xb7   : > { %763 = vst [vmem:[#allocation3 + $0x1e4] sm:$0xf] %v731_v13  ;;  %v3875_v21 = vld [vmem:[#allocation3 + $0x178] sm:$0xf] }
  0xb8   : > { %476 = vst [vmem:[#allocation3 + $0x1fc] sm:$0xf] %v730_v12  ;;  %v4595_v56 = vld [vmem:[#allocation3 + $0x198] sm:$0xf0]  ;;  %v702_v12 = vld [vmem:[#allocation2 + $0xd9] sm:$0xff] }
  0xb9   : > { %477 = vst [vmem:[#allocation3 + $0x220] sm:$0xf] %v731_v13  ;;  %v3876_v61 = vor.u32 %v4595_v56, %v3875_v21  ;;  %v4598_v58 = vld [vmem:[#allocation3 + $0x1b4] sm:$0xf]  ;;  %v734_v37 = vpack.c.bf16 %v702_v12, %v702_v12  ;;  %v704_v21 = vld [vmem:[#allocation2 + $0xf1] sm:$0xff]  ;;  %v705_v56 = vld [vmem:[#allocation2 + $0xf9] sm:$0xff] }
  0xba   : > { %572 = vst [vmem:[#allocation3 + $0x200] sm:$0xf] %v540_v42  ;;  %v3897_v38 = vld [vmem:[#allocation3 + $0x1d4] sm:$0xf0] }
  0xbb   : > { %2835 = vmatmul.bf16.gmra.mxu2 %v3760_v43  ;;  %v541_v43 = vpack.c.bf16 %v509_v34, %v509_v34  ;;  %669 = vst [vmem:[#allocation3 + $0x228] sm:$0xf] %v637_v47  ;;  %v3900_v62 = vor.u32 %v4598_v58, %v3897_v38  ;;  %v703_v13 = vld [vmem:[#allocation2 + $0xe1] sm:$0xff] }
  0xbc   : > { %764 = vst [vmem:[#allocation3 + $0x208] sm:$0xf] %v732_v11  ;;  %v3903_v17 = vld [vmem:[#allocation3 + $0x1b8] sm:$0xf]  ;;  %v4603_v18 = vld [vmem:[#allocation3 + $0x1d8] sm:$0xf0] }
  0xbd   : > { %2924 = vmatmul.bf16.gmra.mxu3 %v3764_v40  ;;  %573 = vst [vmem:[#allocation3 + $0x224] sm:$0xf] %v541_v43  ;;  %v3904_v59 = vor.u32 %v4603_v18, %v3903_v17  ;;  %v3911_v27 = vld [vmem:[#allocation3 + $0x1c0] sm:$0xf]  ;;  %v4739_v43 = vld [vmem:[%s5488_s1 + $0x198] sm:$0xff] }
  0xbe   : > { %765 = vst [vmem:[#allocation3 + $0x22c] sm:$0xf] %v733_v49  ;;  %3177 = vmatpush.bf16.msra.mxu2 %v4739_v43 }
  0xbf   : > { %3013 = vmatmul.bf16.gmra.mxu0 %v3768_v46  ;;  %v636_v46 = vpack.c.bf16 %v604_v44, %v604_v44  ;;  %478 = vst [vmem:[#allocation3 + $0x244] sm:$0xf] %v732_v11  ;;  %v4607_v34 = vld [vmem:[#allocation3 + $0x1fc] sm:$0xf]  ;;  %v608_v11 = vld [vmem:[#allocation2 + $0xf0] sm:$0xff] }
  0xc0   : > { %479 = vst [vmem:[#allocation3 + $0x268] sm:$0xf] %v733_v49  ;;  %v3933_v42 = vld [vmem:[#allocation3 + $0x21c] sm:$0xf0]  ;;  %v640_v52 = vpack.c.bf16 %v608_v11, %v608_v11 }
  0xc1   : > { %668 = vst [vmem:[#allocation3 + $0x204] sm:$0xf] %v636_v46  ;;  %v3936_v45 = vor.u32 %v4607_v34, %v3933_v42  ;;  %v4747_v46 = vld [vmem:[%s5488_s1 + $0x1d8] sm:$0xff] }
  0xc2   : > { %575 = vst [vmem:[#allocation3 + $0x26c] sm:$0xf] %v543_v6  ;;  %3266 = vmatpush.bf16.msra.mxu3 %v4747_v46  ;;  %v707_v11 = vld [vmem:[#allocation2 + $0x111] sm:$0xff] }
  0xc3   : > { %2751 = vmatmul.bf16.gmra.mxu1 %v3792_v31  ;;  %v3867_v31 = vld [vmem:[#allocation3 + $0x170] sm:$0xf]  ;;  %670 = vst [vmem:[#allocation3 + $0x24c] sm:$0xf] %v638_v9  ;;  %v3947_v9 = vld [vmem:[#allocation3 + $0x208] sm:$0xf] }
  0xc4   : > { %v3868_v54 = vor.u32 %v4594_v14, %v3867_v31  ;;  %671 = vst [vmem:[#allocation3 + $0x270] sm:$0xf] %v639_v10  ;;  %v513_v31 = vld [vmem:[#allocation2 + $0xe2] sm:$0xff]  ;;  %v4731_v14 = vld [vmem:[%s5488_s1 + $0x158] sm:$0xff]  ;;  %v4612_v38 = vld [vmem:[#allocation3 + $0x220] sm:$0xf0] }
  0xc5   : > { %766 = vst [vmem:[#allocation3 + $0x250] sm:$0xf] %v734_v37  ;;  %v545_v49 = vpack.c.bf16 %v513_v31, %v513_v31  ;;  %3088 = vmatpush.bf16.msra.mxu1 %v4731_v14  ;;  %v4613_v10 = vld [vmem:[#allocation3 + $0x228] sm:$0xf0]  ;;  %v706_v31 = vld [vmem:[#allocation2 + $0x109] sm:$0xff] }
  0xc6   : > { %480 = vst [vmem:[#allocation3 + $0x28c] sm:$0xf] %v734_v37  ;;  %v3948_v37 = vor.u32 %v4613_v10, %v3947_v9  ;;  %v4616_v18 = vld [vmem:[#allocation3 + $0x244] sm:$0xf]  ;;  %v738_v14 = vpack.c.bf16 %v706_v31, %v706_v31 }
  0xc7   : > { %576 = vst [vmem:[#allocation3 + $0x290] sm:$0xf] %v544_v48 }
  0xc8   : > { %577 = vst [vmem:[#allocation3 + $0x2b4] sm:$0xf] %v545_v49  ;;  %v4608_v4 = vld [vmem:[#allocation3 + $0x204] sm:$0xf] }
  0xc9   : > { %672 = vst [vmem:[#allocation3 + $0x294] sm:$0xf] %v640_v52  ;;  %v739_v52 = vpack.c.bf16 %v707_v11, %v707_v11 }
  0xca   : > { %770 = vst [vmem:[#allocation3 + $0x2e0] sm:$0xf] %v738_v14 }
  0xcb   : > { %2840 = vmatmul.bf16.gmra.mxu2 %v3796_v39  ;;  %771 = vst [vmem:[#allocation3 + $0x304] sm:$0xf] %v739_v52 }
  0xcc   : > { %484 = vst [vmem:[#allocation3 + $0x31c] sm:$0xf] %v738_v14  ;;  %v708_v14 = vld [vmem:[#allocation2 + $0x121] sm:$0xff] }
  0xcd   : > { %2929 = vmatmul.bf16.gmra.mxu3 %v3800_v63  ;;  %485 = vst [vmem:[#allocation3 + $0x340] sm:$0xf] %v739_v52  ;;  %v4625_v9 = vld [vmem:[#allocation3 + $0x28c] sm:$0xf]  ;;  %v740_v52 = vpack.c.bf16 %v708_v14, %v708_v14 }
  0xcf   : > { %3018 = vmatmul.bf16.gmra.mxu0 %v3804_v5  ;;  %v510_v5 = vld [vmem:[#allocation2 + $0xc2] sm:$0xff]  ;;  %772 = vst [vmem:[#allocation3 + $0x328] sm:$0xf] %v740_v52 }
  0xd0   : > { %486 = vst [vmem:[#allocation3 + $0x364] sm:$0xf] %v740_v52  ;;  %v615_v52 = vld [vmem:[#allocation2 + $0x140] sm:$0xff] }
  0xd2   : > { %v5192_v22 = vpop.f32.mrf.mxu0 }
  0xd3   : > { %2756 = vmatmul.bf16.gmra.mxu1 %v3828_v7  ;;  %v542_v7 = vpack.c.bf16 %v510_v5, %v510_v5  ;;  %v737_v5 = vpack.c.bf16 %v705_v56, %v705_v56 }
  0xd5   : > { %574 = vst [vmem:[#allocation3 + $0x248] sm:$0xf] %v542_v7  ;;  %v3941_v7 = vld [vmem:[#allocation3 + $0x224] sm:$0xf0] }
  0xd6   : > { %769 = vst [vmem:[#allocation3 + $0x2bc] sm:$0xf] %v737_v5 }
  0xd7   : > { %483 = vst [vmem:[#allocation3 + $0x2f8] sm:$0xf] %v737_v5 }
  0xda   : > { %v5209_v40 = vpop.f32.mrf.mxu0 }
  0xdb   : > { %2845 = vmatmul.bf16.gmra.mxu2 %v3832_v19  ;;  %v735_v19 = vpack.c.bf16 %v703_v13, %v703_v13  ;;  %v3944_v13 = vor.u32 %v4608_v4, %v3941_v7 }
  0xdc   : > { %v3975_v49 = vld [vmem:[#allocation3 + $0x248] sm:$0xf] }
  0xdd   : > { %2934 = vmatmul.bf16.gmra.mxu3 %v3836_v55  ;;  %v3905_v55 = vld [vmem:[#allocation3 + $0x1dc] sm:$0xf0]  ;;  %767 = vst [vmem:[#allocation3 + $0x274] sm:$0xf] %v735_v19 }
  0xde   : > { %v5197_v30 = vpop.f32.mrf.mxu2  ;;  %v5199_v0 = vpop.f32.mrf.mxu1  ;;  %v3908_v35 = vor.u32 %v4599_v24, %v3905_v55  ;;  %481 = vst [vmem:[#allocation3 + $0x2b0] sm:$0xf] %v735_v19  ;;  %v3969_v19 = vld [vmem:[#allocation3 + $0x264] sm:$0xf0] }
  0xdf   : > { %3023 = vmatmul.bf16.gmra.mxu0 %v3840_v25  ;;  %v3972_v55 = vor.u32 %v4616_v18, %v3969_v19 }
  0xe0   : > { %v5204_v36 = vpop.f32.mrf.mxu3 }
  0xe3   : > { %2761 = vmatmul.bf16.gmra.mxu1 %v3864_v32  ;;  %v4604_v32 = vld [vmem:[#allocation3 + $0x1e0] sm:$0xf0] }
  0xe4   : > { %v3912_v2 = vor.u32 %v4604_v32, %v3911_v27  ;;  %v514_v32 = vld [vmem:[#allocation2 + $0xf2] sm:$0xff] }
  0xe5   : > { %v546_v42 = vpack.c.bf16 %v514_v32, %v514_v32  ;;  %v4005_v10 = vld [vmem:[#allocation3 + $0x2ac] sm:$0xf0]  ;;  %v516_v32 = vld [vmem:[#allocation2 + $0x10a] sm:$0xff] }
  0xe6   : > { %v5214_v50 = vpop.f32.mrf.mxu2  ;;  %v5216_v53 = vpop.f32.mrf.mxu1  ;;  %v4008_v19 = vor.u32 %v4625_v9, %v4005_v10 }
  0xe7   : > { %578 = vst [vmem:[#allocation3 + $0x2d8] sm:$0xf] %v546_v42 }
  0xe8   : > { %v5218_v20 = vpop.f32.mrf.mxu3 }
  0xeb   : > { %2850 = vmatmul.bf16.gmra.mxu2 %v3868_v54  ;;  %v641_v54 = vpack.c.bf16 %v609_v51, %v609_v51  ;;  %v4621_v51 = vld [vmem:[#allocation3 + $0x268] sm:$0xf0] }
  0xec   : > { %v5220_v57 = vpop.f32.mrf.mxu0  ;;  %v3976_v56 = vor.u32 %v4621_v51, %v3975_v49  ;;  %v709_v49 = vld [vmem:[#allocation2 + $0x129] sm:$0xff]  ;;  %v4011_v51 = vld [vmem:[#allocation3 + $0x290] sm:$0xf] }
  0xed   : > { %2939 = vmatmul.bf16.gmra.mxu3 %v3872_v60  ;;  %v3939_v60 = vld [vmem:[#allocation3 + $0x200] sm:$0xf]  ;;  %673 = vst [vmem:[#allocation3 + $0x2b8] sm:$0xf] %v641_v54 }
  0xee   : > { %v5222_v39 = vpop.f32.mrf.mxu2  ;;  %v5224_v33 = vpop.f32.mrf.mxu1  ;;  %v3940_v6 = vor.u32 %v4612_v38, %v3939_v60  ;;  %v4622_v38 = vld [vmem:[#allocation3 + $0x270] sm:$0xf0] }
  0xef   : > { %3028 = vmatmul.bf16.gmra.mxu0 %v3876_v61  ;;  %v736_v61 = vpack.c.bf16 %v704_v21, %v704_v21  ;;  %v3977_v21 = vld [vmem:[#allocation3 + $0x26c] sm:$0xf0] }
  0xf0   : > { %v5226_v63 = vpop.f32.mrf.mxu3 }
  0xf1   : > { %768 = vst [vmem:[#allocation3 + $0x298] sm:$0xf] %v736_v61 }
  0xf2   : > { %482 = vst [vmem:[#allocation3 + $0x2d4] sm:$0xf] %v736_v61  ;;  %v3983_v61 = vld [vmem:[#allocation3 + $0x250] sm:$0xf] }
  0xf3   : > { %2766 = vmatmul.bf16.gmra.mxu1 %v3900_v62  ;;  %v4755_v62 = vld [vmem:[%s5488_s1 + $0x218] sm:$0xff]  ;;  %v3984_v7 = vor.u32 %v4622_v38, %v3983_v61  ;;  %v741_v61 = vpack.c.bf16 %v709_v49, %v709_v49 }
  0xf4   : > { %v5228_v15 = vpop.f32.mrf.mxu0  ;;  %3355 = vmatpush.bf16.msra.mxu0 %v4755_v62 }
  0xf5   : > { %773 = vst [vmem:[#allocation3 + $0x34c] sm:$0xf] %v741_v61 }
  0xf6   : > { %v5230_v23 = vpop.f32.mrf.mxu2  ;;  %v5232_v25 = vpop.f32.mrf.mxu1  ;;  %487 = vst [vmem:[#allocation3 + $0x388] sm:$0xf] %v741_v61  ;;  %v711_v61 = vld [vmem:[#allocation2 + $0x141] sm:$0xff] }
  0xf8   : > { %v5234_v26 = vpop.f32.mrf.mxu3  ;;  %v4019_v10 = vld [vmem:[#allocation3 + $0x298] sm:$0xf] }
  0xfb   : > { %2855 = vmatmul.bf16.gmra.mxu2 %v3904_v59 }
  0xfc   : > { %v5236_v28 = vpop.f32.mrf.mxu0 }
  0xfd   : > { %2944 = vmatmul.bf16.gmra.mxu3 %v3908_v35  ;;  %v515_v35 = vld [vmem:[#allocation2 + $0xfa] sm:$0xff] }
  0xfe   : > { %v5241_v44 = vpop.f32.mrf.mxu2  ;;  %v547_v43 = vpack.c.bf16 %v515_v35, %v515_v35  ;;  %v517_v35 = vld [vmem:[#allocation2 + $0x112] sm:$0xff] }
  0xff   : > { %3033 = vmatmul.bf16.gmra.mxu0 %v3912_v2  ;;  %v610_v2 = vld [vmem:[#allocation2 + $0x108] sm:$0xff] }
 0x100   : > { %v5246_v47 = vpop.f32.mrf.mxu3  ;;  %v5248_v41 = vpop.f32.mrf.mxu1  ;;  %v642_v46 = vpack.c.bf16 %v610_v2, %v610_v2  ;;  %579 = vst [vmem:[#allocation3 + $0x2fc] sm:$0xf] %v547_v43  ;;  %v612_v2 = vld [vmem:[#allocation2 + $0x120] sm:$0xff] }
 0x101   : > { %v644_v31 = vpack.c.bf16 %v612_v2, %v612_v2 }
 0x102   : > { %674 = vst [vmem:[#allocation3 + $0x2dc] sm:$0xf] %v642_v46  ;;  %v549_v46 = vpack.c.bf16 %v517_v35, %v517_v35  ;;  %v4634_v35 = vld [vmem:[#allocation3 + $0x2d4] sm:$0xf] }
 0x103   : > { %2771 = vmatmul.bf16.gmra.mxu1 %v3936_v45  ;;  %v611_v45 = vld [vmem:[#allocation2 + $0x110] sm:$0xff]  ;;  %676 = vst [vmem:[#allocation3 + $0x324] sm:$0xf] %v644_v31 }
 0x104   : > { %v5253_v58 = vpop.f32.mrf.mxu0  ;;  %v643_v29 = vpack.c.bf16 %v611_v45, %v611_v45  ;;  %v4730_v45 = vld [vmem:[%s5488_s1 + $0x150] sm:$0xff]  ;;  %581 = vst [vmem:[#allocation3 + $0x344] sm:$0xf] %v549_v46 }
 0x105   : > { %3089 = vmatpush.bf16.msra.mxu1 %v4730_v45  ;;  %v519_v31 = vld [vmem:[#allocation2 + $0x12a] sm:$0xff] }
 0x106   : > { %v5258_v3 = vpop.f32.mrf.mxu2  ;;  %675 = vst [vmem:[#allocation3 + $0x300] sm:$0xf] %v643_v29  ;;  %v613_v29 = vld [vmem:[#allocation2 + $0x128] sm:$0xff] }
 0x107   : > { %v645_v11 = vpack.c.bf16 %v613_v29, %v613_v29  ;;  %v518_v29 = vld [vmem:[#allocation2 + $0x122] sm:$0xff] }
 0x108   : > { %v5260_v8 = vpop.f32.mrf.mxu3  ;;  %v5262_v12 = vpop.f32.mrf.mxu1  ;;  %v550_v49 = vpack.c.bf16 %v518_v29, %v518_v29  ;;  %v4737_v29 = vld [vmem:[%s5488_s1 + $0x188] sm:$0xff] }
 0x109   : > { %677 = vst [vmem:[#allocation3 + $0x348] sm:$0xf] %v645_v11  ;;  %v614_v11 = vld [vmem:[#allocation2 + $0x138] sm:$0xff] }
 0x10a   : > { %582 = vst [vmem:[#allocation3 + $0x368] sm:$0xf] %v550_v49 }
 0x10b   : > { %2860 = vmatmul.bf16.gmra.mxu2 %v3940_v6 }
 0x10c   : > { %v5264_v17 = vpop.f32.mrf.mxu0 }
 0x10d   : > { %2949 = vmatmul.bf16.gmra.mxu3 %v3944_v13  ;;  %v4738_v13 = vld [vmem:[%s5488_s1 + $0x190] sm:$0xff] }
 0x10e   : > { %v5266_v24 = vpop.f32.mrf.mxu2  ;;  %3178 = vmatpush.bf16.msra.mxu2 %v4738_v13  ;;  %v4631_v13 = vld [vmem:[#allocation3 + $0x2b8] sm:$0xf0] }
 0x10f   : > { %3038 = vmatmul.bf16.gmra.mxu0 %v3948_v37 }
 0x110   : > { %v5268_v59 = vpop.f32.mrf.mxu3  ;;  %v2737_v27 = vpop.f32.mrf.mxu1 }
 0x111   : > { %v2738_v34 = vadd.f32 %v2737_v27, %v5192_v22  ;;  %v4617_v22 = vld [vmem:[#allocation3 + $0x24c] sm:$0xf] }
 0x112   : > { %v3980_v5 = vor.u32 %v4617_v22, %v3977_v21  ;;  %3179 = vmatpush.bf16.msra.mxu2 %v4737_v29  ;;  %v4649_v29 = vld [vmem:[#allocation3 + $0x348] sm:$0xf0] }
 0x113   : > { %2776 = vmatmul.bf16.gmra.mxu1 %v3972_v55 }
 0x114   : > { %v5271_v48 = vpop.f32.mrf.mxu0 }
 0x116   : > { %v5273_v54 = vpop.f32.mrf.mxu2 }
 0x118   : > { %v5275_v60 = vpop.f32.mrf.mxu3  ;;  %v2739_v62 = vpop.f32.mrf.mxu1 }
 0x119   : > { %v2740_v4 = vadd.f32 %v2739_v62, %v5209_v40  ;;  %v4746_v40 = vld [vmem:[%s5488_s1 + $0x1d0] sm:$0xff]  ;;  %v4626_v62 = vld [vmem:[#allocation3 + $0x294] sm:$0xf] }
 0x11a   : > { %3267 = vmatpush.bf16.msra.mxu3 %v4746_v40 }
 0x11b   : > { %2865 = vmatmul.bf16.gmra.mxu2 %v3976_v56  ;;  %v4754_v56 = vld [vmem:[%s5488_s1 + $0x210] sm:$0xff] }
 0x11c   : > { %v3004_v6 = vpop.f32.mrf.mxu0  ;;  %3356 = vmatpush.bf16.msra.mxu0 %v4754_v56  ;;  %v710_v56 = vld [vmem:[#allocation2 + $0x139] sm:$0xff] }
 0x11d   : > { %2954 = vmatmul.bf16.gmra.mxu3 %v3980_v5  ;;  %v4013_v5 = vld [vmem:[#allocation3 + $0x2b4] sm:$0xf0] }
 0x11e   : > { %v2826_v37 = vpop.f32.mrf.mxu2 }
 0x11f   : > { %3043 = vmatmul.bf16.gmra.mxu0 %v3984_v7  ;;  %v2827_v18 = vadd.f32 %v2826_v37, %v2738_v34  ;;  %v548_v34 = vpack.c.bf16 %v516_v32, %v516_v32 }
 0x120   : > { %v2915_v55 = vpop.f32.mrf.mxu3  ;;  %v2742_v27 = vpop.f32.mrf.mxu1 }
 0x121   : > { %v2916_v42 = vadd.f32 %v2915_v55, %v2827_v18  ;;  %v2743_v43 = vadd.f32 %v2742_v27, %v5220_v57  ;;  %580 = vst [vmem:[#allocation3 + $0x320] sm:$0xf] %v548_v34  ;;  %v4630_v57 = vld [vmem:[#allocation3 + $0x2b0] sm:$0xf0]  ;;  %v4020_v55 = vor.u32 %v4631_v13, %v4019_v10  ;;  %v4049_v10 = vld [vmem:[#allocation3 + $0x2fc] sm:$0xf0] }
 0x122   : > { %v4012_v9 = vor.u32 %v4630_v57, %v4011_v51  ;;  %v551_v51 = vpack.c.bf16 %v519_v31, %v519_v31  ;;  %v647_v57 = vpack.c.bf16 %v615_v52, %v615_v52  ;;  %v520_v52 = vld [vmem:[#allocation2 + $0x13a] sm:$0xff] }
 0x123   : > { %2781 = vmatmul.bf16.gmra.mxu1 %v4008_v19  ;;  %v5288_v22 = vadd.f32 %v3004_v6, %v2916_v42  ;;  %v4016_v19 = vor.u32 %v4626_v62, %v4013_v5  ;;  %v4047_v5 = vld [vmem:[#allocation3 + $0x2d8] sm:$0xf] }
 0x124   : > { %v3006_v21 = vpop.f32.mrf.mxu0  ;;  %583 = vst [vmem:[#allocation3 + $0x38c] sm:$0xf] %v551_v51 }
 0x125   : > { %679 = vst [vmem:[#allocation3 + $0x390] sm:$0xf] %v647_v57  ;;  %v616_v57 = vld [vmem:[#allocation2 + $0x150] sm:$0xff] }
 0x126   : > { %v2828_v38 = vpop.f32.mrf.mxu2 }
 0x127   : > { %v2829_v7 = vadd.f32 %v2828_v38, %v2740_v4  ;;  %v4041_v4 = vld [vmem:[#allocation3 + $0x2f4] sm:$0xf0]  ;;  %v742_v38 = vpack.c.bf16 %v710_v56, %v710_v56 }
 0x128   : > { %v2917_v6 = vpop.f32.mrf.mxu3  ;;  %v2744_v37 = vpop.f32.mrf.mxu1  ;;  %v4044_v45 = vor.u32 %v4634_v35, %v4041_v4 }
 0x129   : > { %v2918_v18 = vadd.f32 %v2917_v6, %v2829_v7  ;;  %v2745_v40 = vadd.f32 %v2744_v37, %v5228_v15  ;;  %v4639_v7 = vld [vmem:[#allocation3 + $0x2f8] sm:$0xf0]  ;;  %774 = vst [vmem:[#allocation3 + $0x370] sm:$0xf] %v742_v38 }
 0x12a   : > { %v4048_v37 = vor.u32 %v4639_v7, %v4047_v5  ;;  %488 = vst [vmem:[#allocation3 + $0x3ac] sm:$0xf] %v742_v38  ;;  %v4729_v38 = vld [vmem:[%s5488_s1 + $0x148] sm:$0xff]  ;;  %v617_v5 = vld [vmem:[#allocation2 + $0x158] sm:$0xff]  ;;  %v648_v7 = vpack.c.bf16 %v616_v57, %v616_v57 }
 0x12b   : > { %2870 = vmatmul.bf16.gmra.mxu2 %v4012_v9  ;;  %v5294_v27 = vadd.f32 %v3006_v21, %v2918_v18  ;;  %v646_v21 = vpack.c.bf16 %v614_v11, %v614_v11  ;;  %v743_v9 = vpack.c.bf16 %v711_v61, %v711_v61  ;;  %3090 = vmatpush.bf16.msra.mxu1 %v4729_v38 }
 0x12c   : > { %v3009_v32 = vpop.f32.mrf.mxu0  ;;  %680 = vst [vmem:[#allocation3 + $0x3b4] sm:$0xf] %v648_v7  ;;  %v523_v7 = vld [vmem:[#allocation2 + $0x15a] sm:$0xff] }
 0x12d   : > { %2959 = vmatmul.bf16.gmra.mxu3 %v4016_v19  ;;  %678 = vst [vmem:[#allocation3 + $0x36c] sm:$0xf] %v646_v21  ;;  %v4055_v19 = vld [vmem:[#allocation3 + $0x2e0] sm:$0xf]  ;;  %v521_v21 = vld [vmem:[#allocation2 + $0x142] sm:$0xff] }
 0x12e   : > { %v2831_v2 = vpop.f32.mrf.mxu2  ;;  %775 = vst [vmem:[#allocation3 + $0x394] sm:$0xf] %v743_v9 }
 0x12f   : > { %3048 = vmatmul.bf16.gmra.mxu0 %v4020_v55  ;;  %v2832_v42 = vadd.f32 %v2831_v2, %v2743_v43  ;;  %v4640_v55 = vld [vmem:[#allocation3 + $0x300] sm:$0xf0]  ;;  %489 = vst [vmem:[#allocation3 + $0x3d0] sm:$0xf] %v743_v9  ;;  %v649_v9 = vpack.c.bf16 %v617_v5, %v617_v5 }
 0x130   : > { %v2920_v34 = vpop.f32.mrf.mxu3  ;;  %v2747_v46 = vpop.f32.mrf.mxu1  ;;  %v522_v5 = vld [vmem:[#allocation2 + $0x152] sm:$0xff] }
 0x131   : > { %v2921_v15 = vadd.f32 %v2920_v34, %v2832_v42  ;;  %v2748_v14 = vadd.f32 %v2747_v46, %v5236_v28  ;;  %v4635_v28 = vld [vmem:[#allocation3 + $0x2dc] sm:$0xf]  ;;  %v4056_v42 = vor.u32 %v4640_v55, %v4055_v19  ;;  %681 = vst [vmem:[#allocation3 + $0x3d8] sm:$0xf] %v649_v9 }
 0x132   : > { %v4052_v4 = vor.u32 %v4635_v28, %v4049_v10  ;;  %v4643_v46 = vld [vmem:[#allocation3 + $0x31c] sm:$0xf]  ;;  %v713_v28 = vld [vmem:[#allocation2 + $0x159] sm:$0xff]  ;;  %v4083_v10 = vld [vmem:[#allocation3 + $0x320] sm:$0xf] }
 0x133   : > { %2786 = vmatmul.bf16.gmra.mxu1 %v4044_v45  ;;  %v5297_v43 = vadd.f32 %v3009_v32, %v2921_v15  ;;  %v4753_v19 = vld [vmem:[%s5488_s1 + $0x208] sm:$0xff]  ;;  %v745_v55 = vpack.c.bf16 %v713_v28, %v713_v28  ;;  %v555_v28 = vpack.c.bf16 %v523_v7, %v523_v7  ;;  %v4661_v7 = vld [vmem:[#allocation3 + $0x3ac] sm:$0xf] }
 0x134   : > { %v3011_v62 = vpop.f32.mrf.mxu0  ;;  %3357 = vmatpush.bf16.msra.mxu0 %v4753_v19  ;;  %v618_v9 = vld [vmem:[#allocation2 + $0x168] sm:$0xff]  ;;  %v715_v19 = vld [vmem:[#allocation2 + $0x171] sm:$0xff] }
 0x135   : > { %777 = vst [vmem:[#allocation3 + $0x3dc] sm:$0xf] %v745_v55 }
 0x136   : > { %v2833_v6 = vpop.f32.mrf.mxu2  ;;  %491 = vst [vmem:[#allocation3 + $0x418] sm:$0xf] %v745_v55 }
 0x137   : > { %v2834_v13 = vadd.f32 %v2833_v6, %v2745_v40  ;;  %v4077_v40 = vld [vmem:[#allocation3 + $0x33c] sm:$0xf0]  ;;  %587 = vst [vmem:[#allocation3 + $0x41c] sm:$0xf] %v555_v28 }
 0x138   : > { %v2922_v18 = vpop.f32.mrf.mxu3  ;;  %v2749_v35 = vpop.f32.mrf.mxu1  ;;  %v4080_v15 = vor.u32 %v4643_v46, %v4077_v40  ;;  %v712_v6 = vld [vmem:[#allocation2 + $0x151] sm:$0xff] }
 0x139   : > { %v2923_v32 = vadd.f32 %v2922_v18, %v2834_v13  ;;  %v2750_v2 = vadd.f32 %v2749_v35, %v5253_v58  ;;  %v4745_v58 = vld [vmem:[%s5488_s1 + $0x1c8] sm:$0xff]  ;;  %v744_v13 = vpack.c.bf16 %v712_v6, %v712_v6  ;;  %v4091_v40 = vld [vmem:[#allocation3 + $0x328] sm:$0xf]  ;;  %v554_v6 = vpack.c.bf16 %v522_v5, %v522_v5 }
 0x13a   : > { %3268 = vmatpush.bf16.msra.mxu3 %v4745_v58 }
 0x13b   : > { %2875 = vmatmul.bf16.gmra.mxu2 %v4048_v37  ;;  %v5300_v45 = vadd.f32 %v3011_v62, %v2923_v32  ;;  %v553_v62 = vpack.c.bf16 %v521_v21, %v521_v21  ;;  %v4644_v32 = vld [vmem:[#allocation3 + $0x324] sm:$0xf]  ;;  %776 = vst [vmem:[#allocation3 + $0x3b8] sm:$0xf] %v744_v13 }
 0x13c   : > { %v3014_v34 = vpop.f32.mrf.mxu0  ;;  %490 = vst [vmem:[#allocation3 + $0x3f4] sm:$0xf] %v744_v13  ;;  %v4652_v21 = vld [vmem:[#allocation3 + $0x364] sm:$0xf]  ;;  %v650_v13 = vpack.c.bf16 %v618_v9, %v618_v9 }
 0x13d   : > { %2964 = vmatmul.bf16.gmra.mxu3 %v4052_v4  ;;  %585 = vst [vmem:[#allocation3 + $0x3d4] sm:$0xf] %v553_v62  ;;  %v4085_v4 = vld [vmem:[#allocation3 + $0x344] sm:$0xf0] }
 0x13e   : > { %v2836_v31 = vpop.f32.mrf.mxu2  ;;  %586 = vst [vmem:[#allocation3 + $0x3f8] sm:$0xf] %v554_v6 }
 0x13f   : > { %3053 = vmatmul.bf16.gmra.mxu0 %v4056_v42  ;;  %v2837_v11 = vadd.f32 %v2836_v31, %v2748_v14  ;;  %v552_v14 = vpack.c.bf16 %v520_v52, %v520_v52  ;;  %682 = vst [vmem:[#allocation3 + $0x3fc] sm:$0xf] %v650_v13  ;;  %v4744_v13 = vld [vmem:[%s5488_s1 + $0x1c0] sm:$0xff] }
 0x140   : > { %v2925_v49 = vpop.f32.mrf.mxu3  ;;  %v2752_v51 = vpop.f32.mrf.mxu1  ;;  %3269 = vmatpush.bf16.msra.mxu3 %v4744_v13 }
 0x141   : > { %v2926_v56 = vadd.f32 %v2925_v49, %v2837_v11  ;;  %v2753_v61 = vadd.f32 %v2752_v51, %v5264_v17  ;;  %584 = vst [vmem:[#allocation3 + $0x3b0] sm:$0xf] %v552_v14  ;;  %v4648_v17 = vld [vmem:[#allocation3 + $0x340] sm:$0xf0]  ;;  %v4092_v49 = vor.u32 %v4649_v29, %v4091_v40  ;;  %v4121_v40 = vld [vmem:[#allocation3 + $0x38c] sm:$0xf0] }
 0x142   : > { %v4084_v46 = vor.u32 %v4648_v17, %v4083_v10  ;;  %v619_v10 = vld [vmem:[#allocation2 + $0x170] sm:$0xff] }
 0x143   : > { %2791 = vmatmul.bf16.gmra.mxu1 %v4080_v15  ;;  %v5312_v37 = vadd.f32 %v3014_v34, %v2926_v56  ;;  %v4088_v15 = vor.u32 %v4644_v32, %v4085_v4  ;;  %v714_v17 = vld [vmem:[#allocation2 + $0x169] sm:$0xff]  ;;  %v4119_v32 = vld [vmem:[#allocation3 + $0x368] sm:$0xf]  ;;  %v4657_v4 = vld [vmem:[#allocation3 + $0x388] sm:$0xf0] }
 0x144   : > { %v3016_v18 = vpop.f32.mrf.mxu0  ;;  %v746_v55 = vpack.c.bf16 %v714_v17, %v714_v17 }
 0x146   : > { %v2838_v35 = vpop.f32.mrf.mxu2  ;;  %778 = vst [vmem:[#allocation3 + $0x400] sm:$0xf] %v746_v55 }
 0x147   : > { %v2839_v42 = vadd.f32 %v2838_v35, %v2750_v2  ;;  %v4113_v2 = vld [vmem:[#allocation3 + $0x384] sm:$0xf0]  ;;  %492 = vst [vmem:[#allocation3 + $0x43c] sm:$0xf] %v746_v55 }
 0x148   : > { %v2927_v34 = vpop.f32.mrf.mxu3  ;;  %v2754_v31 = vpop.f32.mrf.mxu1  ;;  %v4116_v38 = vor.u32 %v4652_v21, %v4113_v2  ;;  %v525_v55 = vld [vmem:[#allocation2 + $0x172] sm:$0xff] }
 0x149   : > { %v2928_v11 = vadd.f32 %v2927_v34, %v2839_v42  ;;  %v2755_v58 = vadd.f32 %v2754_v31, %v5271_v48  ;;  %v747_v42 = vpack.c.bf16 %v715_v19, %v715_v19  ;;  %v4653_v34 = vld [vmem:[#allocation3 + $0x36c] sm:$0xf]  ;;  %v4120_v31 = vor.u32 %v4657_v4, %v4119_v32  ;;  %v524_v19 = vld [vmem:[#allocation2 + $0x16a] sm:$0xff]  ;;  %v4155_v4 = vld [vmem:[#allocation3 + $0x3b0] sm:$0xf] }
 0x14a   : > { %v4124_v2 = vor.u32 %v4653_v34, %v4121_v40  ;;  %v557_v32 = vpack.c.bf16 %v525_v55, %v525_v55 }
 0x14b   : > { %2880 = vmatmul.bf16.gmra.mxu2 %v4084_v46  ;;  %v5318_v51 = vadd.f32 %v3016_v18, %v2928_v11  ;;  %v651_v18 = vpack.c.bf16 %v619_v10, %v619_v10  ;;  %779 = vst [vmem:[#allocation3 + $0x424] sm:$0xf] %v747_v42 }
 0x14c   : > { %v3019_v52 = vpop.f32.mrf.mxu0  ;;  %493 = vst [vmem:[#allocation3 + $0x460] sm:$0xf] %v747_v42 }
 0x14d   : > { %2969 = vmatmul.bf16.gmra.mxu3 %v4088_v15  ;;  %683 = vst [vmem:[#allocation3 + $0x420] sm:$0xf] %v651_v18  ;;  %v4127_v15 = vld [vmem:[#allocation3 + $0x370] sm:$0xf] }
 0x14e   : > { %v2841_v57 = vpop.f32.mrf.mxu2  ;;  %589 = vst [vmem:[#allocation3 + $0x464] sm:$0xf] %v557_v32 }
 0x14f   : > { %3058 = vmatmul.bf16.gmra.mxu0 %v4092_v49  ;;  %v2842_v56 = vadd.f32 %v2841_v57, %v2753_v61  ;;  %v4658_v49 = vld [vmem:[#allocation3 + $0x390] sm:$0xf0]  ;;  %v267_v57 = vld [vmem:[%s4852_s22 + $0xf0] sm:$0xff] }
 0x150   : > { %v2930_v14 = vpop.f32.mrf.mxu3  ;;  %v2757_v62 = vpop.f32.mrf.mxu1  ;;  %300 = vst [vmem:[#allocation2 + $0x181] sm:$0xff] %v267_v57 }
 0x151   : > { %v2931_v48 = vadd.f32 %v2930_v14, %v2842_v56  ;;  %v268_v56 = vld [vmem:[%s4852_s22 + $0xf8] sm:$0xff]  ;;  %v2758_v9 = vadd.f32 %v2757_v62, %v5184_v1  ;;  %v4728_v62 = vld [vmem:[%s5488_s1 + $0x140] sm:$0xff] }
 0x152   : > { %301 = vst [vmem:[#allocation2 + $0x189] sm:$0xff] %v268_v56  ;;  %3091 = vmatpush.bf16.msra.mxu1 %v4728_v62 }
 0x153   : > { %2796 = vmatmul.bf16.gmra.mxu1 %v4116_v38  ;;  %v5320_v35 = vadd.f32 %v3019_v52, %v2931_v48  ;;  %v4128_v38 = vor.u32 %v4658_v49, %v4127_v15  ;;  %v4736_v48 = vld [vmem:[%s5488_s1 + $0x180] sm:$0xff]  ;;  %v749_v49 = vpack.c.bf16 %v268_v56, %v268_v56 }
 0x154   : > { %v3021_v61 = vpop.f32.mrf.mxu0  ;;  %3180 = vmatpush.bf16.msra.mxu2 %v4736_v48  ;;  %v4163_v48 = vld [vmem:[#allocation3 + $0x3b8] sm:$0xf] }
 0x155   : > { %781 = vst [vmem:[#allocation3 + $0x46c] sm:$0xf] %v749_v49  ;;  %v975_v49 = vld [vmem:[#allocation2 + $0x31] sm:$0xff] }
 0x156   : > { %v2843_v46 = vpop.f32.mrf.mxu2 }
 0x157   : > { %v2844_v29 = vadd.f32 %v2843_v46, %v2755_v58  ;;  %v4149_v58 = vld [vmem:[#allocation3 + $0x3cc] sm:$0xf0]  ;;  %v748_v46 = vpack.c.bf16 %v267_v57, %v267_v57  ;;  %v4157_v57 = vld [vmem:[#allocation3 + $0x3d4] sm:$0xf0] }
 0x158   : > { %v2932_v11 = vpop.f32.mrf.mxu3  ;;  %v2759_v52 = vpop.f32.mrf.mxu1  ;;  %v4152_v10 = vor.u32 %v4661_v7, %v4149_v58  ;;  %v620_v42 = vld [vmem:[#allocation2 + $0x180] sm:$0xff] }
 0x159   : > { %v2933_v21 = vadd.f32 %v2932_v11, %v2844_v29  ;;  %v4666_v29 = vld [vmem:[#allocation3 + $0x3d0] sm:$0xf0]  ;;  %v621_v11 = vld [vmem:[#allocation2 + $0x188] sm:$0xff]  ;;  %v652_v15 = vpack.c.bf16 %v620_v42, %v620_v42  ;;  %780 = vst [vmem:[#allocation3 + $0x448] sm:$0xf] %v748_v46  ;;  %v782_v42 = vld [vmem:[#allocation2 + $0x1a] sm:$0xff] }
 0x15a   : > { %v4662_v7 = vld [vmem:[#allocation3 + $0x3b4] sm:$0xf]  ;;  %v4156_v58 = vor.u32 %v4666_v29, %v4155_v4  ;;  %v879_v29 = vld [vmem:[#allocation2 + $0x30] sm:$0xff] }
 0x15b   : > { %2885 = vmatmul.bf16.gmra.mxu2 %v4120_v31  ;;  %v5324_v14 = vadd.f32 %v3021_v61, %v2933_v21  ;;  %v556_v61 = vpack.c.bf16 %v524_v19, %v524_v19  ;;  %v4752_v31 = vld [vmem:[%s5488_s1 + $0x200] sm:$0xff]  ;;  %v2760_v21 = vadd.f32 %v2759_v52, %v5190_v16  ;;  %684 = vst [vmem:[#allocation3 + $0x444] sm:$0xf] %v652_v15  ;;  %v4185_v19 = vld [vmem:[#allocation3 + $0x414] sm:$0xf0] }
 0x15c   : > { %v3024_v5 = vpop.f32.mrf.mxu0  ;;  %3358 = vmatpush.bf16.msra.mxu0 %v4752_v31  ;;  %v4160_v13 = vor.u32 %v4662_v7, %v4157_v57  ;;  %v783_v46 = vld [vmem:[#allocation2 + $0x22] sm:$0xff]  ;;  %v1071_v7 = vld [vmem:[#allocation2 + $0x32] sm:$0xff] }
 0x15d   : > { %2974 = vmatmul.bf16.gmra.mxu3 %v4124_v2  ;;  %588 = vst [vmem:[#allocation3 + $0x440] sm:$0xf] %v556_v61  ;;  %v653_v2 = vpack.c.bf16 %v621_v11, %v621_v11  ;;  %v814_v11 = vpack.c.bf16 %v782_v42, %v782_v42  ;;  %v815_v15 = vpack.c.bf16 %v783_v46, %v783_v46 }
 0x15e   : > { %v2846_v6 = vpop.f32.mrf.mxu2 }
 0x15f   : > { %3063 = vmatmul.bf16.gmra.mxu0 %v4128_v38  ;;  %v2847_v28 = vadd.f32 %v2846_v6, %v2758_v9  ;;  %685 = vst [vmem:[#allocation3 + $0x468] sm:$0xf] %v653_v2  ;;  %v4667_v6 = vld [vmem:[#allocation3 + $0x3d8] sm:$0xf0]  ;;  %v911_v2 = vpack.c.bf16 %v879_v29, %v879_v29 }
 0x160   : > { %v2935_v18 = vpop.f32.mrf.mxu3  ;;  %v2762_v17 = vpop.f32.mrf.mxu1  ;;  %v4164_v56 = vor.u32 %v4667_v6, %v4163_v48  ;;  %846 = vst [vmem:[#allocation3 + $0x14] sm:$0xf] %v814_v11  ;;  %v4221_v11 = vld [vmem:[#allocation3 + $0x45c] sm:$0xf0] }
 0x161   : > { %v2936_v1 = vadd.f32 %v2935_v18, %v2847_v28  ;;  %v4670_v18 = vld [vmem:[#allocation3 + $0x3f4] sm:$0xf]  ;;  %v2763_v55 = vadd.f32 %v2762_v17, %v5199_v0  ;;  %v1007_v0 = vpack.c.bf16 %v975_v49, %v975_v49  ;;  %v1072_v17 = vld [vmem:[#allocation2 + $0x3a] sm:$0xff]  ;;  %847 = vst [vmem:[#allocation3 + $0x38] sm:$0xf] %v815_v15 }
 0x162   : > { %v4188_v61 = vor.u32 %v4670_v18, %v4185_v19  ;;  %943 = vst [vmem:[#allocation3 + $0x18] sm:$0xf] %v911_v2  ;;  %v4193_v18 = vld [vmem:[#allocation3 + $0x41c] sm:$0xf0]  ;;  %v1104_v19 = vpack.c.bf16 %v1072_v17, %v1072_v17 }
 0x163   : > { %2801 = vmatmul.bf16.gmra.mxu1 %v4152_v10  ;;  %v5336_v34 = vadd.f32 %v3024_v5, %v2936_v1  ;;  %1039 = vst [vmem:[#allocation3 + $0x1c] sm:$0xf] %v1007_v0  ;;  %v882_v0 = vld [vmem:[#allocation2 + $0x50] sm:$0xff] }
 0x164   : > { %v3026_v40 = vpop.f32.mrf.mxu0  ;;  %1136 = vst [vmem:[#allocation3 + $0x44] sm:$0xf] %v1104_v19 }
 0x165   : > { %849 = vst [vmem:[#allocation3 + $0x80] sm:$0xf] %v1104_v19  ;;  %v4227_v19 = vld [vmem:[#allocation3 + $0x440] sm:$0xf] }
 0x166   : > { %v2848_v38 = vpop.f32.mrf.mxu2 }
 0x167   : > { %v2849_v5 = vadd.f32 %v2848_v38, %v2760_v21  ;;  %v976_v21 = vld [vmem:[#allocation2 + $0x39] sm:$0xff] }
 0x168   : > { %v2937_v9 = vpop.f32.mrf.mxu3  ;;  %v2764_v28 = vpop.f32.mrf.mxu1  ;;  %v1008_v48 = vpack.c.bf16 %v976_v21, %v976_v21 }
 0x169   : > { %v2938_v10 = vadd.f32 %v2937_v9, %v2849_v5  ;;  %v4675_v9 = vld [vmem:[#allocation3 + $0x418] sm:$0xf0]  ;;  %v2765_v6 = vadd.f32 %v2764_v28, %v5216_v53 }
 0x16a   : > { %1040 = vst [vmem:[#allocation3 + $0x40] sm:$0xf] %v1008_v48  ;;  %v978_v48 = vld [vmem:[#allocation2 + $0x51] sm:$0xff] }
 0x16b   : > { %2890 = vmatmul.bf16.gmra.mxu2 %v4156_v58  ;;  %v5342_v16 = vadd.f32 %v3026_v40, %v2938_v10  ;;  %v880_v40 = vld [vmem:[#allocation2 + $0x38] sm:$0xff]  ;;  %v4191_v58 = vld [vmem:[#allocation3 + $0x3f8] sm:$0xf]  ;;  %v1103_v10 = vpack.c.bf16 %v1071_v7, %v1071_v7 }
 0x16c   : > { %v3029_v52 = vpop.f32.mrf.mxu0  ;;  %v912_v38 = vpack.c.bf16 %v880_v40, %v880_v40  ;;  %v881_v7 = vld [vmem:[#allocation2 + $0x48] sm:$0xff] }
 0x16d   : > { %2979 = vmatmul.bf16.gmra.mxu3 %v4160_v13  ;;  %1135 = vst [vmem:[#allocation3 + $0x20] sm:$0xf] %v1103_v10 }
 0x16e   : > { %v2851_v1 = vpop.f32.mrf.mxu2  ;;  %944 = vst [vmem:[#allocation3 + $0x3c] sm:$0xf] %v912_v38 }
 0x16f   : > { %3068 = vmatmul.bf16.gmra.mxu0 %v4164_v56  ;;  %v2852_v62 = vadd.f32 %v2851_v1, %v2763_v55  ;;  %v4671_v56 = vld [vmem:[#allocation3 + $0x3fc] sm:$0xf]  ;;  %v4192_v1 = vor.u32 %v4675_v9, %v4191_v58  ;;  %848 = vst [vmem:[#allocation3 + $0x5c] sm:$0xf] %v1103_v10  ;;  %v913_v58 = vpack.c.bf16 %v881_v7, %v881_v7  ;;  %v3697_v7 = vld [vmem:[#allocation3 + $0x34] sm:$0xf0] }
 0x170   : > { %v2940_v32 = vpop.f32.mrf.mxu3  ;;  %v2767_v4 = vpop.f32.mrf.mxu1  ;;  %v4196_v46 = vor.u32 %v4671_v56, %v4193_v18  ;;  %v914_v9 = vpack.c.bf16 %v882_v0, %v882_v0  ;;  %v1010_v10 = vpack.c.bf16 %v978_v48, %v978_v48  ;;  %v1074_v56 = vld [vmem:[#allocation2 + $0x52] sm:$0xff] }
 0x171   : > { %v2941_v31 = vadd.f32 %v2940_v32, %v2852_v62  ;;  %v2768_v15 = vadd.f32 %v2767_v4, %v5224_v33  ;;  %945 = vst [vmem:[#allocation3 + $0x60] sm:$0xf] %v913_v58 }
 0x172   : > { %946 = vst [vmem:[#allocation3 + $0x84] sm:$0xf] %v914_v9 }
 0x173   : > { %2806 = vmatmul.bf16.gmra.mxu1 %v4188_v61  ;;  %v5345_v57 = vadd.f32 %v3029_v52, %v2941_v31  ;;  %v4199_v52 = vld [vmem:[#allocation3 + $0x400] sm:$0xf]  ;;  %v4676_v61 = vld [vmem:[#allocation3 + $0x420] sm:$0xf0]  ;;  %v4679_v31 = vld [vmem:[#allocation3 + $0x43c] sm:$0xf] }
 0x174   : > { %v3031_v5 = vpop.f32.mrf.mxu0  ;;  %v4200_v53 = vor.u32 %v4676_v61, %v4199_v52  ;;  %v4224_v21 = vor.u32 %v4679_v31, %v4221_v11  ;;  %v4680_v61 = vld [vmem:[#allocation3 + $0x444] sm:$0xf]  ;;  %1042 = vst [vmem:[#allocation3 + $0x88] sm:$0xf] %v1010_v10  ;;  %v4235_v11 = vld [vmem:[#allocation3 + $0x448] sm:$0xf] }
 0x175   : > { %v884_v10 = vld [vmem:[#allocation2 + $0x68] sm:$0xff] }
 0x176   : > { %v2853_v13 = vpop.f32.mrf.mxu2 }
 0x177   : > { %v2854_v55 = vadd.f32 %v2853_v13, %v2765_v6  ;;  %v1073_v13 = vld [vmem:[#allocation2 + $0x4a] sm:$0xff] }
 0x178   : > { %v2942_v62 = vpop.f32.mrf.mxu3  ;;  %v2769_v32 = vpop.f32.mrf.mxu1  ;;  %v1105_v33 = vpack.c.bf16 %v1073_v13, %v1073_v13  ;;  %v979_v13 = vld [vmem:[#allocation2 + $0x61] sm:$0xff] }
 0x179   : > { %v2943_v42 = vadd.f32 %v2942_v62, %v2854_v55  ;;  %v4684_v55 = vld [vmem:[#allocation3 + $0x460] sm:$0xf0]  ;;  %v2770_v62 = vadd.f32 %v2769_v32, %v5232_v25 }
 0x17a   : > { %1137 = vst [vmem:[#allocation3 + $0x68] sm:$0xf] %v1105_v33 }
 0x17b   : > { %2895 = vmatmul.bf16.gmra.mxu2 %v4192_v1  ;;  %v5348_v28 = vadd.f32 %v3031_v5, %v2943_v42  ;;  %v977_v5 = vld [vmem:[#allocation2 + $0x49] sm:$0xff]  ;;  %v1106_v1 = vpack.c.bf16 %v1074_v56, %v1074_v56  ;;  %v4229_v42 = vld [vmem:[#allocation3 + $0x464] sm:$0xf0]  ;;  %850 = vst [vmem:[#allocation3 + $0xa4] sm:$0xf] %v1105_v33 }
 0x17c   : > { %v3034_v29 = vpop.f32.mrf.mxu0  ;;  %v1009_v6 = vpack.c.bf16 %v977_v5, %v977_v5 }
 0x17d   : > { %2984 = vmatmul.bf16.gmra.mxu3 %v4196_v46  ;;  %1138 = vst [vmem:[#allocation3 + $0x8c] sm:$0xf] %v1106_v1 }
 0x17e   : > { %v2856_v40 = vpop.f32.mrf.mxu2  ;;  %1041 = vst [vmem:[#allocation3 + $0x64] sm:$0xf] %v1009_v6  ;;  %v883_v6 = vld [vmem:[#allocation2 + $0x60] sm:$0xff] }
 0x17f   : > { %3073 = vmatmul.bf16.gmra.mxu0 %v4200_v53  ;;  %v2857_v49 = vadd.f32 %v2856_v40, %v2768_v15  ;;  %v4228_v53 = vor.u32 %v4684_v55, %v4227_v19  ;;  %v4685_v15 = vld [vmem:[#allocation3 + $0x468] sm:$0xf0]  ;;  %851 = vst [vmem:[#allocation3 + $0xc8] sm:$0xf] %v1106_v1  ;;  %v915_v33 = vpack.c.bf16 %v883_v6, %v883_v6  ;;  %v3733_v6 = vld [vmem:[#allocation3 + $0x7c] sm:$0xf0] }
 0x180   : > { %v2945_v2 = vpop.f32.mrf.mxu3  ;;  %v2772_v38 = vpop.f32.mrf.mxu1  ;;  %v916_v19 = vpack.c.bf16 %v884_v10, %v884_v10  ;;  %v1011_v55 = vpack.c.bf16 %v979_v13, %v979_v13 }
 0x181   : > { %v2946_v17 = vadd.f32 %v2945_v2, %v2857_v49  ;;  %v4232_v49 = vor.u32 %v4680_v61, %v4229_v42  ;;  %v4546_v2 = vld [vmem:[#allocation3 + $0x14] sm:$0xf]  ;;  %v2773_v0 = vadd.f32 %v2772_v38, %v5248_v41  ;;  %947 = vst [vmem:[#allocation3 + $0xa8] sm:$0xf] %v915_v33  ;;  %v3703_v42 = vld [vmem:[#allocation3 + $0x18] sm:$0xf] }
 0x182   : > { %v3700_v9 = vor.u32 %v4546_v2, %v3697_v7  ;;  %948 = vst [vmem:[#allocation3 + $0xcc] sm:$0xf] %v916_v19  ;;  %v3711_v7 = vld [vmem:[#allocation3 + $0x20] sm:$0xf] }
 0x183   : > { %2811 = vmatmul.bf16.gmra.mxu1 %v4224_v21  ;;  %v5351_v4 = vadd.f32 %v3034_v29, %v2946_v17  ;;  %v4236_v21 = vor.u32 %v4685_v15, %v4235_v11  ;;  %1043 = vst [vmem:[#allocation3 + $0xac] sm:$0xf] %v1011_v55  ;;  %v4547_v15 = vld [vmem:[#allocation3 + $0x1c] sm:$0xf]  ;;  %v885_v55 = vld [vmem:[#allocation2 + $0x78] sm:$0xff] }
 0x184   : > { %v3036_v18 = vpop.f32.mrf.mxu0 }
 0x186   : > { %v2858_v52 = vpop.f32.mrf.mxu2 }
 0x187   : > { %v2859_v46 = vadd.f32 %v2858_v52, %v2770_v62  ;;  %v1075_v62 = vld [vmem:[#allocation2 + $0x62] sm:$0xff]  ;;  %v1076_v52 = vld [vmem:[#allocation2 + $0x6a] sm:$0xff] }
 0x188   : > { %v2947_v31 = vpop.f32.mrf.mxu3  ;;  %v2774_v29 = vpop.f32.mrf.mxu1  ;;  %v1107_v41 = vpack.c.bf16 %v1075_v62, %v1075_v62  ;;  %v981_v62 = vld [vmem:[#allocation2 + $0x79] sm:$0xff] }
 0x189   : > { %v2948_v40 = vadd.f32 %v2947_v31, %v2859_v46  ;;  %v4551_v46 = vld [vmem:[#allocation3 + $0x38] sm:$0xf0]  ;;  %v2775_v31 = vadd.f32 %v2774_v29, %v5262_v12 }
 0x18a   : > { %1139 = vst [vmem:[#allocation3 + $0xb0] sm:$0xf] %v1107_v41 }
 0x18b   : > { %2900 = vmatmul.bf16.gmra.mxu2 %v4228_v53  ;;  %v5354_v25 = vadd.f32 %v3036_v18, %v2948_v40  ;;  %v980_v18 = vld [vmem:[#allocation2 + $0x69] sm:$0xff]  ;;  %v1108_v53 = vpack.c.bf16 %v1076_v52, %v1076_v52  ;;  %852 = vst [vmem:[#allocation3 + $0xec] sm:$0xf] %v1107_v41  ;;  %v917_v41 = vpack.c.bf16 %v885_v55, %v885_v55  ;;  %v3769_v55 = vld [vmem:[#allocation3 + $0xc4] sm:$0xf0] }
 0x18c   : > { %v3039_v32 = vpop.f32.mrf.mxu0  ;;  %v1012_v1 = vpack.c.bf16 %v980_v18, %v980_v18  ;;  %v3705_v40 = vld [vmem:[#allocation3 + $0x3c] sm:$0xf0] }
 0x18d   : > { %2989 = vmatmul.bf16.gmra.mxu3 %v4232_v49  ;;  %1140 = vst [vmem:[#allocation3 + $0xd4] sm:$0xf] %v1108_v53 }
 0x18e   : > { %v2861_v17 = vpop.f32.mrf.mxu2  ;;  %1044 = vst [vmem:[#allocation3 + $0xd0] sm:$0xf] %v1012_v1  ;;  %v886_v1 = vld [vmem:[#allocation2 + $0x80] sm:$0xff] }
 0x18f   : > { %3078 = vmatmul.bf16.gmra.mxu0 %v4236_v21  ;;  %v2862_v58 = vadd.f32 %v2861_v17, %v2773_v0  ;;  %v3704_v21 = vor.u32 %v4551_v46, %v3703_v42  ;;  %v4552_v0 = vld [vmem:[#allocation3 + $0x40] sm:$0xf0]  ;;  %853 = vst [vmem:[#allocation3 + $0x110] sm:$0xf] %v1108_v53  ;;  %v918_v42 = vpack.c.bf16 %v886_v1, %v886_v1 }
 0x190   : > { %v2950_v5 = vpop.f32.mrf.mxu3  ;;  %v2777_v48 = vpop.f32.mrf.mxu1  ;;  %v1013_v46 = vpack.c.bf16 %v981_v62, %v981_v62  ;;  %949 = vst [vmem:[#allocation3 + $0xf0] sm:$0xf] %v917_v41 }
 0x191   : > { %v2951_v56 = vadd.f32 %v2950_v5, %v2862_v58  ;;  %v3708_v58 = vor.u32 %v4547_v15, %v3705_v40  ;;  %v4555_v5 = vld [vmem:[#allocation3 + $0x5c] sm:$0xf]  ;;  %v2778_v10 = vadd.f32 %v2777_v48, %v5197_v30  ;;  %v3739_v40 = vld [vmem:[#allocation3 + $0x60] sm:$0xf]  ;;  %950 = vst [vmem:[#allocation3 + $0x114] sm:$0xf] %v918_v42 }
 0x192   : > { %v3736_v33 = vor.u32 %v4555_v5, %v3733_v6  ;;  %1045 = vst [vmem:[#allocation3 + $0xf4] sm:$0xf] %v1013_v46  ;;  %v3747_v6 = vld [vmem:[#allocation3 + $0x68] sm:$0xf]  ;;  %v887_v46 = vld [vmem:[#allocation2 + $0x90] sm:$0xff] }
 0x193   : > { %3092 = vmatmul.bf16.vlgmr.msra.gmra.mxu1 %v3700_v9  ;;  %v5357_v38 = vadd.f32 %v3039_v32, %v2951_v56  ;;  %v3712_v9 = vor.u32 %v4552_v0, %v3711_v7  ;;  %v4556_v0 = vld [vmem:[#allocation3 + $0x64] sm:$0xf] }
 0x194   : > { %v3041_v61 = vpop.f32.mrf.mxu0 }
 0x196   : > { %v2863_v11 = vpop.f32.mrf.mxu2 }
 0x197   : > { %v2864_v49 = vadd.f32 %v2863_v11, %v2775_v31  ;;  %v1077_v31 = vld [vmem:[#allocation2 + $0x7a] sm:$0xff]  ;;  %v1078_v11 = vld [vmem:[#allocation2 + $0x82] sm:$0xff] }
 0x198   : > { %v2952_v2 = vpop.f32.mrf.mxu3  ;;  %v2779_v32 = vpop.f32.mrf.mxu1  ;;  %v1109_v30 = vpack.c.bf16 %v1077_v31, %v1077_v31  ;;  %v983_v31 = vld [vmem:[#allocation2 + $0x91] sm:$0xff] }
 0x199   : > { %v2953_v17 = vadd.f32 %v2952_v2, %v2864_v49  ;;  %v4560_v49 = vld [vmem:[#allocation3 + $0x80] sm:$0xf0]  ;;  %v2780_v2 = vadd.f32 %v2779_v32, %v5214_v50 }
 0x19a   : > { %1141 = vst [vmem:[#allocation3 + $0xf8] sm:$0xf] %v1109_v30 }
 0x19b   : > { %3181 = vmatmul.bf16.vlgmr.msra.gmra.mxu2 %v3704_v21  ;;  %v5360_v12 = vadd.f32 %v3041_v61, %v2953_v17  ;;  %v982_v61 = vld [vmem:[#allocation2 + $0x81] sm:$0xff]  ;;  %v1110_v21 = vpack.c.bf16 %v1078_v11, %v1078_v11  ;;  %v3741_v17 = vld [vmem:[#allocation3 + $0x84] sm:$0xf0]  ;;  %854 = vst [vmem:[#allocation3 + $0x134] sm:$0xf] %v1109_v30  ;;  %v919_v30 = vpack.c.bf16 %v887_v46, %v887_v46 }
 0x19c   : > { %v3044_v29 = vpop.f32.mrf.mxu0  ;;  %v1014_v53 = vpack.c.bf16 %v982_v61, %v982_v61  ;;  %v3805_v46 = vld [vmem:[#allocation3 + $0x10c] sm:$0xf0] }
 0x19d   : > { %3270 = vmatmul.bf16.vlgmr.msra.gmra.mxu3 %v3708_v58  ;;  %1142 = vst [vmem:[#allocation3 + $0x11c] sm:$0xf] %v1110_v21 }
 0x19e   : > { %v2866_v13 = vpop.f32.mrf.mxu2  ;;  %1046 = vst [vmem:[#allocation3 + $0x118] sm:$0xf] %v1014_v53  ;;  %v888_v53 = vld [vmem:[#allocation2 + $0x98] sm:$0xff] }
 0x19f   : > { %3359 = vmatmul.bf16.vlgmr.msra.gmra.mxu0 %v3712_v9  ;;  %v2867_v56 = vadd.f32 %v2866_v13, %v2778_v10  ;;  %v3740_v9 = vor.u32 %v4560_v49, %v3739_v40  ;;  %v4561_v10 = vld [vmem:[#allocation3 + $0x88] sm:$0xf0]  ;;  %855 = vst [vmem:[#allocation3 + $0x158] sm:$0xf] %v1110_v21  ;;  %v920_v40 = vpack.c.bf16 %v888_v53, %v888_v53 }
 0x1a0   : > { %v2955_v19 = vpop.f32.mrf.mxu3  ;;  %v2782_v18 = vpop.f32.mrf.mxu1  ;;  %v1015_v49 = vpack.c.bf16 %v983_v31, %v983_v31  ;;  %951 = vst [vmem:[#allocation3 + $0x138] sm:$0xf] %v919_v30 }
 0x1a1   : > { %v2956_v52 = vadd.f32 %v2955_v19, %v2867_v56  ;;  %v3744_v56 = vor.u32 %v4556_v0, %v3741_v17  ;;  %v4564_v19 = vld [vmem:[#allocation3 + $0xa4] sm:$0xf]  ;;  %v2783_v1 = vadd.f32 %v2782_v18, %v5222_v39  ;;  %v3775_v17 = vld [vmem:[#allocation3 + $0xa8] sm:$0xf]  ;;  %952 = vst [vmem:[#allocation3 + $0x15c] sm:$0xf] %v920_v40 }
 0x1a2   : > { %v3772_v41 = vor.u32 %v4564_v19, %v3769_v55  ;;  %1047 = vst [vmem:[#allocation3 + $0x13c] sm:$0xf] %v1015_v49  ;;  %v3783_v55 = vld [vmem:[#allocation3 + $0xb0] sm:$0xf]  ;;  %v889_v49 = vld [vmem:[#allocation2 + $0xa8] sm:$0xff] }
 0x1a3   : > { %3097 = vmatmul.bf16.gmra.mxu1 %v3736_v33  ;;  %v5363_v48 = vadd.f32 %v3044_v29, %v2956_v52  ;;  %v3748_v33 = vor.u32 %v4561_v10, %v3747_v6  ;;  %v4565_v10 = vld [vmem:[#allocation3 + $0xac] sm:$0xf] }
 0x1a4   : > { %v3046_v15 = vpop.f32.mrf.mxu0 }
 0x1a6   : > { %v2868_v7 = vpop.f32.mrf.mxu2 }
 0x1a7   : > { %v2869_v58 = vadd.f32 %v2868_v7, %v2780_v2  ;;  %v1079_v2 = vld [vmem:[#allocation2 + $0x92] sm:$0xff]  ;;  %v1080_v7 = vld [vmem:[#allocation2 + $0x9a] sm:$0xff] }
 0x1a8   : > { %v2957_v5 = vpop.f32.mrf.mxu3  ;;  %v2784_v29 = vpop.f32.mrf.mxu1  ;;  %v1111_v39 = vpack.c.bf16 %v1079_v2, %v1079_v2  ;;  %v985_v2 = vld [vmem:[#allocation2 + $0xa9] sm:$0xff] }
 0x1a9   : > { %v2958_v13 = vadd.f32 %v2957_v5, %v2869_v58  ;;  %v4569_v58 = vld [vmem:[#allocation3 + $0xc8] sm:$0xf0]  ;;  %v2785_v5 = vadd.f32 %v2784_v29, %v5230_v23 }
 0x1aa   : > { %1143 = vst [vmem:[#allocation3 + $0x140] sm:$0xf] %v1111_v39 }
 0x1ab   : > { %3186 = vmatmul.bf16.gmra.mxu2 %v3740_v9  ;;  %v5366_v50 = vadd.f32 %v3046_v15, %v2958_v13  ;;  %v984_v15 = vld [vmem:[#allocation2 + $0x99] sm:$0xff]  ;;  %v1112_v9 = vpack.c.bf16 %v1080_v7, %v1080_v7  ;;  %856 = vst [vmem:[#allocation3 + $0x17c] sm:$0xf] %v1111_v39  ;;  %v921_v39 = vpack.c.bf16 %v889_v49, %v889_v49  ;;  %v3841_v49 = vld [vmem:[#allocation3 + $0x154] sm:$0xf0] }
 0x1ac   : > { %v3049_v32 = vpop.f32.mrf.mxu0  ;;  %v1016_v21 = vpack.c.bf16 %v984_v15, %v984_v15  ;;  %v3777_v13 = vld [vmem:[#allocation3 + $0xcc] sm:$0xf0] }
 0x1ad   : > { %3275 = vmatmul.bf16.gmra.mxu3 %v3744_v56  ;;  %1144 = vst [vmem:[#allocation3 + $0x164] sm:$0xf] %v1112_v9 }
 0x1ae   : > { %v2871_v62 = vpop.f32.mrf.mxu2  ;;  %1048 = vst [vmem:[#allocation3 + $0x160] sm:$0xf] %v1016_v21  ;;  %v890_v21 = vld [vmem:[#allocation2 + $0xb0] sm:$0xff] }
 0x1af   : > { %3364 = vmatmul.bf16.gmra.mxu0 %v3748_v33  ;;  %v2872_v52 = vadd.f32 %v2871_v62, %v2783_v1  ;;  %v3776_v33 = vor.u32 %v4569_v58, %v3775_v17  ;;  %v4570_v1 = vld [vmem:[#allocation3 + $0xd0] sm:$0xf0]  ;;  %857 = vst [vmem:[#allocation3 + $0x1a0] sm:$0xf] %v1112_v9  ;;  %v922_v17 = vpack.c.bf16 %v890_v21, %v890_v21 }
 0x1b0   : > { %v2960_v42 = vpop.f32.mrf.mxu3  ;;  %v2787_v61 = vpop.f32.mrf.mxu1  ;;  %v1017_v58 = vpack.c.bf16 %v985_v2, %v985_v2  ;;  %953 = vst [vmem:[#allocation3 + $0x180] sm:$0xf] %v921_v39 }
 0x1b1   : > { %v2961_v11 = vadd.f32 %v2960_v42, %v2872_v52  ;;  %v3780_v52 = vor.u32 %v4565_v10, %v3777_v13  ;;  %v4573_v42 = vld [vmem:[#allocation3 + $0xec] sm:$0xf]  ;;  %v2788_v53 = vadd.f32 %v2787_v61, %v5241_v44  ;;  %v3811_v13 = vld [vmem:[#allocation3 + $0xf0] sm:$0xf]  ;;  %954 = vst [vmem:[#allocation3 + $0x1a4] sm:$0xf] %v922_v17 }
 0x1b2   : > { %v3808_v30 = vor.u32 %v4573_v42, %v3805_v46  ;;  %1049 = vst [vmem:[#allocation3 + $0x184] sm:$0xf] %v1017_v58  ;;  %v3819_v46 = vld [vmem:[#allocation3 + $0xf8] sm:$0xf]  ;;  %v891_v58 = vld [vmem:[#allocation2 + $0xc0] sm:$0xff] }
 0x1b3   : > { %3102 = vmatmul.bf16.gmra.mxu1 %v3772_v41  ;;  %v5369_v18 = vadd.f32 %v3049_v32, %v2961_v11  ;;  %v3784_v41 = vor.u32 %v4570_v1, %v3783_v55  ;;  %v4574_v1 = vld [vmem:[#allocation3 + $0xf4] sm:$0xf] }
 0x1b4   : > { %v3051_v0 = vpop.f32.mrf.mxu0 }
 0x1b6   : > { %v2873_v6 = vpop.f32.mrf.mxu2 }
 0x1b7   : > { %v2874_v56 = vadd.f32 %v2873_v6, %v2785_v5  ;;  %v1081_v5 = vld [vmem:[#allocation2 + $0xaa] sm:$0xff]  ;;  %v1082_v6 = vld [vmem:[#allocation2 + $0xb2] sm:$0xff] }
 0x1b8   : > { %v2962_v19 = vpop.f32.mrf.mxu3  ;;  %v2789_v32 = vpop.f32.mrf.mxu1  ;;  %v1113_v44 = vpack.c.bf16 %v1081_v5, %v1081_v5  ;;  %v987_v5 = vld [vmem:[#allocation2 + $0xc1] sm:$0xff] }
 0x1b9   : > { %v2963_v62 = vadd.f32 %v2962_v19, %v2874_v56  ;;  %v4578_v56 = vld [vmem:[#allocation3 + $0x110] sm:$0xf0]  ;;  %v2790_v19 = vadd.f32 %v2789_v32, %v5258_v3 }
 0x1ba   : > { %1145 = vst [vmem:[#allocation3 + $0x188] sm:$0xf] %v1113_v44 }
 0x1bb   : > { %3191 = vmatmul.bf16.gmra.mxu2 %v3776_v33  ;;  %v5372_v23 = vadd.f32 %v3051_v0, %v2963_v62  ;;  %v986_v0 = vld [vmem:[#allocation2 + $0xb1] sm:$0xff]  ;;  %v1114_v33 = vpack.c.bf16 %v1082_v6, %v1082_v6  ;;  %v3813_v62 = vld [vmem:[#allocation3 + $0x114] sm:$0xf0]  ;;  %858 = vst [vmem:[#allocation3 + $0x1c4] sm:$0xf] %v1113_v44  ;;  %v923_v44 = vpack.c.bf16 %v891_v58, %v891_v58 }
 0x1bc   : > { %v3054_v29 = vpop.f32.mrf.mxu0  ;;  %v1018_v9 = vpack.c.bf16 %v986_v0, %v986_v0  ;;  %v3877_v58 = vld [vmem:[#allocation3 + $0x19c] sm:$0xf0] }
 0x1bd   : > { %3280 = vmatmul.bf16.gmra.mxu3 %v3780_v52  ;;  %1146 = vst [vmem:[#allocation3 + $0x1ac] sm:$0xf] %v1114_v33 }
 0x1be   : > { %v2876_v31 = vpop.f32.mrf.mxu2  ;;  %1050 = vst [vmem:[#allocation3 + $0x1a8] sm:$0xf] %v1018_v9  ;;  %v892_v9 = vld [vmem:[#allocation2 + $0xc8] sm:$0xff] }
 0x1bf   : > { %3369 = vmatmul.bf16.gmra.mxu0 %v3784_v41  ;;  %v2877_v11 = vadd.f32 %v2876_v31, %v2788_v53  ;;  %v3812_v41 = vor.u32 %v4578_v56, %v3811_v13  ;;  %v4579_v53 = vld [vmem:[#allocation3 + $0x118] sm:$0xf0]  ;;  %859 = vst [vmem:[#allocation3 + $0x1e8] sm:$0xf] %v1114_v33  ;;  %v924_v13 = vpack.c.bf16 %v892_v9, %v892_v9 }
 0x1c0   : > { %v2965_v40 = vpop.f32.mrf.mxu3  ;;  %v2792_v15 = vpop.f32.mrf.mxu1  ;;  %v1019_v56 = vpack.c.bf16 %v987_v5, %v987_v5  ;;  %955 = vst [vmem:[#allocation3 + $0x1c8] sm:$0xf] %v923_v44 }
 0x1c1   : > { %v2966_v7 = vadd.f32 %v2965_v40, %v2877_v11  ;;  %v3816_v11 = vor.u32 %v4574_v1, %v3813_v62  ;;  %v4582_v40 = vld [vmem:[#allocation3 + $0x134] sm:$0xf]  ;;  %v2793_v21 = vadd.f32 %v2792_v15, %v5266_v24  ;;  %v3847_v62 = vld [vmem:[#allocation3 + $0x138] sm:$0xf]  ;;  %956 = vst [vmem:[#allocation3 + $0x1ec] sm:$0xf] %v924_v13 }
 0x1c2   : > { %v3844_v39 = vor.u32 %v4582_v40, %v3841_v49  ;;  %1051 = vst [vmem:[#allocation3 + $0x1cc] sm:$0xf] %v1019_v56  ;;  %v3855_v49 = vld [vmem:[#allocation3 + $0x140] sm:$0xf]  ;;  %v893_v56 = vld [vmem:[#allocation2 + $0xd8] sm:$0xff] }
 0x1c3   : > { %3107 = vmatmul.bf16.gmra.mxu1 %v3808_v30  ;;  %v5375_v61 = vadd.f32 %v3054_v29, %v2966_v7  ;;  %v3820_v30 = vor.u32 %v4579_v53, %v3819_v46  ;;  %v4583_v53 = vld [vmem:[#allocation3 + $0x13c] sm:$0xf] }
 0x1c4   : > { %v3056_v10 = vpop.f32.mrf.mxu0 }
 0x1c6   : > { %v2878_v55 = vpop.f32.mrf.mxu2 }
 0x1c7   : > { %v2879_v52 = vadd.f32 %v2878_v55, %v2790_v19  ;;  %v1083_v19 = vld [vmem:[#allocation2 + $0xc2] sm:$0xff]  ;;  %v1084_v55 = vld [vmem:[#allocation2 + $0xca] sm:$0xff] }
 0x1c8   : > { %v2967_v42 = vpop.f32.mrf.mxu3  ;;  %v2794_v29 = vpop.f32.mrf.mxu1  ;;  %v1115_v24 = vpack.c.bf16 %v1083_v19, %v1083_v19  ;;  %v989_v19 = vld [vmem:[#allocation2 + $0xd9] sm:$0xff] }
 0x1c9   : > { %v2968_v31 = vadd.f32 %v2967_v42, %v2879_v52  ;;  %v4587_v52 = vld [vmem:[#allocation3 + $0x158] sm:$0xf0]  ;;  %v2795_v42 = vadd.f32 %v2794_v29, %v5273_v54 }
 0x1ca   : > { %1147 = vst [vmem:[#allocation3 + $0x1d0] sm:$0xf] %v1115_v24 }
 0x1cb   : > { %3196 = vmatmul.bf16.gmra.mxu2 %v3812_v41  ;;  %v5378_v3 = vadd.f32 %v3056_v10, %v2968_v31  ;;  %v988_v10 = vld [vmem:[#allocation2 + $0xc9] sm:$0xff]  ;;  %v1116_v41 = vpack.c.bf16 %v1084_v55, %v1084_v55  ;;  %860 = vst [vmem:[#allocation3 + $0x20c] sm:$0xf] %v1115_v24  ;;  %v925_v24 = vpack.c.bf16 %v893_v56, %v893_v56  ;;  %v3913_v56 = vld [vmem:[#allocation3 + $0x1e4] sm:$0xf0] }
 0x1cc   : > { %v3059_v32 = vpop.f32.mrf.mxu0  ;;  %v1020_v33 = vpack.c.bf16 %v988_v10, %v988_v10  ;;  %v3849_v31 = vld [vmem:[#allocation3 + $0x15c] sm:$0xf0] }
 0x1cd   : > { %3285 = vmatmul.bf16.gmra.mxu3 %v3816_v11  ;;  %1148 = vst [vmem:[#allocation3 + $0x1f4] sm:$0xf] %v1116_v41 }
 0x1ce   : > { %v2881_v2 = vpop.f32.mrf.mxu2  ;;  %1052 = vst [vmem:[#allocation3 + $0x1f0] sm:$0xf] %v1020_v33  ;;  %v894_v33 = vld [vmem:[#allocation2 + $0xe0] sm:$0xff] }
 0x1cf   : > { %3374 = vmatmul.bf16.gmra.mxu0 %v3820_v30  ;;  %v2882_v7 = vadd.f32 %v2881_v2, %v2793_v21  ;;  %v3848_v30 = vor.u32 %v4587_v52, %v3847_v62  ;;  %v4588_v21 = vld [vmem:[#allocation3 + $0x160] sm:$0xf0]  ;;  %861 = vst [vmem:[#allocation3 + $0x230] sm:$0xf] %v1116_v41  ;;  %v926_v62 = vpack.c.bf16 %v894_v33, %v894_v33 }
 0x1d0   : > { %v2970_v17 = vpop.f32.mrf.mxu3  ;;  %v2797_v0 = vpop.f32.mrf.mxu1  ;;  %v1021_v52 = vpack.c.bf16 %v989_v19, %v989_v19  ;;  %957 = vst [vmem:[#allocation3 + $0x210] sm:$0xf] %v925_v24 }
 0x1d1   : > { %v2971_v6 = vadd.f32 %v2970_v17, %v2882_v7  ;;  %v3852_v7 = vor.u32 %v4583_v53, %v3849_v31  ;;  %v4591_v17 = vld [vmem:[#allocation3 + $0x17c] sm:$0xf]  ;;  %v2798_v9 = vadd.f32 %v2797_v0, %v5204_v36  ;;  %v3883_v31 = vld [vmem:[#allocation3 + $0x180] sm:$0xf]  ;;  %958 = vst [vmem:[#allocation3 + $0x234] sm:$0xf] %v926_v62 }
 0x1d2   : > { %v3880_v44 = vor.u32 %v4591_v17, %v3877_v58  ;;  %1053 = vst [vmem:[#allocation3 + $0x214] sm:$0xf] %v1021_v52  ;;  %v3891_v58 = vld [vmem:[#allocation3 + $0x188] sm:$0xf]  ;;  %v895_v52 = vld [vmem:[#allocation2 + $0xf0] sm:$0xff] }
 0x1d3   : > { %3112 = vmatmul.bf16.gmra.mxu1 %v3844_v39  ;;  %v5381_v15 = vadd.f32 %v3059_v32, %v2971_v6  ;;  %v3856_v39 = vor.u32 %v4588_v21, %v3855_v49  ;;  %v4592_v21 = vld [vmem:[#allocation3 + $0x184] sm:$0xf] }
 0x1d4   : > { %v3061_v1 = vpop.f32.mrf.mxu0 }
 0x1d6   : > { %v2883_v46 = vpop.f32.mrf.mxu2 }
 0x1d7   : > { %v2884_v11 = vadd.f32 %v2883_v46, %v2795_v42  ;;  %v1085_v42 = vld [vmem:[#allocation2 + $0xda] sm:$0xff]  ;;  %v1086_v46 = vld [vmem:[#allocation2 + $0xe2] sm:$0xff] }
 0x1d8   : > { %v2972_v40 = vpop.f32.mrf.mxu3  ;;  %v2799_v32 = vpop.f32.mrf.mxu1  ;;  %v1117_v36 = vpack.c.bf16 %v1085_v42, %v1085_v42  ;;  %v991_v42 = vld [vmem:[#allocation2 + $0xf1] sm:$0xff] }
 0x1d9   : > { %v2973_v2 = vadd.f32 %v2972_v40, %v2884_v11  ;;  %v4596_v11 = vld [vmem:[#allocation3 + $0x1a0] sm:$0xf0]  ;;  %v2800_v40 = vadd.f32 %v2799_v32, %v5218_v20 }
 0x1da   : > { %1149 = vst [vmem:[#allocation3 + $0x218] sm:$0xf] %v1117_v36 }
 0x1db   : > { %3201 = vmatmul.bf16.gmra.mxu2 %v3848_v30  ;;  %v5384_v54 = vadd.f32 %v3061_v1, %v2973_v2  ;;  %v990_v1 = vld [vmem:[#allocation2 + $0xe1] sm:$0xff]  ;;  %v1118_v30 = vpack.c.bf16 %v1086_v46, %v1086_v46  ;;  %v3885_v2 = vld [vmem:[#allocation3 + $0x1a4] sm:$0xf0]  ;;  %862 = vst [vmem:[#allocation3 + $0x254] sm:$0xf] %v1117_v36  ;;  %v927_v36 = vpack.c.bf16 %v895_v52, %v895_v52 }
 0x1dc   : > { %v3064_v29 = vpop.f32.mrf.mxu0  ;;  %v1022_v41 = vpack.c.bf16 %v990_v1, %v990_v1  ;;  %v3949_v52 = vld [vmem:[#allocation3 + $0x22c] sm:$0xf0] }
 0x1dd   : > { %3290 = vmatmul.bf16.gmra.mxu3 %v3852_v7  ;;  %1150 = vst [vmem:[#allocation3 + $0x23c] sm:$0xf] %v1118_v30 }
 0x1de   : > { %v2886_v5 = vpop.f32.mrf.mxu2  ;;  %1054 = vst [vmem:[#allocation3 + $0x238] sm:$0xf] %v1022_v41  ;;  %v896_v41 = vld [vmem:[#allocation2 + $0xf8] sm:$0xff] }
 0x1df   : > { %3379 = vmatmul.bf16.gmra.mxu0 %v3856_v39  ;;  %v2887_v6 = vadd.f32 %v2886_v5, %v2798_v9  ;;  %v3884_v39 = vor.u32 %v4596_v11, %v3883_v31  ;;  %v4597_v9 = vld [vmem:[#allocation3 + $0x1a8] sm:$0xf0]  ;;  %863 = vst [vmem:[#allocation3 + $0x278] sm:$0xf] %v1118_v30  ;;  %v928_v31 = vpack.c.bf16 %v896_v41, %v896_v41 }
 0x1e0   : > { %v2975_v13 = vpop.f32.mrf.mxu3  ;;  %v2802_v10 = vpop.f32.mrf.mxu1  ;;  %v1023_v11 = vpack.c.bf16 %v991_v42, %v991_v42  ;;  %959 = vst [vmem:[#allocation3 + $0x258] sm:$0xf] %v927_v36 }
 0x1e1   : > { %v2976_v55 = vadd.f32 %v2975_v13, %v2887_v6  ;;  %v3888_v6 = vor.u32 %v4592_v21, %v3885_v2  ;;  %v4600_v13 = vld [vmem:[#allocation3 + $0x1c4] sm:$0xf]  ;;  %v2803_v33 = vadd.f32 %v2802_v10, %v5226_v63  ;;  %v3919_v2 = vld [vmem:[#allocation3 + $0x1c8] sm:$0xf]  ;;  %960 = vst [vmem:[#allocation3 + $0x27c] sm:$0xf] %v928_v31 }
 0x1e2   : > { %v3916_v24 = vor.u32 %v4600_v13, %v3913_v56  ;;  %1055 = vst [vmem:[#allocation3 + $0x25c] sm:$0xf] %v1023_v11  ;;  %v3927_v56 = vld [vmem:[#allocation3 + $0x1d0] sm:$0xf]  ;;  %v897_v11 = vld [vmem:[#allocation2 + $0x108] sm:$0xff] }
 0x1e3   : > { %3117 = vmatmul.bf16.gmra.mxu1 %v3880_v44  ;;  %v5387_v0 = vadd.f32 %v3064_v29, %v2976_v55  ;;  %v3892_v44 = vor.u32 %v4597_v9, %v3891_v58  ;;  %v4601_v9 = vld [vmem:[#allocation3 + $0x1cc] sm:$0xf] }
 0x1e4   : > { %v3066_v53 = vpop.f32.mrf.mxu0 }
 0x1e6   : > { %v2888_v49 = vpop.f32.mrf.mxu2 }
 0x1e7   : > { %v2889_v7 = vadd.f32 %v2888_v49, %v2800_v40  ;;  %v1087_v40 = vld [vmem:[#allocation2 + $0xf2] sm:$0xff]  ;;  %v1088_v49 = vld [vmem:[#allocation2 + $0xfa] sm:$0xff] }
 0x1e8   : > { %v2977_v17 = vpop.f32.mrf.mxu3  ;;  %v2804_v29 = vpop.f32.mrf.mxu1  ;;  %v1119_v63 = vpack.c.bf16 %v1087_v40, %v1087_v40  ;;  %v993_v40 = vld [vmem:[#allocation2 + $0x109] sm:$0xff] }
 0x1e9   : > { %v2978_v5 = vadd.f32 %v2977_v17, %v2889_v7  ;;  %v4605_v7 = vld [vmem:[#allocation3 + $0x1e8] sm:$0xf0]  ;;  %v2805_v17 = vadd.f32 %v2804_v29, %v5234_v26 }
 0x1ea   : > { %1151 = vst [vmem:[#allocation3 + $0x260] sm:$0xf] %v1119_v63 }
 0x1eb   : > { %3206 = vmatmul.bf16.gmra.mxu2 %v3884_v39  ;;  %v5390_v20 = vadd.f32 %v3066_v53, %v2978_v5  ;;  %v992_v53 = vld [vmem:[#allocation2 + $0xf9] sm:$0xff]  ;;  %v1120_v39 = vpack.c.bf16 %v1088_v49, %v1088_v49  ;;  %864 = vst [vmem:[#allocation3 + $0x29c] sm:$0xf] %v1119_v63  ;;  %v929_v63 = vpack.c.bf16 %v897_v11, %v897_v11  ;;  %v3985_v11 = vld [vmem:[#allocation3 + $0x274] sm:$0xf0] }
 0x1ec   : > { %v3069_v32 = vpop.f32.mrf.mxu0  ;;  %v1024_v30 = vpack.c.bf16 %v992_v53, %v992_v53  ;;  %v3921_v5 = vld [vmem:[#allocation3 + $0x1ec] sm:$0xf0] }
 0x1ed   : > { %3295 = vmatmul.bf16.gmra.mxu3 %v3888_v6  ;;  %1152 = vst [vmem:[#allocation3 + $0x284] sm:$0xf] %v1120_v39 }
 0x1ee   : > { %v2891_v19 = vpop.f32.mrf.mxu2  ;;  %1056 = vst [vmem:[#allocation3 + $0x280] sm:$0xf] %v1024_v30  ;;  %v898_v30 = vld [vmem:[#allocation2 + $0x110] sm:$0xff] }
 0x1ef   : > { %3384 = vmatmul.bf16.gmra.mxu0 %v3892_v44  ;;  %v2892_v55 = vadd.f32 %v2891_v19, %v2803_v33  ;;  %v3920_v44 = vor.u32 %v4605_v7, %v3919_v2  ;;  %v4606_v33 = vld [vmem:[#allocation3 + $0x1f0] sm:$0xf0]  ;;  %865 = vst [vmem:[#allocation3 + $0x2c0] sm:$0xf] %v1120_v39  ;;  %v930_v2 = vpack.c.bf16 %v898_v30, %v898_v30 }
 0x1f0   : > { %v2980_v62 = vpop.f32.mrf.mxu3  ;;  %v2807_v1 = vpop.f32.mrf.mxu1  ;;  %v1025_v7 = vpack.c.bf16 %v993_v40, %v993_v40  ;;  %961 = vst [vmem:[#allocation3 + $0x2a0] sm:$0xf] %v929_v63 }
 0x1f1   : > { %v2981_v46 = vadd.f32 %v2980_v62, %v2892_v55  ;;  %v3924_v55 = vor.u32 %v4601_v9, %v3921_v5  ;;  %v4609_v62 = vld [vmem:[#allocation3 + $0x20c] sm:$0xf]  ;;  %v2808_v41 = vadd.f32 %v2807_v1, %v5246_v47  ;;  %v3955_v5 = vld [vmem:[#allocation3 + $0x210] sm:$0xf]  ;;  %962 = vst [vmem:[#allocation3 + $0x2c4] sm:$0xf] %v930_v2 }
 0x1f2   : > { %v3952_v36 = vor.u32 %v4609_v62, %v3949_v52  ;;  %1057 = vst [vmem:[#allocation3 + $0x2a4] sm:$0xf] %v1025_v7  ;;  %v3963_v52 = vld [vmem:[#allocation3 + $0x218] sm:$0xf]  ;;  %v899_v7 = vld [vmem:[#allocation2 + $0x120] sm:$0xff] }
 0x1f3   : > { %3122 = vmatmul.bf16.gmra.mxu1 %v3916_v24  ;;  %v5393_v10 = vadd.f32 %v3069_v32, %v2981_v46  ;;  %v3928_v24 = vor.u32 %v4606_v33, %v3927_v56  ;;  %v4610_v33 = vld [vmem:[#allocation3 + $0x214] sm:$0xf] }
 0x1f4   : > { %v3071_v21 = vpop.f32.mrf.mxu0 }
 0x1f6   : > { %v2893_v58 = vpop.f32.mrf.mxu2 }
 0x1f7   : > { %v2894_v6 = vadd.f32 %v2893_v58, %v2805_v17  ;;  %v1089_v17 = vld [vmem:[#allocation2 + $0x10a] sm:$0xff]  ;;  %v1090_v58 = vld [vmem:[#allocation2 + $0x112] sm:$0xff] }
 0x1f8   : > { %v2982_v13 = vpop.f32.mrf.mxu3  ;;  %v2809_v32 = vpop.f32.mrf.mxu1  ;;  %v1121_v47 = vpack.c.bf16 %v1089_v17, %v1089_v17  ;;  %v995_v17 = vld [vmem:[#allocation2 + $0x121] sm:$0xff] }
 0x1f9   : > { %v2983_v19 = vadd.f32 %v2982_v13, %v2894_v6  ;;  %v4614_v6 = vld [vmem:[#allocation3 + $0x230] sm:$0xf0]  ;;  %v2810_v13 = vadd.f32 %v2809_v32, %v5260_v8 }
 0x1fa   : > { %1153 = vst [vmem:[#allocation3 + $0x2a8] sm:$0xf] %v1121_v47 }
 0x1fb   : > { %3211 = vmatmul.bf16.gmra.mxu2 %v3920_v44  ;;  %v5396_v26 = vadd.f32 %v3071_v21, %v2983_v19  ;;  %v994_v21 = vld [vmem:[#allocation2 + $0x111] sm:$0xff]  ;;  %v1122_v44 = vpack.c.bf16 %v1090_v58, %v1090_v58  ;;  %v3957_v19 = vld [vmem:[#allocation3 + $0x234] sm:$0xf0]  ;;  %866 = vst [vmem:[#allocation3 + $0x2e4] sm:$0xf] %v1121_v47  ;;  %v931_v47 = vpack.c.bf16 %v899_v7, %v899_v7 }
 0x1fc   : > { %v3074_v29 = vpop.f32.mrf.mxu0  ;;  %v1026_v39 = vpack.c.bf16 %v994_v21, %v994_v21  ;;  %v4021_v7 = vld [vmem:[#allocation3 + $0x2bc] sm:$0xf0] }
 0x1fd   : > { %3300 = vmatmul.bf16.gmra.mxu3 %v3924_v55  ;;  %1154 = vst [vmem:[#allocation3 + $0x2cc] sm:$0xf] %v1122_v44 }
 0x1fe   : > { %v2896_v42 = vpop.f32.mrf.mxu2  ;;  %1058 = vst [vmem:[#allocation3 + $0x2c8] sm:$0xf] %v1026_v39  ;;  %v900_v39 = vld [vmem:[#allocation2 + $0x128] sm:$0xff] }
 0x1ff   : > { %3389 = vmatmul.bf16.gmra.mxu0 %v3928_v24  ;;  %v2897_v46 = vadd.f32 %v2896_v42, %v2808_v41  ;;  %v3956_v24 = vor.u32 %v4614_v6, %v3955_v5  ;;  %v4615_v41 = vld [vmem:[#allocation3 + $0x238] sm:$0xf0]  ;;  %867 = vst [vmem:[#allocation3 + $0x308] sm:$0xf] %v1122_v44  ;;  %v1027_v6 = vpack.c.bf16 %v995_v17, %v995_v17 }
 0x200   : > { %v2985_v31 = vpop.f32.mrf.mxu3  ;;  %v2812_v53 = vpop.f32.mrf.mxu1  ;;  %v996_v5 = vld [vmem:[#allocation2 + $0x129] sm:$0xff]  ;;  %963 = vst [vmem:[#allocation3 + $0x2e8] sm:$0xf] %v931_v47 }
 0x201   : > { %v2986_v49 = vadd.f32 %v2985_v31, %v2897_v46  ;;  %v3960_v46 = vor.u32 %v4610_v33, %v3957_v19  ;;  %v4618_v31 = vld [vmem:[#allocation3 + $0x254] sm:$0xf]  ;;  %v2813_v30 = vadd.f32 %v2812_v53, %v5268_v59  ;;  %v1028_v44 = vpack.c.bf16 %v996_v5, %v996_v5  ;;  %v3991_v19 = vld [vmem:[#allocation3 + $0x258] sm:$0xf]  ;;  %1059 = vst [vmem:[#allocation3 + $0x2ec] sm:$0xf] %v1027_v6 }
 0x202   : > { %v3988_v63 = vor.u32 %v4618_v31, %v3985_v11  ;;  %v3999_v11 = vld [vmem:[#allocation3 + $0x260] sm:$0xf]  ;;  %v901_v6 = vld [vmem:[#allocation2 + $0x138] sm:$0xff] }
 0x203   : > { %3127 = vmatmul.bf16.gmra.mxu1 %v3952_v36  ;;  %v5399_v1 = vadd.f32 %v3074_v29, %v2986_v49  ;;  %v3964_v36 = vor.u32 %v4615_v41, %v3963_v52  ;;  %v4619_v41 = vld [vmem:[#allocation3 + $0x25c] sm:$0xf]  ;;  %1060 = vst [vmem:[#allocation3 + $0x310] sm:$0xf] %v1028_v44  ;;  %v902_v44 = vld [vmem:[#allocation2 + $0x140] sm:$0xff] }
 0x204   : > { %v3076_v9 = vpop.f32.mrf.mxu0 }
 0x206   : > { %v2898_v56 = vpop.f32.mrf.mxu2 }
 0x207   : > { %v2899_v55 = vadd.f32 %v2898_v56, %v2810_v13  ;;  %v1091_v13 = vld [vmem:[#allocation2 + $0x122] sm:$0xff]  ;;  %v1092_v56 = vld [vmem:[#allocation2 + $0x12a] sm:$0xff] }
 0x208   : > { %v2987_v62 = vpop.f32.mrf.mxu3  ;;  %v2814_v29 = vpop.f32.mrf.mxu1  ;;  %v1123_v59 = vpack.c.bf16 %v1091_v13, %v1091_v13  ;;  %v997_v13 = vld [vmem:[#allocation2 + $0x139] sm:$0xff] }
 0x209   : > { %v2988_v42 = vadd.f32 %v2987_v62, %v2899_v55  ;;  %v4623_v55 = vld [vmem:[#allocation3 + $0x278] sm:$0xf0]  ;;  %v2815_v62 = vadd.f32 %v2814_v29, %v5275_v60 }
 0x20a   : > { %1155 = vst [vmem:[#allocation3 + $0x2f0] sm:$0xf] %v1123_v59 }
 0x20b   : > { %3216 = vmatmul.bf16.gmra.mxu2 %v3956_v24  ;;  %v5402_v8 = vadd.f32 %v3076_v9, %v2988_v42  ;;  %v932_v9 = vpack.c.bf16 %v900_v39, %v900_v39  ;;  %v1124_v24 = vpack.c.bf16 %v1092_v56, %v1092_v56  ;;  %v3993_v42 = vld [vmem:[#allocation3 + $0x27c] sm:$0xf0]  ;;  %868 = vst [vmem:[#allocation3 + $0x32c] sm:$0xf] %v1123_v59 }
 0x20c   : > { %v3079_v32 = vpop.f32.mrf.mxu0  ;;  %v933_v59 = vpack.c.bf16 %v901_v6, %v901_v6  ;;  %v4636_v6 = vld [vmem:[#allocation3 + $0x2e4] sm:$0xf] }
 0x20d   : > { %3305 = vmatmul.bf16.gmra.mxu3 %v3960_v46  ;;  %964 = vst [vmem:[#allocation3 + $0x30c] sm:$0xf] %v932_v9 }
 0x20e   : > { %v2901_v40 = vpop.f32.mrf.mxu2  ;;  %1156 = vst [vmem:[#allocation3 + $0x314] sm:$0xf] %v1124_v24 }
 0x20f   : > { %3394 = vmatmul.bf16.gmra.mxu0 %v3964_v36  ;;  %v2902_v49 = vadd.f32 %v2901_v40, %v2813_v30  ;;  %v3992_v36 = vor.u32 %v4623_v55, %v3991_v19  ;;  %869 = vst [vmem:[#allocation3 + $0x350] sm:$0xf] %v1124_v24  ;;  %v998_v19 = vld [vmem:[#allocation2 + $0x141] sm:$0xff] }
 0x210   : > { %v2990_v2 = vpop.f32.mrf.mxu3  ;;  %v3093_v21 = vpop.f32.mrf.mxu1  ;;  %v1094_v55 = vld [vmem:[#allocation2 + $0x142] sm:$0xff]  ;;  %965 = vst [vmem:[#allocation3 + $0x330] sm:$0xf] %v933_v59 }
 0x211   : > { %v2991_v58 = vadd.f32 %v2990_v2, %v2902_v49  ;;  %v3996_v49 = vor.u32 %v4619_v41, %v3993_v42  ;;  %v4627_v2 = vld [vmem:[#allocation3 + $0x29c] sm:$0xf]  ;;  %v3094_v39 = vadd.f32 %v3093_v21, %v5288_v22  ;;  %v1029_v22 = vpack.c.bf16 %v997_v13, %v997_v13  ;;  %v1093_v21 = vld [vmem:[#allocation2 + $0x13a] sm:$0xff]  ;;  %v4027_v41 = vld [vmem:[#allocation3 + $0x2a0] sm:$0xf] }
 0x212   : > { %v4024_v47 = vor.u32 %v4627_v2, %v4021_v7  ;;  %v4632_v42 = vld [vmem:[#allocation3 + $0x2c0] sm:$0xf0]  ;;  %v4035_v2 = vld [vmem:[#allocation3 + $0x2a8] sm:$0xf]  ;;  %v4633_v7 = vld [vmem:[#allocation3 + $0x2c8] sm:$0xf0] }
 0x213   : > { %3132 = vmatmul.bf16.gmra.mxu1 %v3988_v63  ;;  %v5406_v53 = vadd.f32 %v3079_v32, %v2991_v58  ;;  %v4624_v32 = vld [vmem:[#allocation3 + $0x280] sm:$0xf0]  ;;  %1061 = vst [vmem:[#allocation3 + $0x334] sm:$0xf] %v1029_v22 }
 0x214   : > { %v3081_v33 = vpop.f32.mrf.mxu0  ;;  %v4000_v63 = vor.u32 %v4624_v32, %v3999_v11  ;;  %v4628_v32 = vld [vmem:[#allocation3 + $0x2a4] sm:$0xf] }
 0x216   : > { %v2903_v52 = vpop.f32.mrf.mxu2 }
 0x217   : > { %v2904_v46 = vadd.f32 %v2903_v52, %v2815_v62  ;;  %v1030_v62 = vpack.c.bf16 %v998_v19, %v998_v19 }
 0x218   : > { %v2992_v31 = vpop.f32.mrf.mxu3  ;;  %v3095_v30 = vpop.f32.mrf.mxu1 }
 0x219   : > { %v2993_v40 = vadd.f32 %v2992_v31, %v2904_v46  ;;  %v1125_v46 = vpack.c.bf16 %v1093_v21, %v1093_v21  ;;  %v1126_v31 = vpack.c.bf16 %v1094_v55, %v1094_v55  ;;  %1062 = vst [vmem:[#allocation3 + $0x358] sm:$0xf] %v1030_v62 }
 0x21b   : > { %3221 = vmatmul.bf16.gmra.mxu2 %v3992_v36  ;;  %v5409_v60 = vadd.f32 %v3081_v33, %v2993_v40  ;;  %v934_v33 = vpack.c.bf16 %v902_v44, %v902_v44  ;;  %v3096_v36 = vadd.f32 %v3095_v30, %v5294_v27  ;;  %v4029_v40 = vld [vmem:[#allocation3 + $0x2c4] sm:$0xf0]  ;;  %1157 = vst [vmem:[#allocation3 + $0x338] sm:$0xf] %v1125_v46 }
 0x21c   : > { %v3360_v29 = vpop.f32.mrf.mxu0  ;;  %1158 = vst [vmem:[#allocation3 + $0x35c] sm:$0xf] %v1126_v31  ;;  %v4036_v27 = vor.u32 %v4633_v7, %v4035_v2  ;;  %v4057_v44 = vld [vmem:[#allocation3 + $0x304] sm:$0xf0] }
 0x21d   : > { %3310 = vmatmul.bf16.gmra.mxu3 %v3996_v49  ;;  %966 = vst [vmem:[#allocation3 + $0x354] sm:$0xf] %v934_v33  ;;  %v4060_v21 = vor.u32 %v4636_v6, %v4057_v44  ;;  %v4065_v6 = vld [vmem:[#allocation3 + $0x30c] sm:$0xf0] }
 0x21e   : > { %v3182_v17 = vpop.f32.mrf.mxu2  ;;  %870 = vst [vmem:[#allocation3 + $0x374] sm:$0xf] %v1125_v46  ;;  %v1000_v46 = vld [vmem:[#allocation2 + $0x159] sm:$0xff] }
 0x21f   : > { %3399 = vmatmul.bf16.gmra.mxu0 %v4000_v63  ;;  %v3183_v58 = vadd.f32 %v3182_v17, %v3094_v39  ;;  %v4028_v63 = vor.u32 %v4632_v42, %v4027_v41  ;;  %871 = vst [vmem:[#allocation3 + $0x398] sm:$0xf] %v1126_v31  ;;  %v904_v41 = vld [vmem:[#allocation2 + $0x158] sm:$0xff] }
 0x220   : > { %v3271_v9 = vpop.f32.mrf.mxu3  ;;  %v3098_v5 = vpop.f32.mrf.mxu1 }
 0x221   : > { %v3272_v56 = vadd.f32 %v3271_v9, %v3183_v58  ;;  %v4032_v58 = vor.u32 %v4628_v32, %v4029_v40  ;;  %v3099_v30 = vadd.f32 %v3098_v5, %v5297_v43  ;;  %v999_v5 = vld [vmem:[#allocation2 + $0x151] sm:$0xff]  ;;  %v1032_v40 = vpack.c.bf16 %v1000_v46, %v1000_v46 }
 0x222   : > { %v1031_v31 = vpack.c.bf16 %v999_v5, %v999_v5 }
 0x223   : > { %v3361_v24 = vadd.f32 %v3360_v29, %v3272_v56  ;;  %3137 = vmatmul.bf16.gmra.mxu1 %v4024_v47  ;;  %1064 = vst [vmem:[#allocation3 + $0x3a0] sm:$0xf] %v1032_v40  ;;  %v905_v40 = vld [vmem:[#allocation2 + $0x168] sm:$0xff] }
 0x224   : > { %v3362_v52 = vpop.f32.mrf.mxu0  ;;  %1063 = vst [vmem:[#allocation3 + $0x37c] sm:$0xf] %v1031_v31 }
 0x225   : > { %3440 = vst [vmem:[%s5415_s27] sm:$0xff] %v3361_v24  ;;  %v3510_v13 = vmul.f32 %v3361_v24, %v3361_v24 }
 0x226   : > { %v3184_v11 = vpop.f32.mrf.mxu2 }
 0x227   : > { %v3185_v49 = vadd.f32 %v3184_v11, %v3096_v36  ;;  %v936_v36 = vpack.c.bf16 %v904_v41, %v904_v41  ;;  %v1095_v11 = vld [vmem:[#allocation2 + $0x152] sm:$0xff]  ;;  %v4645_v41 = vld [vmem:[#allocation3 + $0x32c] sm:$0xf] }
 0x228   : > { %v3273_v29 = vpop.f32.mrf.mxu3  ;;  %v3100_v39 = vpop.f32.mrf.mxu1  ;;  %v1127_v2 = vpack.c.bf16 %v1095_v11, %v1095_v11 }
 0x229   : > { %v3274_v17 = vadd.f32 %v3273_v29, %v3185_v49  ;;  %v4641_v29 = vld [vmem:[#allocation3 + $0x308] sm:$0xf0]  ;;  %968 = vst [vmem:[#allocation3 + $0x39c] sm:$0xf] %v936_v36 }
 0x22a   : > { %1159 = vst [vmem:[#allocation3 + $0x380] sm:$0xf] %v1127_v2 }
 0x22b   : > { %v3363_v47 = vadd.f32 %v3362_v52, %v3274_v17  ;;  %3226 = vmatmul.bf16.gmra.mxu2 %v4028_v63  ;;  %v903_v52 = vld [vmem:[#allocation2 + $0x150] sm:$0xff]  ;;  %v4063_v63 = vld [vmem:[#allocation3 + $0x2e8] sm:$0xf]  ;;  %872 = vst [vmem:[#allocation3 + $0x3bc] sm:$0xf] %v1127_v2 }
 0x22c   : > { %v3365_v9 = vpop.f32.mrf.mxu0  ;;  %v935_v43 = vpack.c.bf16 %v903_v52, %v903_v52  ;;  %v1001_v2 = vld [vmem:[#allocation2 + $0x169] sm:$0xff] }
 0x22d   : > { %3441 = vst [vmem:[%s5415_s27 + $0x8] sm:$0xff] %v3363_v47  ;;  %v3472_v56 = vadd.f32 %v3363_v47, %v3361_v24  ;;  %v3511_v59 = vmul.f32 %v3363_v47, %v3363_v47  ;;  %3315 = vmatmul.bf16.gmra.mxu3 %v4032_v58  ;;  %v1096_v24 = vld [vmem:[#allocation2 + $0x15a] sm:$0xff]  ;;  %v3101_v58 = vadd.f32 %v3100_v39, %v5300_v45 }
 0x22e   : > { %v3187_v33 = vpop.f32.mrf.mxu2  ;;  %967 = vst [vmem:[#allocation3 + $0x378] sm:$0xf] %v935_v43  ;;  %v1128_v47 = vpack.c.bf16 %v1096_v24, %v1096_v24 }
 0x22f   : > { %v3542_v19 = vadd.f32 %v3511_v59, %v3510_v13  ;;  %3404 = vmatmul.bf16.gmra.mxu0 %v4036_v27  ;;  %v3188_v22 = vadd.f32 %v3187_v33, %v3099_v30  ;;  %v4637_v30 = vld [vmem:[#allocation3 + $0x2ec] sm:$0xf]  ;;  %v4064_v13 = vor.u32 %v4641_v29, %v4063_v63  ;;  %v4071_v33 = vld [vmem:[#allocation3 + $0x2f0] sm:$0xf]  ;;  %v937_v29 = vpack.c.bf16 %v905_v40, %v905_v40  ;;  %v4129_v40 = vld [vmem:[#allocation3 + $0x394] sm:$0xf0] }
 0x230   : > { %v3276_v55 = vpop.f32.mrf.mxu3  ;;  %v3103_v62 = vpop.f32.mrf.mxu1  ;;  %1160 = vst [vmem:[#allocation3 + $0x3a4] sm:$0xf] %v1128_v47 }
 0x231   : > { %v3277_v42 = vadd.f32 %v3276_v55, %v3188_v22  ;;  %v4642_v22 = vld [vmem:[#allocation3 + $0x310] sm:$0xf0]  ;;  %873 = vst [vmem:[#allocation3 + $0x3e0] sm:$0xf] %v1128_v47  ;;  %v3104_v5 = vadd.f32 %v3103_v62, %v5312_v37  ;;  %v1097_v47 = vld [vmem:[#allocation2 + $0x16a] sm:$0xff] }
 0x232   : > { %v4072_v45 = vor.u32 %v4642_v22, %v4071_v33  ;;  %969 = vst [vmem:[#allocation3 + $0x3c0] sm:$0xf] %v937_v29 }
 0x233   : > { %v3366_v32 = vadd.f32 %v3365_v9, %v3277_v42  ;;  %3142 = vmatmul.bf16.gmra.mxu1 %v4060_v21  ;;  %v4093_v42 = vld [vmem:[#allocation3 + $0x34c] sm:$0xf0] }
 0x234   : > { %v3367_v49 = vpop.f32.mrf.mxu0  ;;  %v4096_v11 = vor.u32 %v4645_v41, %v4093_v42 }
 0x235   : > { %3442 = vst [vmem:[%s5415_s27 + $0x10] sm:$0xff] %v3366_v32  ;;  %v3473_v7 = vadd.f32 %v3472_v56, %v3366_v32  ;;  %v3512_v17 = vmul.f32 %v3366_v32, %v3366_v32  ;;  %v4068_v56 = vor.u32 %v4637_v30, %v4065_v6  ;;  %v4099_v6 = vld [vmem:[#allocation3 + $0x330] sm:$0xf] }
 0x236   : > { %v3189_v27 = vpop.f32.mrf.mxu2 }
 0x237   : > { %v3543_v44 = vadd.f32 %v3542_v19, %v3512_v17  ;;  %v3190_v9 = vadd.f32 %v3189_v27, %v3101_v58  ;;  %v1002_v17 = vld [vmem:[#allocation2 + $0x171] sm:$0xff] }
 0x238   : > { %v3278_v59 = vpop.f32.mrf.mxu3  ;;  %v3105_v21 = vpop.f32.mrf.mxu1  ;;  %v1098_v27 = vld [vmem:[#allocation2 + $0x172] sm:$0xff]  ;;  %v1034_v62 = vpack.c.bf16 %v1002_v17, %v1002_v17 }
 0x239   : > { %v3279_v55 = vadd.f32 %v3278_v59, %v3190_v9  ;;  %v1129_v9 = vpack.c.bf16 %v1097_v47, %v1097_v47  ;;  %v3106_v33 = vadd.f32 %v3105_v21, %v5318_v51  ;;  %v1130_v22 = vpack.c.bf16 %v1098_v27, %v1098_v27  ;;  %v907_v27 = vld [vmem:[#allocation2 + $0x180] sm:$0xff] }
 0x23a   : > { %1066 = vst [vmem:[#allocation3 + $0x3e8] sm:$0xf] %v1034_v62 }
 0x23b   : > { %v3368_v52 = vadd.f32 %v3367_v49, %v3279_v55  ;;  %3231 = vmatmul.bf16.gmra.mxu2 %v4064_v13  ;;  %v906_v49 = vld [vmem:[#allocation2 + $0x170] sm:$0xff]  ;;  %1161 = vst [vmem:[#allocation3 + $0x3c8] sm:$0xf] %v1129_v9 }
 0x23c   : > { %v3370_v39 = vpop.f32.mrf.mxu0  ;;  %v938_v58 = vpack.c.bf16 %v906_v49, %v906_v49  ;;  %1162 = vst [vmem:[#allocation3 + $0x3ec] sm:$0xf] %v1130_v22 }
 0x23d   : > { %3443 = vst [vmem:[%s5415_s27 + $0x18] sm:$0xff] %v3368_v52  ;;  %v3474_v19 = vadd.f32 %v3473_v7, %v3368_v52  ;;  %v3513_v43 = vmul.f32 %v3368_v52, %v3368_v52  ;;  %3320 = vmatmul.bf16.gmra.mxu3 %v4068_v56  ;;  %v1033_v7 = vpack.c.bf16 %v1001_v2, %v1001_v2  ;;  %v4646_v56 = vld [vmem:[#allocation3 + $0x334] sm:$0xf]  ;;  %v4101_v52 = vld [vmem:[#allocation3 + $0x354] sm:$0xf0] }
 0x23e   : > { %v3192_v46 = vpop.f32.mrf.mxu2  ;;  %970 = vst [vmem:[#allocation3 + $0x3e4] sm:$0xf] %v938_v58 }
 0x23f   : > { %v3544_v36 = vadd.f32 %v3543_v44, %v3513_v43  ;;  %3409 = vmatmul.bf16.gmra.mxu0 %v4072_v45  ;;  %v3193_v31 = vadd.f32 %v3192_v46, %v3104_v5  ;;  %v4650_v44 = vld [vmem:[#allocation3 + $0x350] sm:$0xf0]  ;;  %1065 = vst [vmem:[#allocation3 + $0x3c4] sm:$0xf] %v1033_v7  ;;  %v4107_v43 = vld [vmem:[#allocation3 + $0x338] sm:$0xf] }
 0x240   : > { %v3281_v24 = vpop.f32.mrf.mxu3  ;;  %v3108_v32 = vpop.f32.mrf.mxu1  ;;  %v4100_v41 = vor.u32 %v4650_v44, %v4099_v6  ;;  %v4651_v5 = vld [vmem:[#allocation3 + $0x358] sm:$0xf0]  ;;  %874 = vst [vmem:[#allocation3 + $0x404] sm:$0xf] %v1129_v9  ;;  %v1003_v6 = vld [vmem:[#allocation2 + $0x181] sm:$0xff] }
 0x241   : > { %v3282_v63 = vadd.f32 %v3281_v24, %v3193_v31  ;;  %v4108_v51 = vor.u32 %v4651_v5, %v4107_v43  ;;  %v4654_v24 = vld [vmem:[#allocation3 + $0x374] sm:$0xf]  ;;  %875 = vst [vmem:[#allocation3 + $0x428] sm:$0xf] %v1130_v22  ;;  %v1004_v44 = vld [vmem:[#allocation2 + $0x189] sm:$0xff] }
 0x242   : > { %v4132_v58 = vor.u32 %v4654_v24, %v4129_v40  ;;  %v4655_v5 = vld [vmem:[#allocation3 + $0x37c] sm:$0xf]  ;;  %v4143_v24 = vld [vmem:[#allocation3 + $0x380] sm:$0xf]  ;;  %v4660_v40 = vld [vmem:[#allocation3 + $0x3a0] sm:$0xf0] }
 0x243   : > { %v3371_v37 = vadd.f32 %v3370_v39, %v3282_v63  ;;  %3147 = vmatmul.bf16.gmra.mxu1 %v4096_v11  ;;  %v3109_v63 = vadd.f32 %v3108_v32, %v5320_v35  ;;  %v1036_v32 = vpack.c.bf16 %v1004_v44, %v1004_v44 }
 0x244   : > { %v3372_v30 = vpop.f32.mrf.mxu0 }
 0x245   : > { %3444 = vst [vmem:[%s5415_s27 + $0x20] sm:$0xff] %v3371_v37  ;;  %v3475_v13 = vadd.f32 %v3474_v19, %v3371_v37  ;;  %v3514_v59 = vmul.f32 %v3371_v37, %v3371_v37  ;;  %v4104_v19 = vor.u32 %v4646_v56, %v4101_v52  ;;  %v908_v37 = vld [vmem:[#allocation2 + $0x188] sm:$0xff] }
 0x246   : > { %v3194_v55 = vpop.f32.mrf.mxu2  ;;  %v940_v9 = vpack.c.bf16 %v908_v37, %v908_v37  ;;  %v4659_v56 = vld [vmem:[#allocation3 + $0x398] sm:$0xf0]  ;;  %1068 = vst [vmem:[#allocation3 + $0x430] sm:$0xf] %v1036_v32 }
 0x247   : > { %v3545_v45 = vadd.f32 %v3544_v36, %v3514_v59  ;;  %v3195_v39 = vadd.f32 %v3194_v55, %v3106_v33  ;;  %v1099_v59 = vld [vmem:[#allocation2 + $0x182] sm:$0xff]  ;;  %v1100_v33 = vld [vmem:[#allocation2 + $0x18a] sm:$0xff] }
 0x248   : > { %v3283_v42 = vpop.f32.mrf.mxu3  ;;  %v3110_v46 = vpop.f32.mrf.mxu1  ;;  %v4135_v55 = vld [vmem:[#allocation3 + $0x378] sm:$0xf]  ;;  %972 = vst [vmem:[#allocation3 + $0x42c] sm:$0xf] %v940_v9  ;;  %v1131_v52 = vpack.c.bf16 %v1099_v59, %v1099_v59 }
 0x249   : > { %v3284_v31 = vadd.f32 %v3283_v42, %v3195_v39  ;;  %v1132_v42 = vpack.c.bf16 %v1100_v33, %v1100_v33  ;;  %v1006_v59 = vld [vmem:[#allocation2 + $0x1a1] sm:$0xff] }
 0x24a   : > { %1163 = vst [vmem:[#allocation3 + $0x410] sm:$0xf] %v1131_v52 }
 0x24b   : > { %v3373_v11 = vadd.f32 %v3372_v30, %v3284_v31  ;;  %3236 = vmatmul.bf16.gmra.mxu2 %v4100_v41  ;;  %v939_v30 = vpack.c.bf16 %v907_v27, %v907_v27  ;;  %v3111_v41 = vadd.f32 %v3110_v46, %v5324_v14  ;;  %v4137_v31 = vld [vmem:[#allocation3 + $0x39c] sm:$0xf0]  ;;  %1164 = vst [vmem:[#allocation3 + $0x434] sm:$0xf] %v1132_v42 }
 0x24c   : > { %v3375_v21 = vpop.f32.mrf.mxu0  ;;  %v4144_v14 = vor.u32 %v4660_v40, %v4143_v24  ;;  %876 = vst [vmem:[#allocation3 + $0x44c] sm:$0xf] %v1131_v52 }
 0x24d   : > { %3445 = vst [vmem:[%s5415_s27 + $0x28] sm:$0xff] %v3373_v11  ;;  %v3476_v36 = vadd.f32 %v3475_v13, %v3373_v11  ;;  %v3515_v49 = vmul.f32 %v3373_v11, %v3373_v11  ;;  %3325 = vmatmul.bf16.gmra.mxu3 %v4104_v19  ;;  %v1035_v13 = vpack.c.bf16 %v1003_v6, %v1003_v6 }
 0x24e   : > { %v3197_v29 = vpop.f32.mrf.mxu2  ;;  %971 = vst [vmem:[#allocation3 + $0x408] sm:$0xf] %v939_v30 }
 0x24f   : > { %v3546_v2 = vadd.f32 %v3545_v45, %v3515_v49  ;;  %3414 = vmatmul.bf16.gmra.mxu0 %v4108_v51  ;;  %v3198_v17 = vadd.f32 %v3197_v29, %v3109_v63  ;;  %1067 = vst [vmem:[#allocation3 + $0x40c] sm:$0xf] %v1035_v13  ;;  %v4136_v51 = vor.u32 %v4659_v56, %v4135_v55  ;;  %v1005_v13 = vld [vmem:[#allocation2 + $0x199] sm:$0xff]  ;;  %v1102_v56 = vld [vmem:[#allocation2 + $0x1a2] sm:$0xff] }
 0x250   : > { %v3286_v7 = vpop.f32.mrf.mxu3  ;;  %v3113_v47 = vpop.f32.mrf.mxu1  ;;  %877 = vst [vmem:[#allocation3 + $0x470] sm:$0xf] %v1132_v42  ;;  %v1101_v55 = vld [vmem:[#allocation2 + $0x19a] sm:$0xff] }
 0x251   : > { %v3287_v62 = vadd.f32 %v3286_v7, %v3198_v17  ;;  %v4663_v17 = vld [vmem:[#allocation3 + $0x3bc] sm:$0xf]  ;;  %v3114_v27 = vadd.f32 %v3113_v47, %v5336_v34  ;;  %v1038_v34 = vpack.c.bf16 %v1006_v59, %v1006_v59 }
 0x253   : > { %v3376_v35 = vadd.f32 %v3375_v21, %v3287_v62  ;;  %3152 = vmatmul.bf16.gmra.mxu1 %v4132_v58  ;;  %v4165_v58 = vld [vmem:[#allocation3 + $0x3dc] sm:$0xf0]  ;;  %1070 = vst [vmem:[#allocation3 + $0x478] sm:$0xf] %v1038_v34 }
 0x254   : > { %v3377_v22 = vpop.f32.mrf.mxu0  ;;  %v4168_v6 = vor.u32 %v4663_v17, %v4165_v58 }
 0x255   : > { %3446 = vst [vmem:[%s5415_s27 + $0x30] sm:$0xff] %v3376_v35  ;;  %v3477_v45 = vadd.f32 %v3476_v36, %v3376_v35  ;;  %v3516_v39 = vmul.f32 %v3376_v35, %v3376_v35  ;;  %v4140_v36 = vor.u32 %v4655_v5, %v4137_v31  ;;  %v4793_v35 = vld [vmem:[#allocation2] sm:$0xff]  ;;  %v1134_v31 = vpack.c.bf16 %v1102_v56, %v1102_v56  ;;  %v4677_v56 = vld [vmem:[#allocation3 + $0x428] sm:$0xf0] }
 0x256   : > { %v3199_v43 = vpop.f32.mrf.mxu2  ;;  %v941_v32 = vpack.c.bf16 %v4793_v35, %v4793_v35 }
 0x257   : > { %v3547_v19 = vadd.f32 %v3546_v2, %v3516_v39  ;;  %v3200_v11 = vadd.f32 %v3199_v43, %v3111_v41  ;;  %v4668_v39 = vld [vmem:[#allocation3 + $0x3e0] sm:$0xf0]  ;;  %v1133_v41 = vpack.c.bf16 %v1101_v55, %v1101_v55  ;;  %1166 = vst [vmem:[#allocation3 + $0x47c] sm:$0xf] %v1134_v31  ;;  %v4207_v55 = vld [vmem:[#allocation3 + $0x408] sm:$0xf] }
 0x258   : > { %v3288_v21 = vpop.f32.mrf.mxu3  ;;  %v3115_v49 = vpop.f32.mrf.mxu1  ;;  %973 = vst [vmem:[#allocation3 + $0x450] sm:$0xf] %v941_v32  ;;  %v4678_v31 = vld [vmem:[#allocation3 + $0x430] sm:$0xf0] }
 0x259   : > { %v3289_v63 = vadd.f32 %v3288_v21, %v3200_v11  ;;  %974 = vst [vmem:[#allocation3 + $0x474] sm:$0xf] %v941_v32  ;;  %v3116_v5 = vadd.f32 %v3115_v49, %v5342_v16  ;;  %v4664_v11 = vld [vmem:[#allocation3 + $0x3c4] sm:$0xf] }
 0x25a   : > { %1165 = vst [vmem:[#allocation3 + $0x458] sm:$0xf] %v1133_v41 }
 0x25b   : > { %v3378_v29 = vadd.f32 %v3377_v22, %v3289_v63  ;;  %3241 = vmatmul.bf16.gmra.mxu2 %v4136_v51  ;;  %v1037_v22 = vpack.c.bf16 %v1005_v13, %v1005_v13  ;;  %v4173_v51 = vld [vmem:[#allocation3 + $0x3e4] sm:$0xf0] }
 0x25c   : > { %v3380_v46 = vpop.f32.mrf.mxu0  ;;  %v4176_v17 = vor.u32 %v4664_v11, %v4173_v51 }
 0x25d   : > { %3447 = vst [vmem:[%s5415_s27 + $0x38] sm:$0xff] %v3378_v29  ;;  %v3478_v2 = vadd.f32 %v3477_v45, %v3378_v29  ;;  %v3517_v7 = vmul.f32 %v3378_v29, %v3378_v29  ;;  %3330 = vmatmul.bf16.gmra.mxu3 %v4140_v36  ;;  %v4171_v45 = vld [vmem:[#allocation3 + $0x3c0] sm:$0xf]  ;;  %v4179_v36 = vld [vmem:[#allocation3 + $0x3c8] sm:$0xf] }
 0x25e   : > { %v3202_v37 = vpop.f32.mrf.mxu2  ;;  %1069 = vst [vmem:[#allocation3 + $0x454] sm:$0xf] %v1037_v22  ;;  %v4172_v40 = vor.u32 %v4668_v39, %v4171_v45  ;;  %v4669_v29 = vld [vmem:[#allocation3 + $0x3e8] sm:$0xf0]  ;;  %v4209_v45 = vld [vmem:[#allocation3 + $0x42c] sm:$0xf0] }
 0x25f   : > { %v3548_v62 = vadd.f32 %v3547_v19, %v3517_v7  ;;  %3419 = vmatmul.bf16.gmra.mxu0 %v4144_v14  ;;  %v3203_v30 = vadd.f32 %v3202_v37, %v3114_v27  ;;  %v4180_v16 = vor.u32 %v4669_v29, %v4179_v36  ;;  %v4201_v7 = vld [vmem:[#allocation3 + $0x424] sm:$0xf0]  ;;  %v4237_v36 = vld [vmem:[#allocation3 + $0x46c] sm:$0xf0] }
 0x260   : > { %v3291_v44 = vpop.f32.mrf.mxu3  ;;  %v3118_v9 = vpop.f32.mrf.mxu1 }
 0x261   : > { %v3292_v33 = vadd.f32 %v3291_v44, %v3203_v30 }
 0x263   : > { %v3381_v52 = vadd.f32 %v3380_v46, %v3292_v33  ;;  %3157 = vmatmul.bf16.gmra.mxu1 %v4168_v6 }
 0x264   : > { %v3382_v47 = vpop.f32.mrf.mxu0 }
 0x265   : > { %3448 = vst [vmem:[%s5415_s27 + $0x40] sm:$0xff] %v3381_v52  ;;  %v3479_v42 = vadd.f32 %v3478_v2, %v3381_v52  ;;  %v3518_v43 = vmul.f32 %v3381_v52, %v3381_v52  ;;  %v4672_v2 = vld [vmem:[#allocation3 + $0x404] sm:$0xf] }
 0x266   : > { %v3204_v19 = vpop.f32.mrf.mxu2  ;;  %v4204_v13 = vor.u32 %v4672_v2, %v4201_v7 }
 0x267   : > { %v3549_v21 = vadd.f32 %v3548_v62, %v3518_v43  ;;  %v3205_v24 = vadd.f32 %v3204_v19, %v3116_v5  ;;  %v3119_v62 = vadd.f32 %v3118_v9, %v5345_v57  ;;  %v4673_v9 = vld [vmem:[#allocation3 + $0x40c] sm:$0xf]  ;;  %v4215_v5 = vld [vmem:[#allocation3 + $0x410] sm:$0xf] }
 0x268   : > { %v3293_v63 = vpop.f32.mrf.mxu3  ;;  %v3120_v14 = vpop.f32.mrf.mxu1  ;;  %v4212_v51 = vor.u32 %v4673_v9, %v4209_v45 }
 0x269   : > { %v3294_v46 = vadd.f32 %v3293_v63, %v3205_v24  ;;  %v4216_v24 = vor.u32 %v4678_v31, %v4215_v5  ;;  %v4681_v63 = vld [vmem:[#allocation3 + $0x44c] sm:$0xf] }
 0x26b   : > { %v3383_v58 = vadd.f32 %v3382_v47, %v3294_v46  ;;  %3246 = vmatmul.bf16.gmra.mxu2 %v4172_v40  ;;  %v3121_v47 = vadd.f32 %v3120_v14, %v5348_v28 }
 0x26c   : > { %v3385_v49 = vpop.f32.mrf.mxu0 }
 0x26d   : > { %3449 = vst [vmem:[%s5415_s27 + $0x48] sm:$0xff] %v3383_v58  ;;  %v3480_v27 = vadd.f32 %v3479_v42, %v3383_v58  ;;  %v3519_v37 = vmul.f32 %v3383_v58, %v3383_v58  ;;  %3335 = vmatmul.bf16.gmra.mxu3 %v4176_v17  ;;  %v4208_v42 = vor.u32 %v4677_v56, %v4207_v55  ;;  %v4251_v56 = vld [vmem:[#allocation3 + $0x458] sm:$0xf] }
 0x26e   : > { %v3207_v30 = vpop.f32.mrf.mxu2 }
 0x26f   : > { %v3550_v6 = vadd.f32 %v3549_v21, %v3519_v37  ;;  %3424 = vmatmul.bf16.gmra.mxu0 %v4180_v16  ;;  %v3208_v44 = vadd.f32 %v3207_v30, %v3119_v62  ;;  %v4240_v16 = vor.u32 %v4681_v63, %v4237_v36  ;;  %v4243_v62 = vld [vmem:[#allocation3 + $0x450] sm:$0xf]  ;;  %v4686_v30 = vld [vmem:[#allocation3 + $0x470] sm:$0xf0] }
 0x270   : > { %v3296_v59 = vpop.f32.mrf.mxu3  ;;  %v3123_v33 = vpop.f32.mrf.mxu1 }
 0x271   : > { %v3297_v35 = vadd.f32 %v3296_v59, %v3208_v44  ;;  %v3124_v14 = vadd.f32 %v3123_v33, %v5351_v4  ;;  %v4682_v59 = vld [vmem:[#allocation3 + $0x454] sm:$0xf]  ;;  %v4245_v33 = vld [vmem:[#allocation3 + $0x474] sm:$0xf0] }
 0x273   : > { %v3386_v32 = vadd.f32 %v3385_v49, %v3297_v35  ;;  %3162 = vmatmul.bf16.gmra.mxu1 %v4204_v13 }
 0x274   : > { %v3387_v22 = vpop.f32.mrf.mxu0 }
 0x275   : > { %3450 = vst [vmem:[%s5415_s27 + $0x50] sm:$0xff] %v3386_v32  ;;  %v3481_v52 = vadd.f32 %v3480_v27, %v3386_v32  ;;  %v3520_v34 = vmul.f32 %v3386_v32, %v3386_v32 }
 0x276   : > { %v3209_v57 = vpop.f32.mrf.mxu2 }
 0x277   : > { %v3551_v39 = vadd.f32 %v3550_v6, %v3520_v34  ;;  %v3210_v41 = vadd.f32 %v3209_v57, %v3121_v47  ;;  %v4248_v57 = vor.u32 %v4682_v59, %v4245_v33 }
 0x278   : > { %v3298_v43 = vpop.f32.mrf.mxu3  ;;  %v3125_v19 = vpop.f32.mrf.mxu1 }
 0x279   : > { %v3299_v11 = vadd.f32 %v3298_v43, %v3210_v41  ;;  %v3126_v13 = vadd.f32 %v3125_v19, %v5354_v25 }
 0x27b   : > { %v3388_v21 = vadd.f32 %v3387_v22, %v3299_v11  ;;  %3251 = vmatmul.bf16.gmra.mxu2 %v4208_v42  ;;  %v4244_v22 = vor.u32 %v4686_v30, %v4243_v62 }
 0x27c   : > { %v3390_v40 = vpop.f32.mrf.mxu0 }
 0x27d   : > { %3451 = vst [vmem:[%s5415_s27 + $0x58] sm:$0xff] %v3388_v21  ;;  %v3482_v28 = vadd.f32 %v3481_v52, %v3388_v21  ;;  %v3521_v29 = vmul.f32 %v3388_v21, %v3388_v21  ;;  %3340 = vmatmul.bf16.gmra.mxu3 %v4212_v51  ;;  %v4687_v52 = vld [vmem:[#allocation3 + $0x478] sm:$0xf0] }
 0x27e   : > { %v3212_v46 = vpop.f32.mrf.mxu2  ;;  %v4252_v45 = vor.u32 %v4687_v52, %v4251_v56 }
 0x27f   : > { %v3552_v17 = vadd.f32 %v3551_v39, %v3521_v29  ;;  %3429 = vmatmul.bf16.gmra.mxu0 %v4216_v24  ;;  %v3213_v58 = vadd.f32 %v3212_v46, %v3124_v14 }
 0x280   : > { %v3301_v49 = vpop.f32.mrf.mxu3  ;;  %v3128_v2 = vpop.f32.mrf.mxu1 }
 0x281   : > { %v3302_v7 = vadd.f32 %v3301_v49, %v3213_v58  ;;  %v3129_v42 = vadd.f32 %v3128_v2, %v5357_v38 }
 0x283   : > { %v3391_v27 = vadd.f32 %v3390_v40, %v3302_v7  ;;  %3167 = vmatmul.bf16.gmra.mxu1 %v4240_v16 }
 0x284   : > { %v3392_v37 = vpop.f32.mrf.mxu0 }
 0x285   : > { %3452 = vst [vmem:[%s5415_s27 + $0x60] sm:$0xff] %v3391_v27  ;;  %v3483_v6 = vadd.f32 %v3482_v28, %v3391_v27  ;;  %v3522_v44 = vmul.f32 %v3391_v27, %v3391_v27 }
 0x286   : > { %v3214_v4 = vpop.f32.mrf.mxu2 }
 0x287   : > { %v3553_v35 = vadd.f32 %v3552_v17, %v3522_v44  ;;  %v3215_v32 = vadd.f32 %v3214_v4, %v3126_v13 }
 0x288   : > { %v3303_v55 = vpop.f32.mrf.mxu3  ;;  %v3130_v34 = vpop.f32.mrf.mxu1 }
 0x289   : > { %v3304_v47 = vadd.f32 %v3303_v55, %v3215_v32  ;;  %v3131_v36 = vadd.f32 %v3130_v34, %v5360_v12 }
 0x28b   : > { %v3393_v9 = vadd.f32 %v3392_v37, %v3304_v47  ;;  %3256 = vmatmul.bf16.gmra.mxu2 %v4244_v22 }
 0x28c   : > { %v3395_v39 = vpop.f32.mrf.mxu0 }
 0x28d   : > { %3453 = vst [vmem:[%s5415_s27 + $0x68] sm:$0xff] %v3393_v9  ;;  %v3484_v25 = vadd.f32 %v3483_v6, %v3393_v9  ;;  %v3523_v41 = vmul.f32 %v3393_v9, %v3393_v9  ;;  %3345 = vmatmul.bf16.gmra.mxu3 %v4248_v57 }
 0x28e   : > { %v3217_v43 = vpop.f32.mrf.mxu2 }
 0x28f   : > { %v3554_v5 = vadd.f32 %v3553_v35, %v3523_v41  ;;  %3434 = vmatmul.bf16.gmra.mxu0 %v4252_v45  ;;  %v3218_v31 = vadd.f32 %v3217_v43, %v3129_v42 }
 0x290   : > { %v3306_v19 = vpop.f32.mrf.mxu3  ;;  %v3133_v11 = vpop.f32.mrf.mxu1 }
 0x291   : > { %v3307_v51 = vadd.f32 %v3306_v19, %v3218_v31  ;;  %v3134_v7 = vadd.f32 %v3133_v11, %v5363_v48 }
 0x293   : > { %v3396_v21 = vadd.f32 %v3395_v39, %v3307_v51 }
 0x294   : > { %v3397_v24 = vpop.f32.mrf.mxu0 }
 0x295   : > { %3454 = vst [vmem:[%s5415_s27 + $0x70] sm:$0xff] %v3396_v21  ;;  %v3485_v40 = vadd.f32 %v3484_v25, %v3396_v21  ;;  %v3524_v63 = vmul.f32 %v3396_v21, %v3396_v21 }
 0x296   : > { %v3219_v28 = vpop.f32.mrf.mxu2 }
 0x297   : > { %v3555_v29 = vadd.f32 %v3554_v5, %v3524_v63  ;;  %v3220_v14 = vadd.f32 %v3219_v28, %v3131_v36 }
 0x298   : > { %v3308_v38 = vpop.f32.mrf.mxu3  ;;  %v3135_v46 = vpop.f32.mrf.mxu1 }
 0x299   : > { %v3309_v17 = vadd.f32 %v3308_v38, %v3220_v14  ;;  %v3136_v33 = vadd.f32 %v3135_v46, %v5366_v50 }
 0x29b   : > { %v3398_v58 = vadd.f32 %v3397_v24, %v3309_v17 }
 0x29c   : > { %v3400_v16 = vpop.f32.mrf.mxu0 }
 0x29d   : > { %3455 = vst [vmem:[%s5415_s27 + $0x78] sm:$0xff] %v3398_v58  ;;  %v3486_v49 = vadd.f32 %v3485_v40, %v3398_v58  ;;  %v3525_v2 = vmul.f32 %v3398_v58, %v3398_v58 }
 0x29e   : > { %v3222_v27 = vpop.f32.mrf.mxu2 }
 0x29f   : > { %v3556_v37 = vadd.f32 %v3555_v29, %v3525_v2  ;;  %v3223_v62 = vadd.f32 %v3222_v27, %v3134_v7 }
 0x2a0   : > { %v3311_v30 = vpop.f32.mrf.mxu3  ;;  %v3138_v6 = vpop.f32.mrf.mxu1 }
 0x2a1   : > { %v3312_v12 = vadd.f32 %v3311_v30, %v3223_v62  ;;  %v3139_v9 = vadd.f32 %v3138_v6, %v5369_v18 }
 0x2a3   : > { %v3401_v44 = vadd.f32 %v3400_v16, %v3312_v12 }
 0x2a4   : > { %v3402_v13 = vpop.f32.mrf.mxu0 }
 0x2a5   : > { %3456 = vst [vmem:[%s5415_s27 + $0x80] sm:$0xff] %v3401_v44  ;;  %v3487_v4 = vadd.f32 %v3486_v49, %v3401_v44  ;;  %v3526_v59 = vmul.f32 %v3401_v44, %v3401_v44 }
 0x2a6   : > { %v3224_v35 = vpop.f32.mrf.mxu2 }
 0x2a7   : > { %v3557_v32 = vadd.f32 %v3556_v37, %v3526_v59  ;;  %v3225_v22 = vadd.f32 %v3224_v35, %v3136_v33 }
 0x2a8   : > { %v3313_v55 = vpop.f32.mrf.mxu3  ;;  %v3140_v56 = vpop.f32.mrf.mxu1 }
 0x2a9   : > { %v3314_v48 = vadd.f32 %v3313_v55, %v3225_v22  ;;  %v3141_v11 = vadd.f32 %v3140_v56, %v5372_v23 }
 0x2ab   : > { %v3403_v52 = vadd.f32 %v3402_v13, %v3314_v48 }
 0x2ac   : > { %v3405_v34 = vpop.f32.mrf.mxu0 }
 0x2ad   : > { %3457 = vst [vmem:[%s5415_s27 + $0x88] sm:$0xff] %v3403_v52  ;;  %v3488_v47 = vadd.f32 %v3487_v4, %v3403_v52  ;;  %v3527_v57 = vmul.f32 %v3403_v52, %v3403_v52 }
 0x2ae   : > { %v3227_v45 = vpop.f32.mrf.mxu2 }
 0x2af   : > { %v3558_v39 = vadd.f32 %v3557_v32, %v3527_v57  ;;  %v3228_v25 = vadd.f32 %v3227_v45, %v3139_v9 }
 0x2b0   : > { %v3316_v41 = vpop.f32.mrf.mxu3  ;;  %v3143_v42 = vpop.f32.mrf.mxu1 }
 0x2b1   : > { %v3317_v50 = vadd.f32 %v3316_v41, %v3228_v25  ;;  %v3144_v38 = vadd.f32 %v3143_v42, %v5375_v61 }
 0x2b3   : > { %v3406_v43 = vadd.f32 %v3405_v34, %v3317_v50 }
 0x2b4   : > { %v3407_v5 = vpop.f32.mrf.mxu0 }
 0x2b5   : > { %3458 = vst [vmem:[%s5415_s27 + $0x90] sm:$0xff] %v3406_v43  ;;  %v3489_v31 = vadd.f32 %v3488_v47, %v3406_v43  ;;  %v3528_v19 = vmul.f32 %v3406_v43, %v3406_v43 }
 0x2b6   : > { %v3229_v51 = vpop.f32.mrf.mxu2 }
 0x2b7   : > { %v3559_v21 = vadd.f32 %v3558_v39, %v3528_v19  ;;  %v3230_v24 = vadd.f32 %v3229_v51, %v3141_v11 }
 0x2b8   : > { %v3318_v40 = vpop.f32.mrf.mxu3  ;;  %v3145_v63 = vpop.f32.mrf.mxu1 }
 0x2b9   : > { %v3319_v18 = vadd.f32 %v3318_v40, %v3230_v24  ;;  %v3146_v62 = vadd.f32 %v3145_v63, %v5378_v3 }
 0x2bb   : > { %v3408_v36 = vadd.f32 %v3407_v5, %v3319_v18 }
 0x2bc   : > { %v3410_v28 = vpop.f32.mrf.mxu0 }
 0x2bd   : > { %3459 = vst [vmem:[%s5415_s27 + $0x98] sm:$0xff] %v3408_v36  ;;  %v3490_v29 = vadd.f32 %v3489_v31, %v3408_v36  ;;  %v3529_v14 = vmul.f32 %v3408_v36, %v3408_v36 }
 0x2be   : > { %v3232_v46 = vpop.f32.mrf.mxu2 }
 0x2bf   : > { %v3560_v17 = vadd.f32 %v3559_v21, %v3529_v14  ;;  %v3233_v58 = vadd.f32 %v3232_v46, %v3144_v38 }
 0x2c0   : > { %v3321_v16 = vpop.f32.mrf.mxu3  ;;  %v3148_v49 = vpop.f32.mrf.mxu1 }
 0x2c1   : > { %v3322_v23 = vadd.f32 %v3321_v16, %v3233_v58  ;;  %v3149_v32 = vadd.f32 %v3148_v49, %v5381_v15 }
 0x2c3   : > { %v3411_v2 = vadd.f32 %v3410_v28, %v3322_v23 }
 0x2c4   : > { %v3412_v7 = vpop.f32.mrf.mxu0 }
 0x2c5   : > { %3460 = vst [vmem:[%s5415_s27 + $0xa0] sm:$0xff] %v3411_v2  ;;  %v3491_v27 = vadd.f32 %v3490_v29, %v3411_v2  ;;  %v3530_v37 = vmul.f32 %v3411_v2, %v3411_v2 }
 0x2c6   : > { %v3234_v30 = vpop.f32.mrf.mxu2 }
 0x2c7   : > { %v3561_v6 = vadd.f32 %v3560_v17, %v3530_v37  ;;  %v3235_v12 = vadd.f32 %v3234_v30, %v3146_v62 }
 0x2c8   : > { %v3323_v44 = vpop.f32.mrf.mxu3  ;;  %v3150_v13 = vpop.f32.mrf.mxu1 }
 0x2c9   : > { %v3324_v61 = vadd.f32 %v3323_v44, %v3235_v12  ;;  %v3151_v45 = vadd.f32 %v3150_v13, %v5384_v54 }
 0x2cb   : > { %v3413_v4 = vadd.f32 %v3412_v7, %v3324_v61 }
 0x2cc   : > { %v3415_v59 = vpop.f32.mrf.mxu0 }
 0x2cd   : > { %3461 = vst [vmem:[%s5415_s27 + $0xa8] sm:$0xff] %v3413_v4  ;;  %v3492_v33 = vadd.f32 %v3491_v27, %v3413_v4  ;;  %v3531_v35 = vmul.f32 %v3413_v4, %v3413_v4 }
 0x2ce   : > { %v3237_v22 = vpop.f32.mrf.mxu2 }
 0x2cf   : > { %v3562_v55 = vadd.f32 %v3561_v6, %v3531_v35  ;;  %v3238_v56 = vadd.f32 %v3237_v22, %v3149_v32 }
 0x2d0   : > { %v3326_v48 = vpop.f32.mrf.mxu3  ;;  %v3153_v52 = vpop.f32.mrf.mxu1 }
 0x2d1   : > { %v3327_v3 = vadd.f32 %v3326_v48, %v3238_v56  ;;  %v3154_v11 = vadd.f32 %v3153_v52, %v5387_v0 }
 0x2d3   : > { %v3416_v34 = vadd.f32 %v3415_v59, %v3327_v3 }
 0x2d4   : > { %v3417_v47 = vpop.f32.mrf.mxu0 }
 0x2d5   : > { %3462 = vst [vmem:[%s5415_s27 + $0xb0] sm:$0xff] %v3416_v34  ;;  %v3493_v57 = vadd.f32 %v3492_v33, %v3416_v34  ;;  %v3532_v9 = vmul.f32 %v3416_v34, %v3416_v34 }
 0x2d6   : > { %v3239_v39 = vpop.f32.mrf.mxu2 }
 0x2d7   : > { %v3563_v25 = vadd.f32 %v3562_v55, %v3532_v9  ;;  %v3240_v41 = vadd.f32 %v3239_v39, %v3151_v45 }
 0x2d8   : > { %v3328_v42 = vpop.f32.mrf.mxu3  ;;  %v3155_v50 = vpop.f32.mrf.mxu1 }
 0x2d9   : > { %v3329_v15 = vadd.f32 %v3328_v42, %v3240_v41  ;;  %v3156_v14 = vadd.f32 %v3155_v50, %v5390_v20 }
 0x2db   : > { %v3418_v43 = vadd.f32 %v3417_v47, %v3329_v15 }
 0x2dc   : > { %v3420_v5 = vpop.f32.mrf.mxu0 }
 0x2dd   : > { %3463 = vst [vmem:[%s5415_s27 + $0xb8] sm:$0xff] %v3418_v43  ;;  %v3494_v31 = vadd.f32 %v3493_v57, %v3418_v43  ;;  %v3533_v19 = vmul.f32 %v3418_v43, %v3418_v43 }
 0x2de   : > { %v3242_v51 = vpop.f32.mrf.mxu2 }
 0x2df   : > { %v3564_v21 = vadd.f32 %v3563_v25, %v3533_v19  ;;  %v3243_v24 = vadd.f32 %v3242_v51, %v3154_v11 }
 0x2e0   : > { %v3331_v40 = vpop.f32.mrf.mxu3  ;;  %v3158_v63 = vpop.f32.mrf.mxu1 }
 0x2e1   : > { %v3332_v54 = vadd.f32 %v3331_v40, %v3243_v24  ;;  %v3159_v27 = vadd.f32 %v3158_v63, %v5393_v10 }
 0x2e3   : > { %v3421_v18 = vadd.f32 %v3420_v5, %v3332_v54 }
 0x2e4   : > { %v3422_v36 = vpop.f32.mrf.mxu0 }
 0x2e5   : > { %3464 = vst [vmem:[%s5415_s27 + $0xc0] sm:$0xff] %v3421_v18  ;;  %v3495_v28 = vadd.f32 %v3494_v31, %v3421_v18  ;;  %v3534_v29 = vmul.f32 %v3421_v18, %v3421_v18 }
 0x2e6   : > { %v3244_v38 = vpop.f32.mrf.mxu2 }
 0x2e7   : > { %v3565_v46 = vadd.f32 %v3564_v21, %v3534_v29  ;;  %v3245_v17 = vadd.f32 %v3244_v38, %v3156_v14 }
 0x2e8   : > { %v3333_v58 = vpop.f32.mrf.mxu3  ;;  %v3160_v0 = vpop.f32.mrf.mxu1 }
 0x2e9   : > { %v3334_v16 = vadd.f32 %v3333_v58, %v3245_v17  ;;  %v3161_v59 = vadd.f32 %v3160_v0, %v5396_v26 }
 0x2eb   : > { %v3423_v49 = vadd.f32 %v3422_v36, %v3334_v16 }
 0x2ec   : > { %v3425_v23 = vpop.f32.mrf.mxu0 }
 0x2ed   : > { %3465 = vst [vmem:[%s5415_s27 + $0xc8] sm:$0xff] %v3423_v49  ;;  %v3496_v2 = vadd.f32 %v3495_v28, %v3423_v49  ;;  %v3535_v7 = vmul.f32 %v3423_v49, %v3423_v49 }
 0x2ee   : > { %v3247_v37 = vpop.f32.mrf.mxu2 }
 0x2ef   : > { %v3566_v62 = vadd.f32 %v3565_v46, %v3535_v7  ;;  %v3248_v30 = vadd.f32 %v3247_v37, %v3159_v27 }
 0x2f0   : > { %v3336_v6 = vpop.f32.mrf.mxu3  ;;  %v3163_v13 = vpop.f32.mrf.mxu1 }
 0x2f1   : > { %v3337_v20 = vadd.f32 %v3336_v6, %v3248_v30  ;;  %v3164_v3 = vadd.f32 %v3163_v13, %v5399_v1 }
 0x2f3   : > { %v3426_v12 = vadd.f32 %v3425_v23, %v3337_v20 }
 0x2f4   : > { %v3427_v44 = vpop.f32.mrf.mxu0 }
 0x2f5   : > { %3466 = vst [vmem:[%s5415_s27 + $0xd0] sm:$0xff] %v3426_v12  ;;  %v3497_v61 = vadd.f32 %v3496_v2, %v3426_v12  ;;  %v3536_v4 = vmul.f32 %v3426_v12, %v3426_v12 }
 0x2f6   : > { %v3249_v33 = vpop.f32.mrf.mxu2 }
 0x2f7   : > { %v3567_v35 = vadd.f32 %v3566_v62, %v3536_v4  ;;  %v3250_v32 = vadd.f32 %v3249_v33, %v3161_v59 }
 0x2f8   : > { %v3338_v22 = vpop.f32.mrf.mxu3  ;;  %v3165_v47 = vpop.f32.mrf.mxu1 }
 0x2f9   : > { %v3339_v10 = vadd.f32 %v3338_v22, %v3250_v32  ;;  %v3166_v42 = vadd.f32 %v3165_v47, %v5402_v8 }
 0x2fb   : > { %v3428_v55 = vadd.f32 %v3427_v44, %v3339_v10 }
 0x2fc   : > { %v3430_v56 = vpop.f32.mrf.mxu0 }
 0x2fd   : > { %3467 = vst [vmem:[%s5415_s27 + $0xd8] sm:$0xff] %v3428_v55  ;;  %v3498_v48 = vadd.f32 %v3497_v61, %v3428_v55  ;;  %v3537_v52 = vmul.f32 %v3428_v55, %v3428_v55 }
 0x2fe   : > { %v3252_v34 = vpop.f32.mrf.mxu2 }
 0x2ff   : > { %v3568_v57 = vadd.f32 %v3567_v35, %v3537_v52  ;;  %v3253_v9 = vadd.f32 %v3252_v34, %v3164_v3 }
 0x300   : > { %v3341_v45 = vpop.f32.mrf.mxu3  ;;  %v3168_v1 = vpop.f32.mrf.mxu1 }
 0x301   : > { %v3342_v26 = vadd.f32 %v3341_v45, %v3253_v9  ;;  %v3169_v24 = vadd.f32 %v3168_v1, %v5406_v53 }
 0x303   : > { %v3431_v39 = vadd.f32 %v3430_v56, %v3342_v26 }
 0x304   : > { %v3432_v50 = vpop.f32.mrf.mxu0 }
 0x305   : > { %3468 = vst [vmem:[%s5415_s27 + $0xe0] sm:$0xff] %v3431_v39  ;;  %v3499_v25 = vadd.f32 %v3498_v48, %v3431_v39  ;;  %v3538_v41 = vmul.f32 %v3431_v39, %v3431_v39 }
 0x306   : > { %v3254_v15 = vpop.f32.mrf.mxu2 }
 0x307   : > { %v3569_v43 = vadd.f32 %v3568_v57, %v3538_v41  ;;  %v3255_v5 = vadd.f32 %v3254_v15, %v3166_v42 }
 0x308   : > { %v3343_v31 = vpop.f32.mrf.mxu3  ;;  %v3170_v28 = vpop.f32.mrf.mxu1 }
 0x309   : > { %v3344_v19 = vadd.f32 %v3343_v31, %v3255_v5  ;;  %v3171_v46 = vadd.f32 %v3170_v28, %v5409_v60 }
 0x30b   : > { %v3433_v11 = vadd.f32 %v3432_v50, %v3344_v19 }
 0x30c   : > { %v3435_v18 = vpop.f32.mrf.mxu0 }
 0x30d   : > { %3469 = vst [vmem:[%s5415_s27 + $0xe8] sm:$0xff] %v3433_v11  ;;  %v3500_v51 = vadd.f32 %v3499_v25, %v3433_v11  ;;  %v3539_v21 = vmul.f32 %v3433_v11, %v3433_v11 }
 0x30e   : > { %v3257_v40 = vpop.f32.mrf.mxu2 }
 0x30f   : > { %v3570_v63 = vadd.f32 %v3569_v43, %v3539_v21  ;;  %v3258_v54 = vadd.f32 %v3257_v40, %v3169_v24 }
 0x310   : > { %v3346_v8 = vpop.f32.mrf.mxu3 }
 0x311   : > { %v3347_v36 = vadd.f32 %v3346_v8, %v3258_v54 }
 0x313   : > { %v3436_v29 = vadd.f32 %v3435_v18, %v3347_v36 }
 0x314   : > { %v3437_v49 = vpop.f32.mrf.mxu0 }
 0x315   : > { %3470 = vst [vmem:[%s5415_s27 + $0xf0] sm:$0xff] %v3436_v29  ;;  %v3501_v14 = vadd.f32 %v3500_v51, %v3436_v29  ;;  %v3540_v38 = vmul.f32 %v3436_v29, %v3436_v29 }
 0x316   : > { %v3259_v17 = vpop.f32.mrf.mxu2 }
 0x317   : > { %v3571_v58 = vadd.f32 %v3570_v63, %v3540_v38  ;;  %v3260_v16 = vadd.f32 %v3259_v17, %v3171_v46 }
 0x318   : > { %v3348_v0 = vpop.f32.mrf.mxu3 }
 0x319   : > { %v3349_v53 = vadd.f32 %v3348_v0, %v3260_v16 }
 0x31b   : > { %v3438_v23 = vadd.f32 %v3437_v49, %v3349_v53 }
 0x31d   : > { %3471 = vst [vmem:[%s5415_s27 + $0xf8] sm:$0xff] %v3438_v23  ;;  %v3502_v2 = vadd.f32 %v3501_v14, %v3438_v23  ;;  %v3541_v7 = vmul.f32 %v3438_v23, %v3438_v23 }
 0x31f   : > { %v3503_v27 = vrot.slane %v3502_v2, 4  ;;  %v3572_v37 = vadd.f32 %v3571_v58, %v3541_v7 }
 0x321   : > { %v3504_v62 = vadd.f32 %v3503_v27, %v3502_v2  ;;  %v3573_v30 = vrot.slane %v3572_v37, 4 }
 0x323   : > { %v3505_v6 = vrot.slane %v3504_v62, 2  ;;  %v3574_v20 = vadd.f32 %v3573_v30, %v3572_v37 }
 0x325   : > { %v3506_v12 = vadd.f32 %v3505_v6, %v3504_v62  ;;  %v3575_v60 = vrot.slane %v3574_v20, 2 }
 0x327   : > { %v3507_v44 = vrot.slane %v3506_v12, 1  ;;  %v3576_v13 = vadd.f32 %v3575_v60, %v3574_v20 }
 0x329   : > { %v3508_v61 = vadd.f32 %v3507_v44, %v3506_v12  ;;  %v3577_v4 = vrot.slane %v3576_v13, 1 }
 0x32b   : > { %3509 = vst [vmem:[%s182_s4] sm:$0x1] %v3508_v61  ;;  %v3578_v59 = vadd.f32 %v3577_v4, %v3576_v13 }
 0x32d   : > { %3579 = vst [vmem:[%s182_s4 + $0x1] sm:$0x1] %v3578_v59 }
 0x32e PF: > { %s14_s12 = sadd.s32 1, %s4800_s12  }
 0x32f   : > { %p11_p5 = scmp.ge.s32.totalorder %s14_s12, 4  }
 0x331   :  { %13 = sbr.rel (!%p11_p5) target bundleno = 1 (0x1), region = 72 }

</bundles_post_ra>
